<compile_context>
chip_gen: v7x
topology: tpu7x:2x2x1
jax: 0.10.0
libtpu: 0.0.40
codegen_flags: <defaults>
</compile_context>

<pallas_src>
import functools

import numpy as np
import jax
import jax.numpy as jnp
from jax.experimental import pallas as pl
from jax.experimental.pallas import tpu as pltpu

ALPHA = 1.2  # Gaussian trial-wavefunction width (deterministic synthetic "parameter")


# ---------------------------------------------------------------------------
# Synthetic wave function / hamiltonian (the callables the module receives).
# ---------------------------------------------------------------------------
def wave_fn(coords):
    # log|psi(R)| = -0.5 * alpha * sum_i |r_i|^2  (Gaussian trial wavefunction)
    return -0.5 * ALPHA * jnp.sum(coords ** 2, axis=(-1, -2))


def hamiltonian_fn(wave_fn_, coords):
    # Closed-form local energy of a 3D harmonic oscillator with the Gaussian
    # trial wavefunction above:
    #   E_loc = -0.5*(lap log|psi| + |grad log|psi||^2) + 0.5*|R|^2
    B, n_e, _ = coords.shape
    r2 = jnp.sum(coords.astype(jnp.float32) ** 2, axis=(1, 2))
    return 1.5 * ALPHA * n_e + (0.5 - 0.5 * ALPHA * ALPHA) * r2


# ---------------------------------------------------------------------------
# In-kernel helpers: exact k-th order statistic via bitwise key bisection.
# ---------------------------------------------------------------------------
def _float_order_key(x):
    """Monotone int32 key: a < b (float32)  <=>  key(a) < key(b) (signed int32)."""
    bits = pltpu.bitcast(x, jnp.int32)
    return jnp.where(bits < 0, bits ^ 0x7FFFFFFF, bits)


def _kth_smallest(x, k, *, nonneg=False):
    """Exact k-th (0-indexed) order statistic over all elements of float32 `x`.

    Builds the order key of the answer bit by bit (MSB->LSB).  Each step is one
    broadcast compare + one cross-lane count; the loop is Python-unrolled with a
    fixed trip count (32 steps signed, 31 steps if all values are non-negative).
    """
    kf = jnp.float32(k)
    if nonneg:
        # Non-negative floats: raw bits are already a monotone non-negative key,
        # sign bit is known to be 0 -> 31 steps, no biased-key transform.
        key = pltpu.bitcast(x, jnp.int32)
        cand = jnp.int32(0)
        for b in range(30, -1, -1):
            trial = cand | (1 << b)
            cnt = jnp.sum((key < trial).astype(jnp.float32))
            cand = jnp.where(cnt <= kf, trial, cand)
        key_k = cand
    else:
        key = _float_order_key(x)
        cand = jnp.int32(0)                   # biased (unsigned-order) key, MSB->LSB
        for b in range(31, -1, -1):
            bit = -(2 ** 31) if b == 31 else (1 << b)
            trial = cand | bit
            trial_key = trial ^ (-(2 ** 31))  # back to signed-key space for the compare
            cnt = jnp.sum((key < trial_key).astype(jnp.float32))
            cand = jnp.where(cnt <= kf, trial, cand)
        key_k = cand ^ (-(2 ** 31))
    # Recover the float value without a scalar bitcast: the k-th smallest is the
    # largest element whose key is <= key_k.
    return jnp.max(jnp.where(key <= key_k, x, -jnp.inf))


# ---------------------------------------------------------------------------
# Shared loss math (median/MAD outlier removal, clipping, mean, unbiased var).
# ---------------------------------------------------------------------------
def _loss_math(e, stats_ref, clipped_ref, mask_ref, *, clip_local_energy,
               remove_outliers, outlier_width):
    n_total = e.size

    if remove_outliers:
        k = (n_total - 1) // 2                 # torch.median == lower median
        median = _kth_smallest(e, k)
        mad = _kth_smallest(jnp.abs(e - median), k, nonneg=True)
        lower = median - outlier_width * mad
        upper = median + outlier_width * mad
        maskf = jnp.logical_and(e >= lower, e <= upper).astype(jnp.float32)
        n_keep = jnp.sum(maskf)
        # torch fallback: if every sample is flagged as an outlier, keep all
        maskf = jnp.where(n_keep > 0.0, maskf, jnp.ones_like(maskf))
        n_keep = jnp.where(n_keep > 0.0, n_keep, jnp.float32(n_total))
    else:
        median = jnp.float32(0.0)
        mad = jnp.float32(0.0)
        maskf = jnp.ones_like(e)
        n_keep = jnp.float32(n_total)

    if clip_local_energy > 0:
        vals = jnp.clip(e, -clip_local_energy, clip_local_energy)
    else:
        vals = e

    mean = jnp.sum(vals * maskf) / n_keep
    ssd = jnp.sum(maskf * (vals - mean) ** 2)
    # torch.var default is unbiased (ddof=1); clamp denominator so a single
    # surviving sample yields 0 instead of inf/NaN.
    var = ssd / jnp.maximum(n_keep - 1.0, 1.0)
    std = jnp.sqrt(var)

    clipped_ref[...] = vals                    # float32, lane-dense
    mask_ref[...] = maskf                      # float32 mask (no in-kernel int cast)

    # Scalar statistics go to SMEM (cheap scalar stores, no masked VMEM store).
    stats_ref[0] = mean                        # loss == mean of kept, clipped energies
    stats_ref[1] = mean
    stats_ref[2] = var
    stats_ref[3] = std
    stats_ref[4] = median
    stats_ref[5] = mad
    stats_ref[6] = jnp.float32(n_total) - n_keep
    stats_ref[7] = n_keep


# ---------------------------------------------------------------------------
# Kernels
# ---------------------------------------------------------------------------
def _fused_vmc_kernel(coords_ref, stats_ref, clipped_ref, mask_ref, *,
                      alpha, n_elec, **cfg):
    c = coords_ref[...]                        # (n_e*3, S, L), batch on lanes
    r2 = jnp.sum(c * c, axis=0)                # (S, L): cross-vreg adds, pure VPU
    e = 1.5 * alpha * n_elec + (0.5 - 0.5 * alpha * alpha) * r2
    _loss_math(e, stats_ref, clipped_ref, mask_ref, **cfg)


def _energies_vmc_kernel(e_ref, stats_ref, clipped_ref, mask_ref, **cfg):
    _loss_math(e_ref[...], stats_ref, clipped_ref, mask_ref, **cfg)


# ---------------------------------------------------------------------------
# Device-side wrappers (fully jit'ed: layout plumbing + pallas_call + aux)
# ---------------------------------------------------------------------------
def _batch_layout(B):
    # Lane-dense layout for the per-walker arrays: fill 128 lanes when possible.
    if B % 128 == 0:
        return B // 128, 128
    return 1, B


def _launch(kernel, x, S, L):
    return pl.pallas_call(
        kernel,
        out_shape=(jax.ShapeDtypeStruct((8,), jnp.float32),     # scalar stats
                   jax.ShapeDtypeStruct((S, L), jnp.float32),   # clipped energies
                   jax.ShapeDtypeStruct((S, L), jnp.float32)),  # keep-mask
        in_specs=[pl.BlockSpec(x.shape, lambda: (0,) * x.ndim)],
        out_specs=(pl.BlockSpec(memory_space=pltpu.MemorySpace.SMEM),
                   pl.BlockSpec((S, L), lambda: (0, 0)),
                   pl.BlockSpec((S, L), lambda: (0, 0))),
    )(x)


def _assemble(stats, clipped, maskf, B):
    loss = stats[0]
    # TODO(synk): PyTorch returns the boolean-filtered (ragged) local_energies;
    # here we return the full-length clipped energies plus the outlier mask
    # (all scalar statistics are computed over the masked subset, matching torch).
    aux = {
        'local_energies': clipped.reshape(B),
        'energy_mean': stats[1],
        'energy_var': stats[2],
        'energy_std': stats[3],
        'outlier_mask': maskf.reshape(B) > 0.5,
        'n_outliers': stats[6].astype(jnp.int32),             # JAX scalar, no host sync
        'effective_batch_size': stats[7].astype(jnp.int32),   # JAX scalar, no host sync
    }
    return loss, aux


def _fused_forward(coords, *, alpha, clip_local_energy, remove_outliers, outlier_width):
    B, n_e, _ = coords.shape
    S, L = _batch_layout(B)
    # Put the batch on the lane axis: (n_e*3, S, L)
    cT = coords.reshape(B, n_e * 3).astype(jnp.float32).T.reshape(n_e * 3, S, L)
    kernel = functools.partial(
        _fused_vmc_kernel, alpha=alpha, n_elec=n_e,
        clip_local_energy=clip_local_energy,
        remove_outliers=remove_outliers, outlier_width=outlier_width)
    stats, clipped, maskf = _launch(kernel, cT, S, L)
    return _assemble(stats, clipped, maskf, B)


def _energies_forward(energies, *, clip_local_energy, remove_outliers, outlier_width):
    B = energies.shape[0]
    S, L = _batch_layout(B)
    e2 = energies.astype(jnp.float32).reshape(S, L)
    kernel = functools.partial(
        _energies_vmc_kernel, clip_local_energy=clip_local_energy,
        remove_outliers=remove_outliers, outlier_width=outlier_width)
    stats, clipped, maskf = _launch(kernel, e2, S, L)
    return _assemble(stats, clipped, maskf, B)


# ---------------------------------------------------------------------------
# Module wrapper (matches the PyTorch VMCLoss forward semantics)
# ---------------------------------------------------------------------------
class VMCLoss:
    def __init__(self, clip_local_energy=5.0, remove_outliers=True, outlier_width=10.0):
        self.clip_local_energy = float(clip_local_energy)
        self.remove_outliers = bool(remove_outliers)
        self.outlier_width = float(outlier_width)
        cfg = dict(clip_local_energy=self.clip_local_energy,
                   remove_outliers=self.remove_outliers,
                   outlier_width=self.outlier_width)
        # jit the whole device-side path (layout plumbing + pallas_call + aux)
        self._fused = jax.jit(functools.partial(_fused_forward, alpha=ALPHA, **cfg))
        self._from_energies = jax.jit(functools.partial(_energies_forward, **cfg))

    def __call__(self, wave_fn_, hamiltonian_fn_, electron_coords):
        if wave_fn_ is wave_fn and hamiltonian_fn_ is hamiltonian_fn:
            # Energy evaluation fused into the loss kernel (single pallas_call).
            return self._fused(electron_coords)
        # Generic path: user-supplied hamiltonian, loss-only kernel.
        energies = hamiltonian_fn_(wave_fn_, electron_coords)
        return self._from_energies(energies)


# ---------------------------------------------------------------------------
# Pure numpy reference (torch semantics) for the correctness check.
# ---------------------------------------------------------------------------
def _reference(energies, clip, remove_outliers, outlier_width):
    e = np.asarray(energies, dtype=np.float64)
    n = e.shape[0]
    mask = np.ones(n, dtype=bool)
    if remove_outliers:
        med = np.sort(e)[(n - 1) // 2]                        # torch lower median
        mad = np.sort(np.abs(e - med))[(n - 1) // 2]
        mask = (e >= med - outlier_width * mad) & (e <= med + outlier_width * mad)
        if mask.sum() > 0:
            e = e[mask]
        else:
            mask = np.ones(n, dtype=bool)
    if clip > 0:
        e = np.clip(e, -clip, clip)
    mean = e.mean()
    var = e.var(ddof=1) if e.size > 1 else 0.0
    return mean, var, mask


if __name__ == "__main__":
    key = jax.random.PRNGKey(0)
    B, N_ELEC = 8, 4
    electron_coords = jax.random.normal(key, (B, N_ELEC, 3), dtype=jnp.float32)

    loss_mod = VMCLoss(clip_local_energy=5.0, remove_outliers=True, outlier_width=10.0)
    loss, aux = loss_mod(wave_fn, hamiltonian_fn, electron_coords)
    jax.block_until_ready(loss)
    jax.block_until_ready(aux['local_energies'])

    # sanity check against a torch-semantics numpy reference
    e_ref = np.asarray(hamiltonian_fn(wave_fn, electron_coords))
    ref_mean, ref_var, ref_mask = _reference(e_ref, 5.0, True, 10.0)
    assert np.allclose(float(loss), ref_mean, rtol=1e-4, atol=1e-4)
    assert np.allclose(float(aux['energy_mean']), ref_mean, rtol=1e-4, atol=1e-4)
    assert np.allclose(float(aux['energy_var']), ref_var, rtol=1e-4, atol=1e-4)
    assert np.array_equal(np.asarray(aux['outlier_mask']), ref_mask)
    assert int(aux['effective_batch_size']) == int(ref_mask.sum())
    assert int(aux['n_outliers']) == int((~ref_mask).sum())

    # also exercise the generic (non-fused) path with a user-supplied hamiltonian
    def shifted_ham(wf, c):
        return hamiltonian_fn(wf, c) + 0.25

    loss2, aux2 = loss_mod(wave_fn, shifted_ham, electron_coords)
    jax.block_until_ready(loss2)
    ref_mean2, ref_var2, _ = _reference(np.asarray(shifted_ham(wave_fn, electron_coords)),
                                        5.0, True, 10.0)
    assert np.allclose(float(loss2), ref_mean2, rtol=1e-4, atol=1e-4)
    assert np.allclose(float(aux2['energy_var']), ref_var2, rtol=1e-4, atol=1e-4)

    print("KERNEL_OK")
</pallas_src>

<mosaic_0001>
module attributes {stable_mosaic.version = 11 : i64} {
  func.func @_fused_vmc_kernel(%arg0: memref<12x1x8xf32, #tpu.memory_space<vmem>>, %arg1: memref<8xf32, #tpu.memory_space<smem>>, %arg2: memref<1x8xf32, #tpu.memory_space<vmem>>, %arg3: memref<1x8xf32, #tpu.memory_space<vmem>>) attributes {dimension_semantics = [], scalar_prefetch = 0 : i64, scratch_operands = 0 : i64, tpu.core_type = #tpu.core_type<tc>} {
    %c0 = arith.constant 0 : index
    %c0_0 = arith.constant 0 : index
    %c0_1 = arith.constant 0 : index
    %0 = vector.load %arg0[%c0, %c0_0, %c0_1] : memref<12x1x8xf32, #tpu.memory_space<vmem>>, vector<12x1x8xf32>
    %1 = arith.mulf %0, %0 : vector<12x1x8xf32>
    %cst = arith.constant dense<0.000000e+00> : vector<1x8xf32>
    %2 = vector.multi_reduction <add>, %1, %cst [0] : vector<12x1x8xf32> to vector<1x8xf32>
    %cst_2 = arith.constant -2.200000e-01 : f32
    %3 = vector.broadcast %cst_2 : f32 to vector<1x8xf32>
    %4 = arith.mulf %3, %2 : vector<1x8xf32>
    %cst_3 = arith.constant 7.1999998 : f32
    %5 = vector.broadcast %cst_3 : f32 to vector<1x8xf32>
    %6 = arith.addf %5, %4 : vector<1x8xf32>
    %7 = tpu.bitcast %6 : vector<1x8xf32> -> vector<1x8xi32>
    %c0_i32 = arith.constant 0 : i32
    %8 = vector.broadcast %c0_i32 : i32 to vector<1x8xi32>
    %9 = arith.cmpi slt, %7, %8 : vector<1x8xi32>
    %c2147483647_i32 = arith.constant 2147483647 : i32
    %10 = vector.broadcast %c2147483647_i32 : i32 to vector<1x8xi32>
    %11 = arith.xori %7, %10 : vector<1x8xi32>
    %12 = arith.select %9, %11, %7 : vector<1x8xi1>, vector<1x8xi32>
    %c0_i32_4 = arith.constant 0 : i32
    %c-2147483648_i32 = arith.constant -2147483648 : i32
    %13 = arith.ori %c0_i32_4, %c-2147483648_i32 : i32
    %c-2147483648_i32_5 = arith.constant -2147483648 : i32
    %14 = arith.xori %13, %c-2147483648_i32_5 : i32
    %15 = vector.broadcast %14 : i32 to vector<1x8xi32>
    %16 = arith.cmpi slt, %12, %15 : vector<1x8xi32>
    %17 = arith.extui %16 : vector<1x8xi1> to vector<1x8xi32>
    %18 = arith.sitofp %17 : vector<1x8xi32> to vector<1x8xf32>
    %19 = vector.shape_cast %18 : vector<1x8xf32> to vector<1x1x8xf32>
    %cst_6 = arith.constant dense<0.000000e+00> : vector<1xf32>
    %20 = vector.multi_reduction <add>, %19, %cst_6 [1, 2] : vector<1x1x8xf32> to vector<1xf32>
    %21 = vector.shape_cast %20 : vector<1xf32> to vector<1x1x1xf32>
    %22 = vector.extract %21[0, 0, 0] : f32 from vector<1x1x1xf32>
    %cst_7 = arith.constant 3.000000e+00 : f32
    %23 = arith.cmpf ole, %22, %cst_7 : f32
    %c0_i32_8 = arith.constant 0 : i32
    %24 = arith.select %23, %13, %c0_i32_8 : i32
    %c1073741824_i32 = arith.constant 1073741824 : i32
    %25 = arith.ori %24, %c1073741824_i32 : i32
    %c-2147483648_i32_9 = arith.constant -2147483648 : i32
    %26 = arith.xori %25, %c-2147483648_i32_9 : i32
    %27 = vector.broadcast %26 : i32 to vector<1x8xi32>
    %28 = arith.cmpi slt, %12, %27 : vector<1x8xi32>
    %29 = arith.extui %28 : vector<1x8xi1> to vector<1x8xi32>
    %30 = arith.sitofp %29 : vector<1x8xi32> to vector<1x8xf32>
    %31 = vector.shape_cast %30 : vector<1x8xf32> to vector<1x1x8xf32>
    %cst_10 = arith.constant dense<0.000000e+00> : vector<1xf32>
    %32 = vector.multi_reduction <add>, %31, %cst_10 [1, 2] : vector<1x1x8xf32> to vector<1xf32>
    %33 = vector.shape_cast %32 : vector<1xf32> to vector<1x1x1xf32>
    %34 = vector.extract %33[0, 0, 0] : f32 from vector<1x1x1xf32>
    %cst_11 = arith.constant 3.000000e+00 : f32
    %35 = arith.cmpf ole, %34, %cst_11 : f32
    %36 = arith.select %35, %25, %24 : i32
    %c536870912_i32 = arith.constant 536870912 : i32
    %37 = arith.ori %36, %c536870912_i32 : i32
    %c-2147483648_i32_12 = arith.constant -2147483648 : i32
    %38 = arith.xori %37, %c-2147483648_i32_12 : i32
    %39 = vector.broadcast %38 : i32 to vector<1x8xi32>
    %40 = arith.cmpi slt, %12, %39 : vector<1x8xi32>
    %41 = arith.extui %40 : vector<1x8xi1> to vector<1x8xi32>
    %42 = arith.sitofp %41 : vector<1x8xi32> to vector<1x8xf32>
    %43 = vector.shape_cast %42 : vector<1x8xf32> to vector<1x1x8xf32>
    %cst_13 = arith.constant dense<0.000000e+00> : vector<1xf32>
    %44 = vector.multi_reduction <add>, %43, %cst_13 [1, 2] : vector<1x1x8xf32> to vector<1xf32>
    %45 = vector.shape_cast %44 : vector<1xf32> to vector<1x1x1xf32>
    %46 = vector.extract %45[0, 0, 0] : f32 from vector<1x1x1xf32>
    %cst_14 = arith.constant 3.000000e+00 : f32
    %47 = arith.cmpf ole, %46, %cst_14 : f32
    %48 = arith.select %47, %37, %36 : i32
    %c268435456_i32 = arith.constant 268435456 : i32
    %49 = arith.ori %48, %c268435456_i32 : i32
    %c-2147483648_i32_15 = arith.constant -2147483648 : i32
    %50 = arith.xori %49, %c-2147483648_i32_15 : i32
    %51 = vector.broadcast %50 : i32 to vector<1x8xi32>
    %52 = arith.cmpi slt, %12, %51 : vector<1x8xi32>
    %53 = arith.extui %52 : vector<1x8xi1> to vector<1x8xi32>
    %54 = arith.sitofp %53 : vector<1x8xi32> to vector<1x8xf32>
    %55 = vector.shape_cast %54 : vector<1x8xf32> to vector<1x1x8xf32>
    %cst_16 = arith.constant dense<0.000000e+00> : vector<1xf32>
    %56 = vector.multi_reduction <add>, %55, %cst_16 [1, 2] : vector<1x1x8xf32> to vector<1xf32>
    %57 = vector.shape_cast %56 : vector<1xf32> to vector<1x1x1xf32>
    %58 = vector.extract %57[0, 0, 0] : f32 from vector<1x1x1xf32>
    %cst_17 = arith.constant 3.000000e+00 : f32
    %59 = arith.cmpf ole, %58, %cst_17 : f32
    %60 = arith.select %59, %49, %48 : i32
    %c134217728_i32 = arith.constant 134217728 : i32
    %61 = arith.ori %60, %c134217728_i32 : i32
    %c-2147483648_i32_18 = arith.constant -2147483648 : i32
    %62 = arith.xori %61, %c-2147483648_i32_18 : i32
    %63 = vector.broadcast %62 : i32 to vector<1x8xi32>
    %64 = arith.cmpi slt, %12, %63 : vector<1x8xi32>
    %65 = arith.extui %64 : vector<1x8xi1> to vector<1x8xi32>
    %66 = arith.sitofp %65 : vector<1x8xi32> to vector<1x8xf32>
    %67 = vector.shape_cast %66 : vector<1x8xf32> to vector<1x1x8xf32>
    %cst_19 = arith.constant dense<0.000000e+00> : vector<1xf32>
    %68 = vector.multi_reduction <add>, %67, %cst_19 [1, 2] : vector<1x1x8xf32> to vector<1xf32>
    %69 = vector.shape_cast %68 : vector<1xf32> to vector<1x1x1xf32>
    %70 = vector.extract %69[0, 0, 0] : f32 from vector<1x1x1xf32>
    %cst_20 = arith.constant 3.000000e+00 : f32
    %71 = arith.cmpf ole, %70, %cst_20 : f32
    %72 = arith.select %71, %61, %60 : i32
    %c67108864_i32 = arith.constant 67108864 : i32
    %73 = arith.ori %72, %c67108864_i32 : i32
    %c-2147483648_i32_21 = arith.constant -2147483648 : i32
    %74 = arith.xori %73, %c-2147483648_i32_21 : i32
    %75 = vector.broadcast %74 : i32 to vector<1x8xi32>
    %76 = arith.cmpi slt, %12, %75 : vector<1x8xi32>
    %77 = arith.extui %76 : vector<1x8xi1> to vector<1x8xi32>
    %78 = arith.sitofp %77 : vector<1x8xi32> to vector<1x8xf32>
    %79 = vector.shape_cast %78 : vector<1x8xf32> to vector<1x1x8xf32>
    %cst_22 = arith.constant dense<0.000000e+00> : vector<1xf32>
    %80 = vector.multi_reduction <add>, %79, %cst_22 [1, 2] : vector<1x1x8xf32> to vector<1xf32>
    %81 = vector.shape_cast %80 : vector<1xf32> to vector<1x1x1xf32>
    %82 = vector.extract %81[0, 0, 0] : f32 from vector<1x1x1xf32>
    %cst_23 = arith.constant 3.000000e+00 : f32
    %83 = arith.cmpf ole, %82, %cst_23 : f32
    %84 = arith.select %83, %73, %72 : i32
    %c33554432_i32 = arith.constant 33554432 : i32
    %85 = arith.ori %84, %c33554432_i32 : i32
    %c-2147483648_i32_24 = arith.constant -2147483648 : i32
    %86 = arith.xori %85, %c-2147483648_i32_24 : i32
    %87 = vector.broadcast %86 : i32 to vector<1x8xi32>
    %88 = arith.cmpi slt, %12, %87 : vector<1x8xi32>
    %89 = arith.extui %88 : vector<1x8xi1> to vector<1x8xi32>
    %90 = arith.sitofp %89 : vector<1x8xi32> to vector<1x8xf32>
    %91 = vector.shape_cast %90 : vector<1x8xf32> to vector<1x1x8xf32>
    %cst_25 = arith.constant dense<0.000000e+00> : vector<1xf32>
    %92 = vector.multi_reduction <add>, %91, %cst_25 [1, 2] : vector<1x1x8xf32> to vector<1xf32>
    %93 = vector.shape_cast %92 : vector<1xf32> to vector<1x1x1xf32>
    %94 = vector.extract %93[0, 0, 0] : f32 from vector<1x1x1xf32>
    %cst_26 = arith.constant 3.000000e+00 : f32
    %95 = arith.cmpf ole, %94, %cst_26 : f32
    %96 = arith.select %95, %85, %84 : i32
    %c16777216_i32 = arith.constant 16777216 : i32
    %97 = arith.ori %96, %c16777216_i32 : i32
    %c-2147483648_i32_27 = arith.constant -2147483648 : i32
    %98 = arith.xori %97, %c-2147483648_i32_27 : i32
    %99 = vector.broadcast %98 : i32 to vector<1x8xi32>
    %100 = arith.cmpi slt, %12, %99 : vector<1x8xi32>
    %101 = arith.extui %100 : vector<1x8xi1> to vector<1x8xi32>
    %102 = arith.sitofp %101 : vector<1x8xi32> to vector<1x8xf32>
    %103 = vector.shape_cast %102 : vector<1x8xf32> to vector<1x1x8xf32>
    %cst_28 = arith.constant dense<0.000000e+00> : vector<1xf32>
    %104 = vector.multi_reduction <add>, %103, %cst_28 [1, 2] : vector<1x1x8xf32> to vector<1xf32>
    %105 = vector.shape_cast %104 : vector<1xf32> to vector<1x1x1xf32>
    %106 = vector.extract %105[0, 0, 0] : f32 from vector<1x1x1xf32>
    %cst_29 = arith.constant 3.000000e+00 : f32
    %107 = arith.cmpf ole, %106, %cst_29 : f32
    %108 = arith.select %107, %97, %96 : i32
    %c8388608_i32 = arith.constant 8388608 : i32
    %109 = arith.ori %108, %c8388608_i32 : i32
    %c-2147483648_i32_30 = arith.constant -2147483648 : i32
    %110 = arith.xori %109, %c-2147483648_i32_30 : i32
    %111 = vector.broadcast %110 : i32 to vector<1x8xi32>
    %112 = arith.cmpi slt, %12, %111 : vector<1x8xi32>
    %113 = arith.extui %112 : vector<1x8xi1> to vector<1x8xi32>
    %114 = arith.sitofp %113 : vector<1x8xi32> to vector<1x8xf32>
    %115 = vector.shape_cast %114 : vector<1x8xf32> to vector<1x1x8xf32>
    %cst_31 = arith.constant dense<0.000000e+00> : vector<1xf32>
    %116 = vector.multi_reduction <add>, %115, %cst_31 [1, 2] : vector<1x1x8xf32> to vector<1xf32>
    %117 = vector.shape_cast %116 : vector<1xf32> to vector<1x1x1xf32>
    %118 = vector.extract %117[0, 0, 0] : f32 from vector<1x1x1xf32>
    %cst_32 = arith.constant 3.000000e+00 : f32
    %119 = arith.cmpf ole, %118, %cst_32 : f32
    %120 = arith.select %119, %109, %108 : i32
    %c4194304_i32 = arith.constant 4194304 : i32
    %121 = arith.ori %120, %c4194304_i32 : i32
    %c-2147483648_i32_33 = arith.constant -2147483648 : i32
    %122 = arith.xori %121, %c-2147483648_i32_33 : i32
    %123 = vector.broadcast %122 : i32 to vector<1x8xi32>
    %124 = arith.cmpi slt, %12, %123 : vector<1x8xi32>
    %125 = arith.extui %124 : vector<1x8xi1> to vector<1x8xi32>
    %126 = arith.sitofp %125 : vector<1x8xi32> to vector<1x8xf32>
    %127 = vector.shape_cast %126 : vector<1x8xf32> to vector<1x1x8xf32>
    %cst_34 = arith.constant dense<0.000000e+00> : vector<1xf32>
    %128 = vector.multi_reduction <add>, %127, %cst_34 [1, 2] : vector<1x1x8xf32> to vector<1xf32>
    %129 = vector.shape_cast %128 : vector<1xf32> to vector<1x1x1xf32>
    %130 = vector.extract %129[0, 0, 0] : f32 from vector<1x1x1xf32>
    %cst_35 = arith.constant 3.000000e+00 : f32
    %131 = arith.cmpf ole, %130, %cst_35 : f32
    %132 = arith.select %131, %121, %120 : i32
    %c2097152_i32 = arith.constant 2097152 : i32
    %133 = arith.ori %132, %c2097152_i32 : i32
    %c-2147483648_i32_36 = arith.constant -2147483648 : i32
    %134 = arith.xori %133, %c-2147483648_i32_36 : i32
    %135 = vector.broadcast %134 : i32 to vector<1x8xi32>
    %136 = arith.cmpi slt, %12, %135 : vector<1x8xi32>
    %137 = arith.extui %136 : vector<1x8xi1> to vector<1x8xi32>
    %138 = arith.sitofp %137 : vector<1x8xi32> to vector<1x8xf32>
    %139 = vector.shape_cast %138 : vector<1x8xf32> to vector<1x1x8xf32>
    %cst_37 = arith.constant dense<0.000000e+00> : vector<1xf32>
    %140 = vector.multi_reduction <add>, %139, %cst_37 [1, 2] : vector<1x1x8xf32> to vector<1xf32>
    %141 = vector.shape_cast %140 : vector<1xf32> to vector<1x1x1xf32>
    %142 = vector.extract %141[0, 0, 0] : f32 from vector<1x1x1xf32>
    %cst_38 = arith.constant 3.000000e+00 : f32
    %143 = arith.cmpf ole, %142, %cst_38 : f32
    %144 = arith.select %143, %133, %132 : i32
    %c1048576_i32 = arith.constant 1048576 : i32
    %145 = arith.ori %144, %c1048576_i32 : i32
    %c-2147483648_i32_39 = arith.constant -2147483648 : i32
    %146 = arith.xori %145, %c-2147483648_i32_39 : i32
    %147 = vector.broadcast %146 : i32 to vector<1x8xi32>
    %148 = arith.cmpi slt, %12, %147 : vector<1x8xi32>
    %149 = arith.extui %148 : vector<1x8xi1> to vector<1x8xi32>
    %150 = arith.sitofp %149 : vector<1x8xi32> to vector<1x8xf32>
    %151 = vector.shape_cast %150 : vector<1x8xf32> to vector<1x1x8xf32>
    %cst_40 = arith.constant dense<0.000000e+00> : vector<1xf32>
    %152 = vector.multi_reduction <add>, %151, %cst_40 [1, 2] : vector<1x1x8xf32> to vector<1xf32>
    %153 = vector.shape_cast %152 : vector<1xf32> to vector<1x1x1xf32>
    %154 = vector.extract %153[0, 0, 0] : f32 from vector<1x1x1xf32>
    %cst_41 = arith.constant 3.000000e+00 : f32
    %155 = arith.cmpf ole, %154, %cst_41 : f32
    %156 = arith.select %155, %145, %144 : i32
    %c524288_i32 = arith.constant 524288 : i32
    %157 = arith.ori %156, %c524288_i32 : i32
    %c-2147483648_i32_42 = arith.constant -2147483648 : i32
    %158 = arith.xori %157, %c-2147483648_i32_42 : i32
    %159 = vector.broadcast %158 : i32 to vector<1x8xi32>
    %160 = arith.cmpi slt, %12, %159 : vector<1x8xi32>
    %161 = arith.extui %160 : vector<1x8xi1> to vector<1x8xi32>
    %162 = arith.sitofp %161 : vector<1x8xi32> to vector<1x8xf32>
    %163 = vector.shape_cast %162 : vector<1x8xf32> to vector<1x1x8xf32>
    %cst_43 = arith.constant dense<0.000000e+00> : vector<1xf32>
    %164 = vector.multi_reduction <add>, %163, %cst_43 [1, 2] : vector<1x1x8xf32> to vector<1xf32>
    %165 = vector.shape_cast %164 : vector<1xf32> to vector<1x1x1xf32>
    %166 = vector.extract %165[0, 0, 0] : f32 from vector<1x1x1xf32>
    %cst_44 = arith.constant 3.000000e+00 : f32
    %167 = arith.cmpf ole, %166, %cst_44 : f32
    %168 = arith.select %167, %157, %156 : i32
    %c262144_i32 = arith.constant 262144 : i32
    %169 = arith.ori %168, %c262144_i32 : i32
    %c-2147483648_i32_45 = arith.constant -2147483648 : i32
    %170 = arith.xori %169, %c-2147483648_i32_45 : i32
    %171 = vector.broadcast %170 : i32 to vector<1x8xi32>
    %172 = arith.cmpi slt, %12, %171 : vector<1x8xi32>
    %173 = arith.extui %172 : vector<1x8xi1> to vector<1x8xi32>
    %174 = arith.sitofp %173 : vector<1x8xi32> to vector<1x8xf32>
    %175 = vector.shape_cast %174 : vector<1x8xf32> to vector<1x1x8xf32>
    %cst_46 = arith.constant dense<0.000000e+00> : vector<1xf32>
    %176 = vector.multi_reduction <add>, %175, %cst_46 [1, 2] : vector<1x1x8xf32> to vector<1xf32>
    %177 = vector.shape_cast %176 : vector<1xf32> to vector<1x1x1xf32>
    %178 = vector.extract %177[0, 0, 0] : f32 from vector<1x1x1xf32>
    %cst_47 = arith.constant 3.000000e+00 : f32
    %179 = arith.cmpf ole, %178, %cst_47 : f32
    %180 = arith.select %179, %169, %168 : i32
    %c131072_i32 = arith.constant 131072 : i32
    %181 = arith.ori %180, %c131072_i32 : i32
    %c-2147483648_i32_48 = arith.constant -2147483648 : i32
    %182 = arith.xori %181, %c-2147483648_i32_48 : i32
    %183 = vector.broadcast %182 : i32 to vector<1x8xi32>
    %184 = arith.cmpi slt, %12, %183 : vector<1x8xi32>
    %185 = arith.extui %184 : vector<1x8xi1> to vector<1x8xi32>
    %186 = arith.sitofp %185 : vector<1x8xi32> to vector<1x8xf32>
    %187 = vector.shape_cast %186 : vector<1x8xf32> to vector<1x1x8xf32>
    %cst_49 = arith.constant dense<0.000000e+00> : vector<1xf32>
    %188 = vector.multi_reduction <add>, %187, %cst_49 [1, 2] : vector<1x1x8xf32> to vector<1xf32>
    %189 = vector.shape_cast %188 : vector<1xf32> to vector<1x1x1xf32>
    %190 = vector.extract %189[0, 0, 0] : f32 from vector<1x1x1xf32>
    %cst_50 = arith.constant 3.000000e+00 : f32
    %191 = arith.cmpf ole, %190, %cst_50 : f32
    %192 = arith.select %191, %181, %180 : i32
    %c65536_i32 = arith.constant 65536 : i32
    %193 = arith.ori %192, %c65536_i32 : i32
    %c-2147483648_i32_51 = arith.constant -2147483648 : i32
    %194 = arith.xori %193, %c-2147483648_i32_51 : i32
    %195 = vector.broadcast %194 : i32 to vector<1x8xi32>
    %196 = arith.cmpi slt, %12, %195 : vector<1x8xi32>
    %197 = arith.extui %196 : vector<1x8xi1> to vector<1x8xi32>
    %198 = arith.sitofp %197 : vector<1x8xi32> to vector<1x8xf32>
    %199 = vector.shape_cast %198 : vector<1x8xf32> to vector<1x1x8xf32>
    %cst_52 = arith.constant dense<0.000000e+00> : vector<1xf32>
    %200 = vector.multi_reduction <add>, %199, %cst_52 [1, 2] : vector<1x1x8xf32> to vector<1xf32>
    %201 = vector.shape_cast %200 : vector<1xf32> to vector<1x1x1xf32>
    %202 = vector.extract %201[0, 0, 0] : f32 from vector<1x1x1xf32>
    %cst_53 = arith.constant 3.000000e+00 : f32
    %203 = arith.cmpf ole, %202, %cst_53 : f32
    %204 = arith.select %203, %193, %192 : i32
    %c32768_i32 = arith.constant 32768 : i32
    %205 = arith.ori %204, %c32768_i32 : i32
    %c-2147483648_i32_54 = arith.constant -2147483648 : i32
    %206 = arith.xori %205, %c-2147483648_i32_54 : i32
    %207 = vector.broadcast %206 : i32 to vector<1x8xi32>
    %208 = arith.cmpi slt, %12, %207 : vector<1x8xi32>
    %209 = arith.extui %208 : vector<1x8xi1> to vector<1x8xi32>
    %210 = arith.sitofp %209 : vector<1x8xi32> to vector<1x8xf32>
    %211 = vector.shape_cast %210 : vector<1x8xf32> to vector<1x1x8xf32>
    %cst_55 = arith.constant dense<0.000000e+00> : vector<1xf32>
    %212 = vector.multi_reduction <add>, %211, %cst_55 [1, 2] : vector<1x1x8xf32> to vector<1xf32>
    %213 = vector.shape_cast %212 : vector<1xf32> to vector<1x1x1xf32>
    %214 = vector.extract %213[0, 0, 0] : f32 from vector<1x1x1xf32>
    %cst_56 = arith.constant 3.000000e+00 : f32
    %215 = arith.cmpf ole, %214, %cst_56 : f32
    %216 = arith.select %215, %205, %204 : i32
    %c16384_i32 = arith.constant 16384 : i32
    %217 = arith.ori %216, %c16384_i32 : i32
    %c-2147483648_i32_57 = arith.constant -2147483648 : i32
    %218 = arith.xori %217, %c-2147483648_i32_57 : i32
    %219 = vector.broadcast %218 : i32 to vector<1x8xi32>
    %220 = arith.cmpi slt, %12, %219 : vector<1x8xi32>
    %221 = arith.extui %220 : vector<1x8xi1> to vector<1x8xi32>
    %222 = arith.sitofp %221 : vector<1x8xi32> to vector<1x8xf32>
    %223 = vector.shape_cast %222 : vector<1x8xf32> to vector<1x1x8xf32>
    %cst_58 = arith.constant dense<0.000000e+00> : vector<1xf32>
    %224 = vector.multi_reduction <add>, %223, %cst_58 [1, 2] : vector<1x1x8xf32> to vector<1xf32>
    %225 = vector.shape_cast %224 : vector<1xf32> to vector<1x1x1xf32>
    %226 = vector.extract %225[0, 0, 0] : f32 from vector<1x1x1xf32>
    %cst_59 = arith.constant 3.000000e+00 : f32
    %227 = arith.cmpf ole, %226, %cst_59 : f32
    %228 = arith.select %227, %217, %216 : i32
    %c8192_i32 = arith.constant 8192 : i32
    %229 = arith.ori %228, %c8192_i32 : i32
    %c-2147483648_i32_60 = arith.constant -2147483648 : i32
    %230 = arith.xori %229, %c-2147483648_i32_60 : i32
    %231 = vector.broadcast %230 : i32 to vector<1x8xi32>
    %232 = arith.cmpi slt, %12, %231 : vector<1x8xi32>
    %233 = arith.extui %232 : vector<1x8xi1> to vector<1x8xi32>
    %234 = arith.sitofp %233 : vector<1x8xi32> to vector<1x8xf32>
    %235 = vector.shape_cast %234 : vector<1x8xf32> to vector<1x1x8xf32>
    %cst_61 = arith.constant dense<0.000000e+00> : vector<1xf32>
    %236 = vector.multi_reduction <add>, %235, %cst_61 [1, 2] : vector<1x1x8xf32> to vector<1xf32>
    %237 = vector.shape_cast %236 : vector<1xf32> to vector<1x1x1xf32>
    %238 = vector.extract %237[0, 0, 0] : f32 from vector<1x1x1xf32>
    %cst_62 = arith.constant 3.000000e+00 : f32
    %239 = arith.cmpf ole, %238, %cst_62 : f32
    %240 = arith.select %239, %229, %228 : i32
    %c4096_i32 = arith.constant 4096 : i32
    %241 = arith.ori %240, %c4096_i32 : i32
    %c-2147483648_i32_63 = arith.constant -2147483648 : i32
    %242 = arith.xori %241, %c-2147483648_i32_63 : i32
    %243 = vector.broadcast %242 : i32 to vector<1x8xi32>
    %244 = arith.cmpi slt, %12, %243 : vector<1x8xi32>
    %245 = arith.extui %244 : vector<1x8xi1> to vector<1x8xi32>
    %246 = arith.sitofp %245 : vector<1x8xi32> to vector<1x8xf32>
    %247 = vector.shape_cast %246 : vector<1x8xf32> to vector<1x1x8xf32>
    %cst_64 = arith.constant dense<0.000000e+00> : vector<1xf32>
    %248 = vector.multi_reduction <add>, %247, %cst_64 [1, 2] : vector<1x1x8xf32> to vector<1xf32>
    %249 = vector.shape_cast %248 : vector<1xf32> to vector<1x1x1xf32>
    %250 = vector.extract %249[0, 0, 0] : f32 from vector<1x1x1xf32>
    %cst_65 = arith.constant 3.000000e+00 : f32
    %251 = arith.cmpf ole, %250, %cst_65 : f32
    %252 = arith.select %251, %241, %240 : i32
    %c2048_i32 = arith.constant 2048 : i32
    %253 = arith.ori %252, %c2048_i32 : i32
    %c-2147483648_i32_66 = arith.constant -2147483648 : i32
    %254 = arith.xori %253, %c-2147483648_i32_66 : i32
    %255 = vector.broadcast %254 : i32 to vector<1x8xi32>
    %256 = arith.cmpi slt, %12, %255 : vector<1x8xi32>
    %257 = arith.extui %256 : vector<1x8xi1> to vector<1x8xi32>
    %258 = arith.sitofp %257 : vector<1x8xi32> to vector<1x8xf32>
    %259 = vector.shape_cast %258 : vector<1x8xf32> to vector<1x1x8xf32>
    %cst_67 = arith.constant dense<0.000000e+00> : vector<1xf32>
    %260 = vector.multi_reduction <add>, %259, %cst_67 [1, 2] : vector<1x1x8xf32> to vector<1xf32>
    %261 = vector.shape_cast %260 : vector<1xf32> to vector<1x1x1xf32>
    %262 = vector.extract %261[0, 0, 0] : f32 from vector<1x1x1xf32>
    %cst_68 = arith.constant 3.000000e+00 : f32
    %263 = arith.cmpf ole, %262, %cst_68 : f32
    %264 = arith.select %263, %253, %252 : i32
    %c1024_i32 = arith.constant 1024 : i32
    %265 = arith.ori %264, %c1024_i32 : i32
    %c-2147483648_i32_69 = arith.constant -2147483648 : i32
    %266 = arith.xori %265, %c-2147483648_i32_69 : i32
    %267 = vector.broadcast %266 : i32 to vector<1x8xi32>
    %268 = arith.cmpi slt, %12, %267 : vector<1x8xi32>
    %269 = arith.extui %268 : vector<1x8xi1> to vector<1x8xi32>
    %270 = arith.sitofp %269 : vector<1x8xi32> to vector<1x8xf32>
    %271 = vector.shape_cast %270 : vector<1x8xf32> to vector<1x1x8xf32>
    %cst_70 = arith.constant dense<0.000000e+00> : vector<1xf32>
    %272 = vector.multi_reduction <add>, %271, %cst_70 [1, 2] : vector<1x1x8xf32> to vector<1xf32>
    %273 = vector.shape_cast %272 : vector<1xf32> to vector<1x1x1xf32>
    %274 = vector.extract %273[0, 0, 0] : f32 from vector<1x1x1xf32>
    %cst_71 = arith.constant 3.000000e+00 : f32
    %275 = arith.cmpf ole, %274, %cst_71 : f32
    %276 = arith.select %275, %265, %264 : i32
    %c512_i32 = arith.constant 512 : i32
    %277 = arith.ori %276, %c512_i32 : i32
    %c-2147483648_i32_72 = arith.constant -2147483648 : i32
    %278 = arith.xori %277, %c-2147483648_i32_72 : i32
    %279 = vector.broadcast %278 : i32 to vector<1x8xi32>
    %280 = arith.cmpi slt, %12, %279 : vector<1x8xi32>
    %281 = arith.extui %280 : vector<1x8xi1> to vector<1x8xi32>
    %282 = arith.sitofp %281 : vector<1x8xi32> to vector<1x8xf32>
    %283 = vector.shape_cast %282 : vector<1x8xf32> to vector<1x1x8xf32>
    %cst_73 = arith.constant dense<0.000000e+00> : vector<1xf32>
    %284 = vector.multi_reduction <add>, %283, %cst_73 [1, 2] : vector<1x1x8xf32> to vector<1xf32>
    %285 = vector.shape_cast %284 : vector<1xf32> to vector<1x1x1xf32>
    %286 = vector.extract %285[0, 0, 0] : f32 from vector<1x1x1xf32>
    %cst_74 = arith.constant 3.000000e+00 : f32
    %287 = arith.cmpf ole, %286, %cst_74 : f32
    %288 = arith.select %287, %277, %276 : i32
    %c256_i32 = arith.constant 256 : i32
    %289 = arith.ori %288, %c256_i32 : i32
    %c-2147483648_i32_75 = arith.constant -2147483648 : i32
    %290 = arith.xori %289, %c-2147483648_i32_75 : i32
    %291 = vector.broadcast %290 : i32 to vector<1x8xi32>
    %292 = arith.cmpi slt, %12, %291 : vector<1x8xi32>
    %293 = arith.extui %292 : vector<1x8xi1> to vector<1x8xi32>
    %294 = arith.sitofp %293 : vector<1x8xi32> to vector<1x8xf32>
    %295 = vector.shape_cast %294 : vector<1x8xf32> to vector<1x1x8xf32>
    %cst_76 = arith.constant dense<0.000000e+00> : vector<1xf32>
    %296 = vector.multi_reduction <add>, %295, %cst_76 [1, 2] : vector<1x1x8xf32> to vector<1xf32>
    %297 = vector.shape_cast %296 : vector<1xf32> to vector<1x1x1xf32>
    %298 = vector.extract %297[0, 0, 0] : f32 from vector<1x1x1xf32>
    %cst_77 = arith.constant 3.000000e+00 : f32
    %299 = arith.cmpf ole, %298, %cst_77 : f32
    %300 = arith.select %299, %289, %288 : i32
    %c128_i32 = arith.constant 128 : i32
    %301 = arith.ori %300, %c128_i32 : i32
    %c-2147483648_i32_78 = arith.constant -2147483648 : i32
    %302 = arith.xori %301, %c-2147483648_i32_78 : i32
    %303 = vector.broadcast %302 : i32 to vector<1x8xi32>
    %304 = arith.cmpi slt, %12, %303 : vector<1x8xi32>
    %305 = arith.extui %304 : vector<1x8xi1> to vector<1x8xi32>
    %306 = arith.sitofp %305 : vector<1x8xi32> to vector<1x8xf32>
    %307 = vector.shape_cast %306 : vector<1x8xf32> to vector<1x1x8xf32>
    %cst_79 = arith.constant dense<0.000000e+00> : vector<1xf32>
    %308 = vector.multi_reduction <add>, %307, %cst_79 [1, 2] : vector<1x1x8xf32> to vector<1xf32>
    %309 = vector.shape_cast %308 : vector<1xf32> to vector<1x1x1xf32>
    %310 = vector.extract %309[0, 0, 0] : f32 from vector<1x1x1xf32>
    %cst_80 = arith.constant 3.000000e+00 : f32
    %311 = arith.cmpf ole, %310, %cst_80 : f32
    %312 = arith.select %311, %301, %300 : i32
    %c64_i32 = arith.constant 64 : i32
    %313 = arith.ori %312, %c64_i32 : i32
    %c-2147483648_i32_81 = arith.constant -2147483648 : i32
    %314 = arith.xori %313, %c-2147483648_i32_81 : i32
    %315 = vector.broadcast %314 : i32 to vector<1x8xi32>
    %316 = arith.cmpi slt, %12, %315 : vector<1x8xi32>
    %317 = arith.extui %316 : vector<1x8xi1> to vector<1x8xi32>
    %318 = arith.sitofp %317 : vector<1x8xi32> to vector<1x8xf32>
    %319 = vector.shape_cast %318 : vector<1x8xf32> to vector<1x1x8xf32>
    %cst_82 = arith.constant dense<0.000000e+00> : vector<1xf32>
    %320 = vector.multi_reduction <add>, %319, %cst_82 [1, 2] : vector<1x1x8xf32> to vector<1xf32>
    %321 = vector.shape_cast %320 : vector<1xf32> to vector<1x1x1xf32>
    %322 = vector.extract %321[0, 0, 0] : f32 from vector<1x1x1xf32>
    %cst_83 = arith.constant 3.000000e+00 : f32
    %323 = arith.cmpf ole, %322, %cst_83 : f32
    %324 = arith.select %323, %313, %312 : i32
    %c32_i32 = arith.constant 32 : i32
    %325 = arith.ori %324, %c32_i32 : i32
    %c-2147483648_i32_84 = arith.constant -2147483648 : i32
    %326 = arith.xori %325, %c-2147483648_i32_84 : i32
    %327 = vector.broadcast %326 : i32 to vector<1x8xi32>
    %328 = arith.cmpi slt, %12, %327 : vector<1x8xi32>
    %329 = arith.extui %328 : vector<1x8xi1> to vector<1x8xi32>
    %330 = arith.sitofp %329 : vector<1x8xi32> to vector<1x8xf32>
    %331 = vector.shape_cast %330 : vector<1x8xf32> to vector<1x1x8xf32>
    %cst_85 = arith.constant dense<0.000000e+00> : vector<1xf32>
    %332 = vector.multi_reduction <add>, %331, %cst_85 [1, 2] : vector<1x1x8xf32> to vector<1xf32>
    %333 = vector.shape_cast %332 : vector<1xf32> to vector<1x1x1xf32>
    %334 = vector.extract %333[0, 0, 0] : f32 from vector<1x1x1xf32>
    %cst_86 = arith.constant 3.000000e+00 : f32
    %335 = arith.cmpf ole, %334, %cst_86 : f32
    %336 = arith.select %335, %325, %324 : i32
    %c16_i32 = arith.constant 16 : i32
    %337 = arith.ori %336, %c16_i32 : i32
    %c-2147483648_i32_87 = arith.constant -2147483648 : i32
    %338 = arith.xori %337, %c-2147483648_i32_87 : i32
    %339 = vector.broadcast %338 : i32 to vector<1x8xi32>
    %340 = arith.cmpi slt, %12, %339 : vector<1x8xi32>
    %341 = arith.extui %340 : vector<1x8xi1> to vector<1x8xi32>
    %342 = arith.sitofp %341 : vector<1x8xi32> to vector<1x8xf32>
    %343 = vector.shape_cast %342 : vector<1x8xf32> to vector<1x1x8xf32>
    %cst_88 = arith.constant dense<0.000000e+00> : vector<1xf32>
    %344 = vector.multi_reduction <add>, %343, %cst_88 [1, 2] : vector<1x1x8xf32> to vector<1xf32>
    %345 = vector.shape_cast %344 : vector<1xf32> to vector<1x1x1xf32>
    %346 = vector.extract %345[0, 0, 0] : f32 from vector<1x1x1xf32>
    %cst_89 = arith.constant 3.000000e+00 : f32
    %347 = arith.cmpf ole, %346, %cst_89 : f32
    %348 = arith.select %347, %337, %336 : i32
    %c8_i32 = arith.constant 8 : i32
    %349 = arith.ori %348, %c8_i32 : i32
    %c-2147483648_i32_90 = arith.constant -2147483648 : i32
    %350 = arith.xori %349, %c-2147483648_i32_90 : i32
    %351 = vector.broadcast %350 : i32 to vector<1x8xi32>
    %352 = arith.cmpi slt, %12, %351 : vector<1x8xi32>
    %353 = arith.extui %352 : vector<1x8xi1> to vector<1x8xi32>
    %354 = arith.sitofp %353 : vector<1x8xi32> to vector<1x8xf32>
    %355 = vector.shape_cast %354 : vector<1x8xf32> to vector<1x1x8xf32>
    %cst_91 = arith.constant dense<0.000000e+00> : vector<1xf32>
    %356 = vector.multi_reduction <add>, %355, %cst_91 [1, 2] : vector<1x1x8xf32> to vector<1xf32>
    %357 = vector.shape_cast %356 : vector<1xf32> to vector<1x1x1xf32>
    %358 = vector.extract %357[0, 0, 0] : f32 from vector<1x1x1xf32>
    %cst_92 = arith.constant 3.000000e+00 : f32
    %359 = arith.cmpf ole, %358, %cst_92 : f32
    %360 = arith.select %359, %349, %348 : i32
    %c4_i32 = arith.constant 4 : i32
    %361 = arith.ori %360, %c4_i32 : i32
    %c-2147483648_i32_93 = arith.constant -2147483648 : i32
    %362 = arith.xori %361, %c-2147483648_i32_93 : i32
    %363 = vector.broadcast %362 : i32 to vector<1x8xi32>
    %364 = arith.cmpi slt, %12, %363 : vector<1x8xi32>
    %365 = arith.extui %364 : vector<1x8xi1> to vector<1x8xi32>
    %366 = arith.sitofp %365 : vector<1x8xi32> to vector<1x8xf32>
    %367 = vector.shape_cast %366 : vector<1x8xf32> to vector<1x1x8xf32>
    %cst_94 = arith.constant dense<0.000000e+00> : vector<1xf32>
    %368 = vector.multi_reduction <add>, %367, %cst_94 [1, 2] : vector<1x1x8xf32> to vector<1xf32>
    %369 = vector.shape_cast %368 : vector<1xf32> to vector<1x1x1xf32>
    %370 = vector.extract %369[0, 0, 0] : f32 from vector<1x1x1xf32>
    %cst_95 = arith.constant 3.000000e+00 : f32
    %371 = arith.cmpf ole, %370, %cst_95 : f32
    %372 = arith.select %371, %361, %360 : i32
    %c2_i32 = arith.constant 2 : i32
    %373 = arith.ori %372, %c2_i32 : i32
    %c-2147483648_i32_96 = arith.constant -2147483648 : i32
    %374 = arith.xori %373, %c-2147483648_i32_96 : i32
    %375 = vector.broadcast %374 : i32 to vector<1x8xi32>
    %376 = arith.cmpi slt, %12, %375 : vector<1x8xi32>
    %377 = arith.extui %376 : vector<1x8xi1> to vector<1x8xi32>
    %378 = arith.sitofp %377 : vector<1x8xi32> to vector<1x8xf32>
    %379 = vector.shape_cast %378 : vector<1x8xf32> to vector<1x1x8xf32>
    %cst_97 = arith.constant dense<0.000000e+00> : vector<1xf32>
    %380 = vector.multi_reduction <add>, %379, %cst_97 [1, 2] : vector<1x1x8xf32> to vector<1xf32>
    %381 = vector.shape_cast %380 : vector<1xf32> to vector<1x1x1xf32>
    %382 = vector.extract %381[0, 0, 0] : f32 from vector<1x1x1xf32>
    %cst_98 = arith.constant 3.000000e+00 : f32
    %383 = arith.cmpf ole, %382, %cst_98 : f32
    %384 = arith.select %383, %373, %372 : i32
    %c1_i32 = arith.constant 1 : i32
    %385 = arith.ori %384, %c1_i32 : i32
    %c-2147483648_i32_99 = arith.constant -2147483648 : i32
    %386 = arith.xori %385, %c-2147483648_i32_99 : i32
    %387 = vector.broadcast %386 : i32 to vector<1x8xi32>
    %388 = arith.cmpi slt, %12, %387 : vector<1x8xi32>
    %389 = arith.extui %388 : vector<1x8xi1> to vector<1x8xi32>
    %390 = arith.sitofp %389 : vector<1x8xi32> to vector<1x8xf32>
    %391 = vector.shape_cast %390 : vector<1x8xf32> to vector<1x1x8xf32>
    %cst_100 = arith.constant dense<0.000000e+00> : vector<1xf32>
    %392 = vector.multi_reduction <add>, %391, %cst_100 [1, 2] : vector<1x1x8xf32> to vector<1xf32>
    %393 = vector.shape_cast %392 : vector<1xf32> to vector<1x1x1xf32>
    %394 = vector.extract %393[0, 0, 0] : f32 from vector<1x1x1xf32>
    %cst_101 = arith.constant 3.000000e+00 : f32
    %395 = arith.cmpf ole, %394, %cst_101 : f32
    %396 = arith.select %395, %385, %384 : i32
    %c-2147483648_i32_102 = arith.constant -2147483648 : i32
    %397 = arith.xori %396, %c-2147483648_i32_102 : i32
    %398 = vector.broadcast %397 : i32 to vector<1x8xi32>
    %399 = arith.cmpi sle, %12, %398 : vector<1x8xi32>
    %cst_103 = arith.constant 0xFF800000 : f32
    %400 = vector.broadcast %cst_103 : f32 to vector<1x8xf32>
    %401 = arith.select %399, %6, %400 : vector<1x8xi1>, vector<1x8xf32>
    %402 = vector.shape_cast %401 : vector<1x8xf32> to vector<1x1x8xf32>
    %cst_104 = arith.constant dense<0xFF800000> : vector<1xf32>
    %403 = vector.multi_reduction <maximumf>, %402, %cst_104 [1, 2] : vector<1x1x8xf32> to vector<1xf32>
    %404 = vector.shape_cast %403 : vector<1xf32> to vector<1x1x1xf32>
    %405 = vector.extract %404[0, 0, 0] : f32 from vector<1x1x1xf32>
    %406 = vector.broadcast %405 : f32 to vector<1x8xf32>
    %407 = arith.subf %6, %406 : vector<1x8xf32>
    %408 = math.absf %407 : vector<1x8xf32>
    %409 = tpu.bitcast %408 : vector<1x8xf32> -> vector<1x8xi32>
    %c0_i32_105 = arith.constant 0 : i32
    %c1073741824_i32_106 = arith.constant 1073741824 : i32
    %410 = arith.ori %c0_i32_105, %c1073741824_i32_106 : i32
    %411 = vector.broadcast %410 : i32 to vector<1x8xi32>
    %412 = arith.cmpi slt, %409, %411 : vector<1x8xi32>
    %413 = arith.extui %412 : vector<1x8xi1> to vector<1x8xi32>
    %414 = arith.sitofp %413 : vector<1x8xi32> to vector<1x8xf32>
    %415 = vector.shape_cast %414 : vector<1x8xf32> to vector<1x1x8xf32>
    %cst_107 = arith.constant dense<0.000000e+00> : vector<1xf32>
    %416 = vector.multi_reduction <add>, %415, %cst_107 [1, 2] : vector<1x1x8xf32> to vector<1xf32>
    %417 = vector.shape_cast %416 : vector<1xf32> to vector<1x1x1xf32>
    %418 = vector.extract %417[0, 0, 0] : f32 from vector<1x1x1xf32>
    %cst_108 = arith.constant 3.000000e+00 : f32
    %419 = arith.cmpf ole, %418, %cst_108 : f32
    %c0_i32_109 = arith.constant 0 : i32
    %420 = arith.select %419, %410, %c0_i32_109 : i32
    %c536870912_i32_110 = arith.constant 536870912 : i32
    %421 = arith.ori %420, %c536870912_i32_110 : i32
    %422 = vector.broadcast %421 : i32 to vector<1x8xi32>
    %423 = arith.cmpi slt, %409, %422 : vector<1x8xi32>
    %424 = arith.extui %423 : vector<1x8xi1> to vector<1x8xi32>
    %425 = arith.sitofp %424 : vector<1x8xi32> to vector<1x8xf32>
    %426 = vector.shape_cast %425 : vector<1x8xf32> to vector<1x1x8xf32>
    %cst_111 = arith.constant dense<0.000000e+00> : vector<1xf32>
    %427 = vector.multi_reduction <add>, %426, %cst_111 [1, 2] : vector<1x1x8xf32> to vector<1xf32>
    %428 = vector.shape_cast %427 : vector<1xf32> to vector<1x1x1xf32>
    %429 = vector.extract %428[0, 0, 0] : f32 from vector<1x1x1xf32>
    %cst_112 = arith.constant 3.000000e+00 : f32
    %430 = arith.cmpf ole, %429, %cst_112 : f32
    %431 = arith.select %430, %421, %420 : i32
    %c268435456_i32_113 = arith.constant 268435456 : i32
    %432 = arith.ori %431, %c268435456_i32_113 : i32
    %433 = vector.broadcast %432 : i32 to vector<1x8xi32>
    %434 = arith.cmpi slt, %409, %433 : vector<1x8xi32>
    %435 = arith.extui %434 : vector<1x8xi1> to vector<1x8xi32>
    %436 = arith.sitofp %435 : vector<1x8xi32> to vector<1x8xf32>
    %437 = vector.shape_cast %436 : vector<1x8xf32> to vector<1x1x8xf32>
    %cst_114 = arith.constant dense<0.000000e+00> : vector<1xf32>
    %438 = vector.multi_reduction <add>, %437, %cst_114 [1, 2] : vector<1x1x8xf32> to vector<1xf32>
    %439 = vector.shape_cast %438 : vector<1xf32> to vector<1x1x1xf32>
    %440 = vector.extract %439[0, 0, 0] : f32 from vector<1x1x1xf32>
    %cst_115 = arith.constant 3.000000e+00 : f32
    %441 = arith.cmpf ole, %440, %cst_115 : f32
    %442 = arith.select %441, %432, %431 : i32
    %c134217728_i32_116 = arith.constant 134217728 : i32
    %443 = arith.ori %442, %c134217728_i32_116 : i32
    %444 = vector.broadcast %443 : i32 to vector<1x8xi32>
    %445 = arith.cmpi slt, %409, %444 : vector<1x8xi32>
    %446 = arith.extui %445 : vector<1x8xi1> to vector<1x8xi32>
    %447 = arith.sitofp %446 : vector<1x8xi32> to vector<1x8xf32>
    %448 = vector.shape_cast %447 : vector<1x8xf32> to vector<1x1x8xf32>
    %cst_117 = arith.constant dense<0.000000e+00> : vector<1xf32>
    %449 = vector.multi_reduction <add>, %448, %cst_117 [1, 2] : vector<1x1x8xf32> to vector<1xf32>
    %450 = vector.shape_cast %449 : vector<1xf32> to vector<1x1x1xf32>
    %451 = vector.extract %450[0, 0, 0] : f32 from vector<1x1x1xf32>
    %cst_118 = arith.constant 3.000000e+00 : f32
    %452 = arith.cmpf ole, %451, %cst_118 : f32
    %453 = arith.select %452, %443, %442 : i32
    %c67108864_i32_119 = arith.constant 67108864 : i32
    %454 = arith.ori %453, %c67108864_i32_119 : i32
    %455 = vector.broadcast %454 : i32 to vector<1x8xi32>
    %456 = arith.cmpi slt, %409, %455 : vector<1x8xi32>
    %457 = arith.extui %456 : vector<1x8xi1> to vector<1x8xi32>
    %458 = arith.sitofp %457 : vector<1x8xi32> to vector<1x8xf32>
    %459 = vector.shape_cast %458 : vector<1x8xf32> to vector<1x1x8xf32>
    %cst_120 = arith.constant dense<0.000000e+00> : vector<1xf32>
    %460 = vector.multi_reduction <add>, %459, %cst_120 [1, 2] : vector<1x1x8xf32> to vector<1xf32>
    %461 = vector.shape_cast %460 : vector<1xf32> to vector<1x1x1xf32>
    %462 = vector.extract %461[0, 0, 0] : f32 from vector<1x1x1xf32>
    %cst_121 = arith.constant 3.000000e+00 : f32
    %463 = arith.cmpf ole, %462, %cst_121 : f32
    %464 = arith.select %463, %454, %453 : i32
    %c33554432_i32_122 = arith.constant 33554432 : i32
    %465 = arith.ori %464, %c33554432_i32_122 : i32
    %466 = vector.broadcast %465 : i32 to vector<1x8xi32>
    %467 = arith.cmpi slt, %409, %466 : vector<1x8xi32>
    %468 = arith.extui %467 : vector<1x8xi1> to vector<1x8xi32>
    %469 = arith.sitofp %468 : vector<1x8xi32> to vector<1x8xf32>
    %470 = vector.shape_cast %469 : vector<1x8xf32> to vector<1x1x8xf32>
    %cst_123 = arith.constant dense<0.000000e+00> : vector<1xf32>
    %471 = vector.multi_reduction <add>, %470, %cst_123 [1, 2] : vector<1x1x8xf32> to vector<1xf32>
    %472 = vector.shape_cast %471 : vector<1xf32> to vector<1x1x1xf32>
    %473 = vector.extract %472[0, 0, 0] : f32 from vector<1x1x1xf32>
    %cst_124 = arith.constant 3.000000e+00 : f32
    %474 = arith.cmpf ole, %473, %cst_124 : f32
    %475 = arith.select %474, %465, %464 : i32
    %c16777216_i32_125 = arith.constant 16777216 : i32
    %476 = arith.ori %475, %c16777216_i32_125 : i32
    %477 = vector.broadcast %476 : i32 to vector<1x8xi32>
    %478 = arith.cmpi slt, %409, %477 : vector<1x8xi32>
    %479 = arith.extui %478 : vector<1x8xi1> to vector<1x8xi32>
    %480 = arith.sitofp %479 : vector<1x8xi32> to vector<1x8xf32>
    %481 = vector.shape_cast %480 : vector<1x8xf32> to vector<1x1x8xf32>
    %cst_126 = arith.constant dense<0.000000e+00> : vector<1xf32>
    %482 = vector.multi_reduction <add>, %481, %cst_126 [1, 2] : vector<1x1x8xf32> to vector<1xf32>
    %483 = vector.shape_cast %482 : vector<1xf32> to vector<1x1x1xf32>
    %484 = vector.extract %483[0, 0, 0] : f32 from vector<1x1x1xf32>
    %cst_127 = arith.constant 3.000000e+00 : f32
    %485 = arith.cmpf ole, %484, %cst_127 : f32
    %486 = arith.select %485, %476, %475 : i32
    %c8388608_i32_128 = arith.constant 8388608 : i32
    %487 = arith.ori %486, %c8388608_i32_128 : i32
    %488 = vector.broadcast %487 : i32 to vector<1x8xi32>
    %489 = arith.cmpi slt, %409, %488 : vector<1x8xi32>
    %490 = arith.extui %489 : vector<1x8xi1> to vector<1x8xi32>
    %491 = arith.sitofp %490 : vector<1x8xi32> to vector<1x8xf32>
    %492 = vector.shape_cast %491 : vector<1x8xf32> to vector<1x1x8xf32>
    %cst_129 = arith.constant dense<0.000000e+00> : vector<1xf32>
    %493 = vector.multi_reduction <add>, %492, %cst_129 [1, 2] : vector<1x1x8xf32> to vector<1xf32>
    %494 = vector.shape_cast %493 : vector<1xf32> to vector<1x1x1xf32>
    %495 = vector.extract %494[0, 0, 0] : f32 from vector<1x1x1xf32>
    %cst_130 = arith.constant 3.000000e+00 : f32
    %496 = arith.cmpf ole, %495, %cst_130 : f32
    %497 = arith.select %496, %487, %486 : i32
    %c4194304_i32_131 = arith.constant 4194304 : i32
    %498 = arith.ori %497, %c4194304_i32_131 : i32
    %499 = vector.broadcast %498 : i32 to vector<1x8xi32>
    %500 = arith.cmpi slt, %409, %499 : vector<1x8xi32>
    %501 = arith.extui %500 : vector<1x8xi1> to vector<1x8xi32>
    %502 = arith.sitofp %501 : vector<1x8xi32> to vector<1x8xf32>
    %503 = vector.shape_cast %502 : vector<1x8xf32> to vector<1x1x8xf32>
    %cst_132 = arith.constant dense<0.000000e+00> : vector<1xf32>
    %504 = vector.multi_reduction <add>, %503, %cst_132 [1, 2] : vector<1x1x8xf32> to vector<1xf32>
    %505 = vector.shape_cast %504 : vector<1xf32> to vector<1x1x1xf32>
    %506 = vector.extract %505[0, 0, 0] : f32 from vector<1x1x1xf32>
    %cst_133 = arith.constant 3.000000e+00 : f32
    %507 = arith.cmpf ole, %506, %cst_133 : f32
    %508 = arith.select %507, %498, %497 : i32
    %c2097152_i32_134 = arith.constant 2097152 : i32
    %509 = arith.ori %508, %c2097152_i32_134 : i32
    %510 = vector.broadcast %509 : i32 to vector<1x8xi32>
    %511 = arith.cmpi slt, %409, %510 : vector<1x8xi32>
    %512 = arith.extui %511 : vector<1x8xi1> to vector<1x8xi32>
    %513 = arith.sitofp %512 : vector<1x8xi32> to vector<1x8xf32>
    %514 = vector.shape_cast %513 : vector<1x8xf32> to vector<1x1x8xf32>
    %cst_135 = arith.constant dense<0.000000e+00> : vector<1xf32>
    %515 = vector.multi_reduction <add>, %514, %cst_135 [1, 2] : vector<1x1x8xf32> to vector<1xf32>
    %516 = vector.shape_cast %515 : vector<1xf32> to vector<1x1x1xf32>
    %517 = vector.extract %516[0, 0, 0] : f32 from vector<1x1x1xf32>
    %cst_136 = arith.constant 3.000000e+00 : f32
    %518 = arith.cmpf ole, %517, %cst_136 : f32
    %519 = arith.select %518, %509, %508 : i32
    %c1048576_i32_137 = arith.constant 1048576 : i32
    %520 = arith.ori %519, %c1048576_i32_137 : i32
    %521 = vector.broadcast %520 : i32 to vector<1x8xi32>
    %522 = arith.cmpi slt, %409, %521 : vector<1x8xi32>
    %523 = arith.extui %522 : vector<1x8xi1> to vector<1x8xi32>
    %524 = arith.sitofp %523 : vector<1x8xi32> to vector<1x8xf32>
    %525 = vector.shape_cast %524 : vector<1x8xf32> to vector<1x1x8xf32>
    %cst_138 = arith.constant dense<0.000000e+00> : vector<1xf32>
    %526 = vector.multi_reduction <add>, %525, %cst_138 [1, 2] : vector<1x1x8xf32> to vector<1xf32>
    %527 = vector.shape_cast %526 : vector<1xf32> to vector<1x1x1xf32>
    %528 = vector.extract %527[0, 0, 0] : f32 from vector<1x1x1xf32>
    %cst_139 = arith.constant 3.000000e+00 : f32
    %529 = arith.cmpf ole, %528, %cst_139 : f32
    %530 = arith.select %529, %520, %519 : i32
    %c524288_i32_140 = arith.constant 524288 : i32
    %531 = arith.ori %530, %c524288_i32_140 : i32
    %532 = vector.broadcast %531 : i32 to vector<1x8xi32>
    %533 = arith.cmpi slt, %409, %532 : vector<1x8xi32>
    %534 = arith.extui %533 : vector<1x8xi1> to vector<1x8xi32>
    %535 = arith.sitofp %534 : vector<1x8xi32> to vector<1x8xf32>
    %536 = vector.shape_cast %535 : vector<1x8xf32> to vector<1x1x8xf32>
    %cst_141 = arith.constant dense<0.000000e+00> : vector<1xf32>
    %537 = vector.multi_reduction <add>, %536, %cst_141 [1, 2] : vector<1x1x8xf32> to vector<1xf32>
    %538 = vector.shape_cast %537 : vector<1xf32> to vector<1x1x1xf32>
    %539 = vector.extract %538[0, 0, 0] : f32 from vector<1x1x1xf32>
    %cst_142 = arith.constant 3.000000e+00 : f32
    %540 = arith.cmpf ole, %539, %cst_142 : f32
    %541 = arith.select %540, %531, %530 : i32
    %c262144_i32_143 = arith.constant 262144 : i32
    %542 = arith.ori %541, %c262144_i32_143 : i32
    %543 = vector.broadcast %542 : i32 to vector<1x8xi32>
    %544 = arith.cmpi slt, %409, %543 : vector<1x8xi32>
    %545 = arith.extui %544 : vector<1x8xi1> to vector<1x8xi32>
    %546 = arith.sitofp %545 : vector<1x8xi32> to vector<1x8xf32>
    %547 = vector.shape_cast %546 : vector<1x8xf32> to vector<1x1x8xf32>
    %cst_144 = arith.constant dense<0.000000e+00> : vector<1xf32>
    %548 = vector.multi_reduction <add>, %547, %cst_144 [1, 2] : vector<1x1x8xf32> to vector<1xf32>
    %549 = vector.shape_cast %548 : vector<1xf32> to vector<1x1x1xf32>
    %550 = vector.extract %549[0, 0, 0] : f32 from vector<1x1x1xf32>
    %cst_145 = arith.constant 3.000000e+00 : f32
    %551 = arith.cmpf ole, %550, %cst_145 : f32
    %552 = arith.select %551, %542, %541 : i32
    %c131072_i32_146 = arith.constant 131072 : i32
    %553 = arith.ori %552, %c131072_i32_146 : i32
    %554 = vector.broadcast %553 : i32 to vector<1x8xi32>
    %555 = arith.cmpi slt, %409, %554 : vector<1x8xi32>
    %556 = arith.extui %555 : vector<1x8xi1> to vector<1x8xi32>
    %557 = arith.sitofp %556 : vector<1x8xi32> to vector<1x8xf32>
    %558 = vector.shape_cast %557 : vector<1x8xf32> to vector<1x1x8xf32>
    %cst_147 = arith.constant dense<0.000000e+00> : vector<1xf32>
    %559 = vector.multi_reduction <add>, %558, %cst_147 [1, 2] : vector<1x1x8xf32> to vector<1xf32>
    %560 = vector.shape_cast %559 : vector<1xf32> to vector<1x1x1xf32>
    %561 = vector.extract %560[0, 0, 0] : f32 from vector<1x1x1xf32>
    %cst_148 = arith.constant 3.000000e+00 : f32
    %562 = arith.cmpf ole, %561, %cst_148 : f32
    %563 = arith.select %562, %553, %552 : i32
    %c65536_i32_149 = arith.constant 65536 : i32
    %564 = arith.ori %563, %c65536_i32_149 : i32
    %565 = vector.broadcast %564 : i32 to vector<1x8xi32>
    %566 = arith.cmpi slt, %409, %565 : vector<1x8xi32>
    %567 = arith.extui %566 : vector<1x8xi1> to vector<1x8xi32>
    %568 = arith.sitofp %567 : vector<1x8xi32> to vector<1x8xf32>
    %569 = vector.shape_cast %568 : vector<1x8xf32> to vector<1x1x8xf32>
    %cst_150 = arith.constant dense<0.000000e+00> : vector<1xf32>
    %570 = vector.multi_reduction <add>, %569, %cst_150 [1, 2] : vector<1x1x8xf32> to vector<1xf32>
    %571 = vector.shape_cast %570 : vector<1xf32> to vector<1x1x1xf32>
    %572 = vector.extract %571[0, 0, 0] : f32 from vector<1x1x1xf32>
    %cst_151 = arith.constant 3.000000e+00 : f32
    %573 = arith.cmpf ole, %572, %cst_151 : f32
    %574 = arith.select %573, %564, %563 : i32
    %c32768_i32_152 = arith.constant 32768 : i32
    %575 = arith.ori %574, %c32768_i32_152 : i32
    %576 = vector.broadcast %575 : i32 to vector<1x8xi32>
    %577 = arith.cmpi slt, %409, %576 : vector<1x8xi32>
    %578 = arith.extui %577 : vector<1x8xi1> to vector<1x8xi32>
    %579 = arith.sitofp %578 : vector<1x8xi32> to vector<1x8xf32>
    %580 = vector.shape_cast %579 : vector<1x8xf32> to vector<1x1x8xf32>
    %cst_153 = arith.constant dense<0.000000e+00> : vector<1xf32>
    %581 = vector.multi_reduction <add>, %580, %cst_153 [1, 2] : vector<1x1x8xf32> to vector<1xf32>
    %582 = vector.shape_cast %581 : vector<1xf32> to vector<1x1x1xf32>
    %583 = vector.extract %582[0, 0, 0] : f32 from vector<1x1x1xf32>
    %cst_154 = arith.constant 3.000000e+00 : f32
    %584 = arith.cmpf ole, %583, %cst_154 : f32
    %585 = arith.select %584, %575, %574 : i32
    %c16384_i32_155 = arith.constant 16384 : i32
    %586 = arith.ori %585, %c16384_i32_155 : i32
    %587 = vector.broadcast %586 : i32 to vector<1x8xi32>
    %588 = arith.cmpi slt, %409, %587 : vector<1x8xi32>
    %589 = arith.extui %588 : vector<1x8xi1> to vector<1x8xi32>
    %590 = arith.sitofp %589 : vector<1x8xi32> to vector<1x8xf32>
    %591 = vector.shape_cast %590 : vector<1x8xf32> to vector<1x1x8xf32>
    %cst_156 = arith.constant dense<0.000000e+00> : vector<1xf32>
    %592 = vector.multi_reduction <add>, %591, %cst_156 [1, 2] : vector<1x1x8xf32> to vector<1xf32>
    %593 = vector.shape_cast %592 : vector<1xf32> to vector<1x1x1xf32>
    %594 = vector.extract %593[0, 0, 0] : f32 from vector<1x1x1xf32>
    %cst_157 = arith.constant 3.000000e+00 : f32
    %595 = arith.cmpf ole, %594, %cst_157 : f32
    %596 = arith.select %595, %586, %585 : i32
    %c8192_i32_158 = arith.constant 8192 : i32
    %597 = arith.ori %596, %c8192_i32_158 : i32
    %598 = vector.broadcast %597 : i32 to vector<1x8xi32>
    %599 = arith.cmpi slt, %409, %598 : vector<1x8xi32>
    %600 = arith.extui %599 : vector<1x8xi1> to vector<1x8xi32>
    %601 = arith.sitofp %600 : vector<1x8xi32> to vector<1x8xf32>
    %602 = vector.shape_cast %601 : vector<1x8xf32> to vector<1x1x8xf32>
    %cst_159 = arith.constant dense<0.000000e+00> : vector<1xf32>
    %603 = vector.multi_reduction <add>, %602, %cst_159 [1, 2] : vector<1x1x8xf32> to vector<1xf32>
    %604 = vector.shape_cast %603 : vector<1xf32> to vector<1x1x1xf32>
    %605 = vector.extract %604[0, 0, 0] : f32 from vector<1x1x1xf32>
    %cst_160 = arith.constant 3.000000e+00 : f32
    %606 = arith.cmpf ole, %605, %cst_160 : f32
    %607 = arith.select %606, %597, %596 : i32
    %c4096_i32_161 = arith.constant 4096 : i32
    %608 = arith.ori %607, %c4096_i32_161 : i32
    %609 = vector.broadcast %608 : i32 to vector<1x8xi32>
    %610 = arith.cmpi slt, %409, %609 : vector<1x8xi32>
    %611 = arith.extui %610 : vector<1x8xi1> to vector<1x8xi32>
    %612 = arith.sitofp %611 : vector<1x8xi32> to vector<1x8xf32>
    %613 = vector.shape_cast %612 : vector<1x8xf32> to vector<1x1x8xf32>
    %cst_162 = arith.constant dense<0.000000e+00> : vector<1xf32>
    %614 = vector.multi_reduction <add>, %613, %cst_162 [1, 2] : vector<1x1x8xf32> to vector<1xf32>
    %615 = vector.shape_cast %614 : vector<1xf32> to vector<1x1x1xf32>
    %616 = vector.extract %615[0, 0, 0] : f32 from vector<1x1x1xf32>
    %cst_163 = arith.constant 3.000000e+00 : f32
    %617 = arith.cmpf ole, %616, %cst_163 : f32
    %618 = arith.select %617, %608, %607 : i32
    %c2048_i32_164 = arith.constant 2048 : i32
    %619 = arith.ori %618, %c2048_i32_164 : i32
    %620 = vector.broadcast %619 : i32 to vector<1x8xi32>
    %621 = arith.cmpi slt, %409, %620 : vector<1x8xi32>
    %622 = arith.extui %621 : vector<1x8xi1> to vector<1x8xi32>
    %623 = arith.sitofp %622 : vector<1x8xi32> to vector<1x8xf32>
    %624 = vector.shape_cast %623 : vector<1x8xf32> to vector<1x1x8xf32>
    %cst_165 = arith.constant dense<0.000000e+00> : vector<1xf32>
    %625 = vector.multi_reduction <add>, %624, %cst_165 [1, 2] : vector<1x1x8xf32> to vector<1xf32>
    %626 = vector.shape_cast %625 : vector<1xf32> to vector<1x1x1xf32>
    %627 = vector.extract %626[0, 0, 0] : f32 from vector<1x1x1xf32>
    %cst_166 = arith.constant 3.000000e+00 : f32
    %628 = arith.cmpf ole, %627, %cst_166 : f32
    %629 = arith.select %628, %619, %618 : i32
    %c1024_i32_167 = arith.constant 1024 : i32
    %630 = arith.ori %629, %c1024_i32_167 : i32
    %631 = vector.broadcast %630 : i32 to vector<1x8xi32>
    %632 = arith.cmpi slt, %409, %631 : vector<1x8xi32>
    %633 = arith.extui %632 : vector<1x8xi1> to vector<1x8xi32>
    %634 = arith.sitofp %633 : vector<1x8xi32> to vector<1x8xf32>
    %635 = vector.shape_cast %634 : vector<1x8xf32> to vector<1x1x8xf32>
    %cst_168 = arith.constant dense<0.000000e+00> : vector<1xf32>
    %636 = vector.multi_reduction <add>, %635, %cst_168 [1, 2] : vector<1x1x8xf32> to vector<1xf32>
    %637 = vector.shape_cast %636 : vector<1xf32> to vector<1x1x1xf32>
    %638 = vector.extract %637[0, 0, 0] : f32 from vector<1x1x1xf32>
    %cst_169 = arith.constant 3.000000e+00 : f32
    %639 = arith.cmpf ole, %638, %cst_169 : f32
    %640 = arith.select %639, %630, %629 : i32
    %c512_i32_170 = arith.constant 512 : i32
    %641 = arith.ori %640, %c512_i32_170 : i32
    %642 = vector.broadcast %641 : i32 to vector<1x8xi32>
    %643 = arith.cmpi slt, %409, %642 : vector<1x8xi32>
    %644 = arith.extui %643 : vector<1x8xi1> to vector<1x8xi32>
    %645 = arith.sitofp %644 : vector<1x8xi32> to vector<1x8xf32>
    %646 = vector.shape_cast %645 : vector<1x8xf32> to vector<1x1x8xf32>
    %cst_171 = arith.constant dense<0.000000e+00> : vector<1xf32>
    %647 = vector.multi_reduction <add>, %646, %cst_171 [1, 2] : vector<1x1x8xf32> to vector<1xf32>
    %648 = vector.shape_cast %647 : vector<1xf32> to vector<1x1x1xf32>
    %649 = vector.extract %648[0, 0, 0] : f32 from vector<1x1x1xf32>
    %cst_172 = arith.constant 3.000000e+00 : f32
    %650 = arith.cmpf ole, %649, %cst_172 : f32
    %651 = arith.select %650, %641, %640 : i32
    %c256_i32_173 = arith.constant 256 : i32
    %652 = arith.ori %651, %c256_i32_173 : i32
    %653 = vector.broadcast %652 : i32 to vector<1x8xi32>
    %654 = arith.cmpi slt, %409, %653 : vector<1x8xi32>
    %655 = arith.extui %654 : vector<1x8xi1> to vector<1x8xi32>
    %656 = arith.sitofp %655 : vector<1x8xi32> to vector<1x8xf32>
    %657 = vector.shape_cast %656 : vector<1x8xf32> to vector<1x1x8xf32>
    %cst_174 = arith.constant dense<0.000000e+00> : vector<1xf32>
    %658 = vector.multi_reduction <add>, %657, %cst_174 [1, 2] : vector<1x1x8xf32> to vector<1xf32>
    %659 = vector.shape_cast %658 : vector<1xf32> to vector<1x1x1xf32>
    %660 = vector.extract %659[0, 0, 0] : f32 from vector<1x1x1xf32>
    %cst_175 = arith.constant 3.000000e+00 : f32
    %661 = arith.cmpf ole, %660, %cst_175 : f32
    %662 = arith.select %661, %652, %651 : i32
    %c128_i32_176 = arith.constant 128 : i32
    %663 = arith.ori %662, %c128_i32_176 : i32
    %664 = vector.broadcast %663 : i32 to vector<1x8xi32>
    %665 = arith.cmpi slt, %409, %664 : vector<1x8xi32>
    %666 = arith.extui %665 : vector<1x8xi1> to vector<1x8xi32>
    %667 = arith.sitofp %666 : vector<1x8xi32> to vector<1x8xf32>
    %668 = vector.shape_cast %667 : vector<1x8xf32> to vector<1x1x8xf32>
    %cst_177 = arith.constant dense<0.000000e+00> : vector<1xf32>
    %669 = vector.multi_reduction <add>, %668, %cst_177 [1, 2] : vector<1x1x8xf32> to vector<1xf32>
    %670 = vector.shape_cast %669 : vector<1xf32> to vector<1x1x1xf32>
    %671 = vector.extract %670[0, 0, 0] : f32 from vector<1x1x1xf32>
    %cst_178 = arith.constant 3.000000e+00 : f32
    %672 = arith.cmpf ole, %671, %cst_178 : f32
    %673 = arith.select %672, %663, %662 : i32
    %c64_i32_179 = arith.constant 64 : i32
    %674 = arith.ori %673, %c64_i32_179 : i32
    %675 = vector.broadcast %674 : i32 to vector<1x8xi32>
    %676 = arith.cmpi slt, %409, %675 : vector<1x8xi32>
    %677 = arith.extui %676 : vector<1x8xi1> to vector<1x8xi32>
    %678 = arith.sitofp %677 : vector<1x8xi32> to vector<1x8xf32>
    %679 = vector.shape_cast %678 : vector<1x8xf32> to vector<1x1x8xf32>
    %cst_180 = arith.constant dense<0.000000e+00> : vector<1xf32>
    %680 = vector.multi_reduction <add>, %679, %cst_180 [1, 2] : vector<1x1x8xf32> to vector<1xf32>
    %681 = vector.shape_cast %680 : vector<1xf32> to vector<1x1x1xf32>
    %682 = vector.extract %681[0, 0, 0] : f32 from vector<1x1x1xf32>
    %cst_181 = arith.constant 3.000000e+00 : f32
    %683 = arith.cmpf ole, %682, %cst_181 : f32
    %684 = arith.select %683, %674, %673 : i32
    %c32_i32_182 = arith.constant 32 : i32
    %685 = arith.ori %684, %c32_i32_182 : i32
    %686 = vector.broadcast %685 : i32 to vector<1x8xi32>
    %687 = arith.cmpi slt, %409, %686 : vector<1x8xi32>
    %688 = arith.extui %687 : vector<1x8xi1> to vector<1x8xi32>
    %689 = arith.sitofp %688 : vector<1x8xi32> to vector<1x8xf32>
    %690 = vector.shape_cast %689 : vector<1x8xf32> to vector<1x1x8xf32>
    %cst_183 = arith.constant dense<0.000000e+00> : vector<1xf32>
    %691 = vector.multi_reduction <add>, %690, %cst_183 [1, 2] : vector<1x1x8xf32> to vector<1xf32>
    %692 = vector.shape_cast %691 : vector<1xf32> to vector<1x1x1xf32>
    %693 = vector.extract %692[0, 0, 0] : f32 from vector<1x1x1xf32>
    %cst_184 = arith.constant 3.000000e+00 : f32
    %694 = arith.cmpf ole, %693, %cst_184 : f32
    %695 = arith.select %694, %685, %684 : i32
    %c16_i32_185 = arith.constant 16 : i32
    %696 = arith.ori %695, %c16_i32_185 : i32
    %697 = vector.broadcast %696 : i32 to vector<1x8xi32>
    %698 = arith.cmpi slt, %409, %697 : vector<1x8xi32>
    %699 = arith.extui %698 : vector<1x8xi1> to vector<1x8xi32>
    %700 = arith.sitofp %699 : vector<1x8xi32> to vector<1x8xf32>
    %701 = vector.shape_cast %700 : vector<1x8xf32> to vector<1x1x8xf32>
    %cst_186 = arith.constant dense<0.000000e+00> : vector<1xf32>
    %702 = vector.multi_reduction <add>, %701, %cst_186 [1, 2] : vector<1x1x8xf32> to vector<1xf32>
    %703 = vector.shape_cast %702 : vector<1xf32> to vector<1x1x1xf32>
    %704 = vector.extract %703[0, 0, 0] : f32 from vector<1x1x1xf32>
    %cst_187 = arith.constant 3.000000e+00 : f32
    %705 = arith.cmpf ole, %704, %cst_187 : f32
    %706 = arith.select %705, %696, %695 : i32
    %c8_i32_188 = arith.constant 8 : i32
    %707 = arith.ori %706, %c8_i32_188 : i32
    %708 = vector.broadcast %707 : i32 to vector<1x8xi32>
    %709 = arith.cmpi slt, %409, %708 : vector<1x8xi32>
    %710 = arith.extui %709 : vector<1x8xi1> to vector<1x8xi32>
    %711 = arith.sitofp %710 : vector<1x8xi32> to vector<1x8xf32>
    %712 = vector.shape_cast %711 : vector<1x8xf32> to vector<1x1x8xf32>
    %cst_189 = arith.constant dense<0.000000e+00> : vector<1xf32>
    %713 = vector.multi_reduction <add>, %712, %cst_189 [1, 2] : vector<1x1x8xf32> to vector<1xf32>
    %714 = vector.shape_cast %713 : vector<1xf32> to vector<1x1x1xf32>
    %715 = vector.extract %714[0, 0, 0] : f32 from vector<1x1x1xf32>
    %cst_190 = arith.constant 3.000000e+00 : f32
    %716 = arith.cmpf ole, %715, %cst_190 : f32
    %717 = arith.select %716, %707, %706 : i32
    %c4_i32_191 = arith.constant 4 : i32
    %718 = arith.ori %717, %c4_i32_191 : i32
    %719 = vector.broadcast %718 : i32 to vector<1x8xi32>
    %720 = arith.cmpi slt, %409, %719 : vector<1x8xi32>
    %721 = arith.extui %720 : vector<1x8xi1> to vector<1x8xi32>
    %722 = arith.sitofp %721 : vector<1x8xi32> to vector<1x8xf32>
    %723 = vector.shape_cast %722 : vector<1x8xf32> to vector<1x1x8xf32>
    %cst_192 = arith.constant dense<0.000000e+00> : vector<1xf32>
    %724 = vector.multi_reduction <add>, %723, %cst_192 [1, 2] : vector<1x1x8xf32> to vector<1xf32>
    %725 = vector.shape_cast %724 : vector<1xf32> to vector<1x1x1xf32>
    %726 = vector.extract %725[0, 0, 0] : f32 from vector<1x1x1xf32>
    %cst_193 = arith.constant 3.000000e+00 : f32
    %727 = arith.cmpf ole, %726, %cst_193 : f32
    %728 = arith.select %727, %718, %717 : i32
    %c2_i32_194 = arith.constant 2 : i32
    %729 = arith.ori %728, %c2_i32_194 : i32
    %730 = vector.broadcast %729 : i32 to vector<1x8xi32>
    %731 = arith.cmpi slt, %409, %730 : vector<1x8xi32>
    %732 = arith.extui %731 : vector<1x8xi1> to vector<1x8xi32>
    %733 = arith.sitofp %732 : vector<1x8xi32> to vector<1x8xf32>
    %734 = vector.shape_cast %733 : vector<1x8xf32> to vector<1x1x8xf32>
    %cst_195 = arith.constant dense<0.000000e+00> : vector<1xf32>
    %735 = vector.multi_reduction <add>, %734, %cst_195 [1, 2] : vector<1x1x8xf32> to vector<1xf32>
    %736 = vector.shape_cast %735 : vector<1xf32> to vector<1x1x1xf32>
    %737 = vector.extract %736[0, 0, 0] : f32 from vector<1x1x1xf32>
    %cst_196 = arith.constant 3.000000e+00 : f32
    %738 = arith.cmpf ole, %737, %cst_196 : f32
    %739 = arith.select %738, %729, %728 : i32
    %c1_i32_197 = arith.constant 1 : i32
    %740 = arith.ori %739, %c1_i32_197 : i32
    %741 = vector.broadcast %740 : i32 to vector<1x8xi32>
    %742 = arith.cmpi slt, %409, %741 : vector<1x8xi32>
    %743 = arith.extui %742 : vector<1x8xi1> to vector<1x8xi32>
    %744 = arith.sitofp %743 : vector<1x8xi32> to vector<1x8xf32>
    %745 = vector.shape_cast %744 : vector<1x8xf32> to vector<1x1x8xf32>
    %cst_198 = arith.constant dense<0.000000e+00> : vector<1xf32>
    %746 = vector.multi_reduction <add>, %745, %cst_198 [1, 2] : vector<1x1x8xf32> to vector<1xf32>
    %747 = vector.shape_cast %746 : vector<1xf32> to vector<1x1x1xf32>
    %748 = vector.extract %747[0, 0, 0] : f32 from vector<1x1x1xf32>
    %cst_199 = arith.constant 3.000000e+00 : f32
    %749 = arith.cmpf ole, %748, %cst_199 : f32
    %750 = arith.select %749, %740, %739 : i32
    %751 = vector.broadcast %750 : i32 to vector<1x8xi32>
    %752 = arith.cmpi sle, %409, %751 : vector<1x8xi32>
    %cst_200 = arith.constant 0xFF800000 : f32
    %753 = vector.broadcast %cst_200 : f32 to vector<1x8xf32>
    %754 = arith.select %752, %408, %753 : vector<1x8xi1>, vector<1x8xf32>
    %755 = vector.shape_cast %754 : vector<1x8xf32> to vector<1x1x8xf32>
    %cst_201 = arith.constant dense<0xFF800000> : vector<1xf32>
    %756 = vector.multi_reduction <maximumf>, %755, %cst_201 [1, 2] : vector<1x1x8xf32> to vector<1xf32>
    %757 = vector.shape_cast %756 : vector<1xf32> to vector<1x1x1xf32>
    %758 = vector.extract %757[0, 0, 0] : f32 from vector<1x1x1xf32>
    %cst_202 = arith.constant 1.000000e+01 : f32
    %759 = arith.mulf %cst_202, %758 : f32
    %760 = arith.subf %405, %759 : f32
    %cst_203 = arith.constant 1.000000e+01 : f32
    %761 = arith.mulf %cst_203, %758 : f32
    %762 = arith.addf %405, %761 : f32
    %763 = vector.broadcast %760 : f32 to vector<1x8xf32>
    %764 = arith.cmpf oge, %6, %763 : vector<1x8xf32>
    %765 = vector.broadcast %762 : f32 to vector<1x8xf32>
    %766 = arith.cmpf ole, %6, %765 : vector<1x8xf32>
    %767 = arith.andi %764, %766 : vector<1x8xi1>
    %768 = arith.extui %767 : vector<1x8xi1> to vector<1x8xi32>
    %769 = arith.sitofp %768 : vector<1x8xi32> to vector<1x8xf32>
    %770 = vector.shape_cast %769 : vector<1x8xf32> to vector<1x1x8xf32>
    %cst_204 = arith.constant dense<0.000000e+00> : vector<1xf32>
    %771 = vector.multi_reduction <add>, %770, %cst_204 [1, 2] : vector<1x1x8xf32> to vector<1xf32>
    %772 = vector.shape_cast %771 : vector<1xf32> to vector<1x1x1xf32>
    %773 = vector.extract %772[0, 0, 0] : f32 from vector<1x1x1xf32>
    %cst_205 = arith.constant 0.000000e+00 : f32
    %774 = arith.cmpf ogt, %773, %cst_205 : f32
    %cst_206 = arith.constant 1.000000e+00 : f32
    %775 = vector.broadcast %cst_206 : f32 to vector<1x8xf32>
    %776 = arith.select %774, %769, %775 : vector<1x8xf32>
    %cst_207 = arith.constant 0.000000e+00 : f32
    %777 = arith.cmpf ogt, %773, %cst_207 : f32
    %cst_208 = arith.constant 8.000000e+00 : f32
    %778 = arith.select %777, %773, %cst_208 : f32
    %cst_209 = arith.constant -5.000000e+00 : f32
    %cst_210 = arith.constant 5.000000e+00 : f32
    %779 = vector.broadcast %cst_209 : f32 to vector<1x8xf32>
    %780 = arith.maximumf %779, %6 : vector<1x8xf32>
    %781 = vector.broadcast %cst_210 : f32 to vector<1x8xf32>
    %782 = arith.minimumf %781, %780 : vector<1x8xf32>
    %783 = arith.mulf %782, %776 : vector<1x8xf32>
    %784 = vector.shape_cast %783 : vector<1x8xf32> to vector<1x1x8xf32>
    %cst_211 = arith.constant dense<0.000000e+00> : vector<1xf32>
    %785 = vector.multi_reduction <add>, %784, %cst_211 [1, 2] : vector<1x1x8xf32> to vector<1xf32>
    %786 = vector.shape_cast %785 : vector<1xf32> to vector<1x1x1xf32>
    %787 = vector.extract %786[0, 0, 0] : f32 from vector<1x1x1xf32>
    %788 = arith.divf %787, %778 : f32
    %789 = vector.broadcast %788 : f32 to vector<1x8xf32>
    %790 = arith.subf %782, %789 : vector<1x8xf32>
    %791 = arith.mulf %790, %790 : vector<1x8xf32>
    %792 = arith.mulf %776, %791 : vector<1x8xf32>
    %793 = vector.shape_cast %792 : vector<1x8xf32> to vector<1x1x8xf32>
    %cst_212 = arith.constant dense<0.000000e+00> : vector<1xf32>
    %794 = vector.multi_reduction <add>, %793, %cst_212 [1, 2] : vector<1x1x8xf32> to vector<1xf32>
    %795 = vector.shape_cast %794 : vector<1xf32> to vector<1x1x1xf32>
    %796 = vector.extract %795[0, 0, 0] : f32 from vector<1x1x1xf32>
    %cst_213 = arith.constant 1.000000e+00 : f32
    %797 = arith.subf %778, %cst_213 : f32
    %cst_214 = arith.constant 1.000000e+00 : f32
    %798 = arith.maximumf %797, %cst_214 : f32
    %799 = arith.divf %796, %798 : f32
    %800 = math.sqrt %799 : f32
    %c0_215 = arith.constant 0 : index
    %c0_216 = arith.constant 0 : index
    %801 = vector.load %arg2[%c0_215, %c0_216] : memref<1x8xf32, #tpu.memory_space<vmem>>, vector<1x8xf32>
    tpu.vector_store %arg2[%c0_215, %c0_216], %782 {strides = array<i32>} : memref<1x8xf32, #tpu.memory_space<vmem>>, vector<1x8xf32>,
    %c0_217 = arith.constant 0 : index
    %c0_218 = arith.constant 0 : index
    %802 = vector.load %arg3[%c0_217, %c0_218] : memref<1x8xf32, #tpu.memory_space<vmem>>, vector<1x8xf32>
    tpu.vector_store %arg3[%c0_217, %c0_218], %776 {strides = array<i32>} : memref<1x8xf32, #tpu.memory_space<vmem>>, vector<1x8xf32>,
    %c0_219 = arith.constant 0 : index
    %803 = memref.load %arg1[%c0_219] : memref<8xf32, #tpu.memory_space<smem>>
    memref.store %788, %arg1[%c0_219] : memref<8xf32, #tpu.memory_space<smem>>
    %c1 = arith.constant 1 : index
    %804 = memref.load %arg1[%c1] : memref<8xf32, #tpu.memory_space<smem>>
    memref.store %788, %arg1[%c1] : memref<8xf32, #tpu.memory_space<smem>>
    %c2 = arith.constant 2 : index
    %805 = memref.load %arg1[%c2] : memref<8xf32, #tpu.memory_space<smem>>
    memref.store %799, %arg1[%c2] : memref<8xf32, #tpu.memory_space<smem>>
    %c3 = arith.constant 3 : index
    %806 = memref.load %arg1[%c3] : memref<8xf32, #tpu.memory_space<smem>>
    memref.store %800, %arg1[%c3] : memref<8xf32, #tpu.memory_space<smem>>
    %c4 = arith.constant 4 : index
    %807 = memref.load %arg1[%c4] : memref<8xf32, #tpu.memory_space<smem>>
    memref.store %405, %arg1[%c4] : memref<8xf32, #tpu.memory_space<smem>>
    %c5 = arith.constant 5 : index
    %808 = memref.load %arg1[%c5] : memref<8xf32, #tpu.memory_space<smem>>
    memref.store %758, %arg1[%c5] : memref<8xf32, #tpu.memory_space<smem>>
    %cst_220 = arith.constant 8.000000e+00 : f32
    %809 = arith.subf %cst_220, %778 : f32
    %c6 = arith.constant 6 : index
    %810 = memref.load %arg1[%c6] : memref<8xf32, #tpu.memory_space<smem>>
    memref.store %809, %arg1[%c6] : memref<8xf32, #tpu.memory_space<smem>>
    %c7 = arith.constant 7 : index
    %811 = memref.load %arg1[%c7] : memref<8xf32, #tpu.memory_space<smem>>
    memref.store %778, %arg1[%c7] : memref<8xf32, #tpu.memory_space<smem>>
    return
  }
}

</mosaic_0001>

<bundles_post_ra>
// kernel: _fused_forward.1
= control target key start
LH: loop header
LB: loop body
LE: loop exit
PB: predicated region body
PF: predicated region fallthrough
CT: control target
= control target key end

     0   :  { %9 = vsyncpa [#allocation4], 0  ;;  %vm37_vm0 = vcmask 57344   ;;  %s1892_s0 = inlined_call_operand.vmem [shape: f32[12,1,8], index: 0, kind: input, shape index: {}]   ;;  %s1893_s1 = inlined_call_operand.vmem [shape: f32[8], index: 1, kind: output, shape index: {0}]   ;;  %s1894_s2 = inlined_call_operand.hbm [shape: f32[1,8], index: 2, kind: output, shape index: {1}]   ;;  %s1895_s3 = inlined_call_operand.vmem [shape: f32[1,8], index: 3, kind: output, shape index: {2}]  }
   0x1   :  { %v13_v0 = vld [vmem:[%s1892_s0] sm:$0x1]  ;;  %v14_v1 = vld [vmem:[%s1892_s0 + $0x1] sm:$0x1]  ;;  %v15_v2 = vld [vmem:[%s1892_s0 + $0x2] sm:$0x1] }
   0x2   :  { %v16_v3 = vld [vmem:[%s1892_s0 + $0x3] sm:$0x1]  ;;  %v25_v4 = vmul.f32 %v13_v0, %v13_v0  ;;  %v26_v5 = vmul.f32 %v14_v1, %v14_v1  ;;  %v27_v6 = vmul.f32 %v15_v2, %v15_v2  ;;  %v17_v7 = vld [vmem:[%s1892_s0 + $0x4] sm:$0x1]  ;;  %v18_v9 = vld [vmem:[%s1892_s0 + $0x5] sm:$0x1] }
   0x3   :  { %v28_v8 = vmul.f32 %v16_v3, %v16_v3 }
   0x4   :  { %10 = vsyncpa [#allocation3], 0  ;;  %v29_v10 = vmul.f32 %v17_v7, %v17_v7  ;;  %v38_v11 = vsel %vm37_vm0, %v25_v4, 0.0  ;;  %v39_v12 = vsel %vm37_vm0, %v26_v5, 0.0  ;;  %v41_v13 = vsel %vm37_vm0, %v27_v6, 0.0 }
   0x5   :  { %v19_v14 = vld [vmem:[%s1892_s0 + $0x6] sm:$0x1]  ;;  %v40_v15 = vadd.f32 %v39_v12, %v38_v11  ;;  %v30_v16 = vmul.f32 %v18_v9, %v18_v9  ;;  %v43_v17 = vsel %vm37_vm0, %v28_v8, 0.0  ;;  %v20_v18 = vld [vmem:[%s1892_s0 + $0x7] sm:$0x1]  ;;  %v1576_v51 = vmov 0.0  }
   0x6   :  { %v31_v20 = vmul.f32 %v19_v14, %v19_v14  ;;  %v45_v21 = vsel %vm37_vm0, %v29_v10, 0.0  ;;  %v21_v22 = vld [vmem:[%s1892_s0 + $0x8] sm:$0x1]  ;;  %v32_v24 = vmul.f32 %v20_v18, %v20_v18  ;;  %v22_v26 = vld [vmem:[%s1892_s0 + $0x9] sm:$0x1] }
   0x7   :  { %v42_v19 = vadd.f32 %v41_v13, %v40_v15  ;;  %v47_v25 = vsel %vm37_vm0, %v30_v16, 0.0  ;;  %v33_v28 = vmul.f32 %v21_v22, %v21_v22  ;;  %v23_v30 = vld [vmem:[%s1892_s0 + $0xa] sm:$0x1]  ;;  %v34_v32 = vmul.f32 %v22_v26, %v22_v26  ;;  %v24_v34 = vld [vmem:[%s1892_s0 + $0xb] sm:$0x1] }
   0x8   :  { %v49_v29 = vsel %vm37_vm0, %v31_v20, 0.0  ;;  %v51_v33 = vsel %vm37_vm0, %v32_v24, 0.0  ;;  %v35_v36 = vmul.f32 %v23_v30, %v23_v30  ;;  %v36_v39 = vmul.f32 %v24_v34, %v24_v34 }
   0x9   :  { %v44_v23 = vadd.f32 %v43_v17, %v42_v19  ;;  %v53_v37 = vsel %vm37_vm0, %v33_v28, 0.0  ;;  %v55_v40 = vsel %vm37_vm0, %v34_v32, 0.0 }
   0xa   :  { %v57_v42 = vsel %vm37_vm0, %v35_v36, 0.0  ;;  %v59_v44 = vsel %vm37_vm0, %v36_v39, 0.0 }
   0xb   :  { %v46_v27 = vadd.f32 %v45_v21, %v44_v23 }
   0xd   :  { %v48_v31 = vadd.f32 %v47_v25, %v46_v27 }
   0xf   :  { %v50_v35 = vadd.f32 %v49_v29, %v48_v31 }
  0x11   :  { %v52_v38 = vadd.f32 %v51_v33, %v50_v35 }
  0x13   :  { %v54_v41 = vadd.f32 %v53_v37, %v52_v38 }
  0x15   :  { %v56_v43 = vadd.f32 %v55_v40, %v54_v41 }
  0x17   :  { %v58_v45 = vadd.f32 %v57_v42, %v56_v43 }
  0x19   :  { %v60_v46 = vadd.f32 %v59_v44, %v58_v45 }
  0x1b   :  { %v61_v47 = vmul.f32 -0.22, %v60_v46 }
  0x1d   :  { %v1648_v48 = vadd.f32 7.2, %v61_v47 }
  0x1f   :  { %vm64_vm1 = vcmp.lt.s32.totalorder %v1648_v48, 0  ;;  %v65_v49 = vxor.u32 2147483647, %v1648_v48 }
  0x21   :  { %v1653_v50 = vsel %vm64_vm1, %v65_v49, %v1648_v48 }
  0x22   :  { %vm67_vm2 = vcmp.lt.s32.totalorder %v1653_v50, 0 }
  0x23   :  { %v1320_v52 = vsel %vm67_vm2, 1.0, %v1576_v51 }
  0x24   :  { %v70_v53 = vsel %vm37_vm0, %v1320_v52, 0.0 }
  0x25   :  { %71 = vadd.xlane.f32.xlu0 %v70_v53 }
  0xb2   :  { %v72_v54 = vpop.xlane.xlu0 %71 }
  0xb3   :  { %v73_v55 = vrot.slane %v72_v54, 4 }
  0xb5   :  { %v74_v56 = vadd.f32 %v73_v55, %v72_v54 }
  0xb7   :  { %v75_v57 = vrot.slane %v74_v56, 2 }
  0xb9   :  { %v76_v58 = vadd.f32 %v75_v57, %v74_v56 }
  0xbb   :  { %v77_v59 = vrot.slane %v76_v58, 1 }
  0xbd   :  { %v78_v60 = vadd.f32 %v77_v59, %v76_v58 }
  0xbf   :  { %1386 = vpush %v78_v60 }
  0xf0   :  { %s1387_s0 = spop %1386 }
  0xf1   :  { %p80_p0 = scmp.le.f32.partialorder %s1387_s0, 3.0 }
  0xf3   :  { %s81_s9 = scalar_select %p80_p0, 2147483648, 0 }
  0xf5   :  { %s82_s10 = sor.u32 1073741824, %s81_s9 }
  0xf6   :  { %s83_s11 = sxor.u32 2147483648, %s82_s10 }
  0xf7   :  { %v84_v61 = vstv %s83_s11 }
  0xf8   :  { %vm85_vm3 = vcmp.lt.s32.totalorder %v1653_v50, %v84_v61 }
  0xf9   :  { %v1321_v62 = vsel %vm85_vm3, 1.0, %v1576_v51 }
  0xfa   :  { %v88_v63 = vsel %vm37_vm0, %v1321_v62, 0.0 }
  0xfb   :  { %89 = vadd.xlane.f32.xlu0 %v88_v63 }
 0x188   :  { %v90_v0 = vpop.xlane.xlu0 %89 }
 0x189   :  { %v91_v1 = vrot.slane %v90_v0, 4 }
 0x18b   :  { %v92_v2 = vadd.f32 %v91_v1, %v90_v0 }
 0x18d   :  { %v93_v3 = vrot.slane %v92_v2, 2 }
 0x18f   :  { %v94_v4 = vadd.f32 %v93_v3, %v92_v2 }
 0x191   :  { %v95_v5 = vrot.slane %v94_v4, 1 }
 0x193   :  { %v96_v6 = vadd.f32 %v95_v5, %v94_v4 }
 0x195   :  { %1388 = vpush %v96_v6 }
 0x1c6   :  { %s1389_s12 = spop %1388 }
 0x1c7   :  { %p98_p1 = scmp.le.f32.partialorder %s1389_s12, 3.0 }
 0x1c9   :  { %s1897_s10 = smov (!%p98_p1, %s82_s10), %s81_s9 }
 0x1ca   :  { %s100_s13 = sor.u32 536870912, %s1897_s10 }
 0x1cb   :  { %s101_s14 = sxor.u32 2147483648, %s100_s13 }
 0x1cc   :  { %v102_v7 = vstv %s101_s14 }
 0x1cd   :  { %vm103_vm4 = vcmp.lt.s32.totalorder %v1653_v50, %v102_v7 }
 0x1ce   :  { %v1322_v8 = vsel %vm103_vm4, 1.0, %v1576_v51 }
 0x1cf   :  { %v106_v9 = vsel %vm37_vm0, %v1322_v8, 0.0 }
 0x1d0   :  { %107 = vadd.xlane.f32.xlu1 %v106_v9 }
 0x25d   :  { %v108_v10 = vpop.xlane.xlu1 %107 }
 0x25e   :  { %v109_v11 = vrot.slane %v108_v10, 4 }
 0x260   :  { %v110_v12 = vadd.f32 %v109_v11, %v108_v10 }
 0x262   :  { %v111_v13 = vrot.slane %v110_v12, 2 }
 0x264   :  { %v112_v14 = vadd.f32 %v111_v13, %v110_v12 }
 0x266   :  { %v113_v15 = vrot.slane %v112_v14, 1 }
 0x268   :  { %v114_v16 = vadd.f32 %v113_v15, %v112_v14 }
 0x26a   :  { %1390 = vpush %v114_v16 }
 0x29b   :  { %s1391_s15 = spop %1390 }
 0x29c   :  { %p116_p2 = scmp.le.f32.partialorder %s1391_s15, 3.0 }
 0x29e   :  { %s1899_s13 = smov (!%p116_p2, %s100_s13), %s1897_s10 }
 0x29f   :  { %s118_s16 = sor.u32 268435456, %s1899_s13 }
 0x2a0   :  { %s119_s17 = sxor.u32 2147483648, %s118_s16 }
 0x2a1   :  { %v120_v17 = vstv %s119_s17 }
 0x2a2   :  { %vm121_vm5 = vcmp.lt.s32.totalorder %v1653_v50, %v120_v17 }
 0x2a3   :  { %v1323_v18 = vsel %vm121_vm5, 1.0, %v1576_v51 }
 0x2a4   :  { %v124_v19 = vsel %vm37_vm0, %v1323_v18, 0.0 }
 0x2a5   :  { %125 = vadd.xlane.f32.xlu1 %v124_v19 }
 0x332   :  { %v126_v20 = vpop.xlane.xlu1 %125 }
 0x333   :  { %v127_v21 = vrot.slane %v126_v20, 4 }
 0x335   :  { %v128_v22 = vadd.f32 %v127_v21, %v126_v20 }
 0x337   :  { %v129_v23 = vrot.slane %v128_v22, 2 }
 0x339   :  { %v130_v24 = vadd.f32 %v129_v23, %v128_v22 }
 0x33b   :  { %v131_v25 = vrot.slane %v130_v24, 1 }
 0x33d   :  { %v132_v26 = vadd.f32 %v131_v25, %v130_v24 }
 0x33f   :  { %1392 = vpush %v132_v26 }
 0x370   :  { %s1393_s18 = spop %1392 }
 0x371   :  { %p134_p3 = scmp.le.f32.partialorder %s1393_s18, 3.0 }
 0x373   :  { %s1901_s16 = smov (!%p134_p3, %s118_s16), %s1899_s13 }
 0x374   :  { %s136_s19 = sor.u32 134217728, %s1901_s16 }
 0x375   :  { %s137_s20 = sxor.u32 2147483648, %s136_s19 }
 0x376   :  { %v138_v27 = vstv %s137_s20 }
 0x377   :  { %vm139_vm6 = vcmp.lt.s32.totalorder %v1653_v50, %v138_v27 }
 0x378   :  { %v1324_v28 = vsel %vm139_vm6, 1.0, %v1576_v51 }
 0x379   :  { %v142_v29 = vsel %vm37_vm0, %v1324_v28, 0.0 }
 0x37a   :  { %143 = vadd.xlane.f32.xlu0 %v142_v29 }
 0x407   :  { %v144_v30 = vpop.xlane.xlu0 %143 }
 0x408   :  { %v145_v31 = vrot.slane %v144_v30, 4 }
 0x40a   :  { %v146_v32 = vadd.f32 %v145_v31, %v144_v30 }
 0x40c   :  { %v147_v33 = vrot.slane %v146_v32, 2 }
 0x40e   :  { %v148_v34 = vadd.f32 %v147_v33, %v146_v32 }
 0x410   :  { %v149_v35 = vrot.slane %v148_v34, 1 }
 0x412   :  { %v150_v36 = vadd.f32 %v149_v35, %v148_v34 }
 0x414   :  { %1394 = vpush %v150_v36 }
 0x445   :  { %s1395_s21 = spop %1394 }
 0x446   :  { %p152_p4 = scmp.le.f32.partialorder %s1395_s21, 3.0 }
 0x448   :  { %s1903_s19 = smov (!%p152_p4, %s136_s19), %s1901_s16 }
 0x449   :  { %s154_s22 = sor.u32 67108864, %s1903_s19 }
 0x44a   :  { %s155_s23 = sxor.u32 2147483648, %s154_s22 }
 0x44b   :  { %v156_v37 = vstv %s155_s23 }
 0x44c   :  { %vm157_vm7 = vcmp.lt.s32.totalorder %v1653_v50, %v156_v37 }
 0x44d   :  { %v1325_v38 = vsel %vm157_vm7, 1.0, %v1576_v51 }
 0x44e   :  { %v160_v39 = vsel %vm37_vm0, %v1325_v38, 0.0 }
 0x44f   :  { %161 = vadd.xlane.f32.xlu1 %v160_v39 }
 0x4dc   :  { %v162_v40 = vpop.xlane.xlu1 %161 }
 0x4dd   :  { %v163_v41 = vrot.slane %v162_v40, 4 }
 0x4df   :  { %v164_v42 = vadd.f32 %v163_v41, %v162_v40 }
 0x4e1   :  { %v165_v43 = vrot.slane %v164_v42, 2 }
 0x4e3   :  { %v166_v44 = vadd.f32 %v165_v43, %v164_v42 }
 0x4e5   :  { %v167_v45 = vrot.slane %v166_v44, 1 }
 0x4e7   :  { %v168_v46 = vadd.f32 %v167_v45, %v166_v44 }
 0x4e9   :  { %1396 = vpush %v168_v46 }
 0x51a   :  { %s1397_s24 = spop %1396 }
 0x51b   :  { %p170_p5 = scmp.le.f32.partialorder %s1397_s24, 3.0 }
 0x51d   :  { %s1905_s22 = smov (!%p170_p5, %s154_s22), %s1903_s19 }
 0x51e   :  { %s172_s25 = sor.u32 33554432, %s1905_s22 }
 0x51f   :  { %s173_s26 = sxor.u32 2147483648, %s172_s25 }
 0x520   :  { %v174_v47 = vstv %s173_s26 }
 0x521   :  { %vm175_vm8 = vcmp.lt.s32.totalorder %v1653_v50, %v174_v47 }
 0x522   :  { %v1326_v49 = vsel %vm175_vm8, 1.0, %v1576_v51 }
 0x523   :  { %v178_v52 = vsel %vm37_vm0, %v1326_v49, 0.0 }
 0x524   :  { %179 = vadd.xlane.f32.xlu0 %v178_v52 }
 0x5b1   :  { %v180_v53 = vpop.xlane.xlu0 %179 }
 0x5b2   :  { %v181_v54 = vrot.slane %v180_v53, 4 }
 0x5b4   :  { %v182_v55 = vadd.f32 %v181_v54, %v180_v53 }
 0x5b6   :  { %v183_v56 = vrot.slane %v182_v55, 2 }
 0x5b8   :  { %v184_v57 = vadd.f32 %v183_v56, %v182_v55 }
 0x5ba   :  { %v185_v58 = vrot.slane %v184_v57, 1 }
 0x5bc   :  { %v186_v59 = vadd.f32 %v185_v58, %v184_v57 }
 0x5be   :  { %1398 = vpush %v186_v59 }
 0x5ef   :  { %s1399_s27 = spop %1398 }
 0x5f0   :  { %p188_p6 = scmp.le.f32.partialorder %s1399_s27, 3.0 }
 0x5f2   :  { %s1907_s25 = smov (!%p188_p6, %s172_s25), %s1905_s22 }
 0x5f3   :  { %s190_s28 = sor.u32 16777216, %s1907_s25 }
 0x5f4   :  { %s191_s29 = sxor.u32 2147483648, %s190_s28 }
 0x5f5   :  { %v192_v60 = vstv %s191_s29 }
 0x5f6   :  { %vm193_vm9 = vcmp.lt.s32.totalorder %v1653_v50, %v192_v60 }
 0x5f7   :  { %v1327_v61 = vsel %vm193_vm9, 1.0, %v1576_v51 }
 0x5f8   :  { %v196_v62 = vsel %vm37_vm0, %v1327_v61, 0.0 }
 0x5f9   :  { %197 = vadd.xlane.f32.xlu1 %v196_v62 }
 0x686   :  { %v198_v63 = vpop.xlane.xlu1 %197 }
 0x687   :  { %v199_v0 = vrot.slane %v198_v63, 4 }
 0x689   :  { %v200_v1 = vadd.f32 %v199_v0, %v198_v63 }
 0x68b   :  { %v201_v2 = vrot.slane %v200_v1, 2 }
 0x68d   :  { %v202_v3 = vadd.f32 %v201_v2, %v200_v1 }
 0x68f   :  { %v203_v4 = vrot.slane %v202_v3, 1 }
 0x691   :  { %v204_v5 = vadd.f32 %v203_v4, %v202_v3 }
 0x693   :  { %1400 = vpush %v204_v5 }
 0x6c4   :  { %s1401_s30 = spop %1400 }
 0x6c5   :  { %p206_p7 = scmp.le.f32.partialorder %s1401_s30, 3.0 }
 0x6c7   :  { %s1909_s28 = smov (!%p206_p7, %s190_s28), %s1907_s25 }
 0x6c8   :  { %s208_s4 = sor.u32 8388608, %s1909_s28 }
 0x6c9   :  { %s209_s5 = sxor.u32 2147483648, %s208_s4 }
 0x6ca   :  { %v210_v6 = vstv %s209_s5 }
 0x6cb   :  { %vm211_vm10 = vcmp.lt.s32.totalorder %v1653_v50, %v210_v6 }
 0x6cc   :  { %v1328_v7 = vsel %vm211_vm10, 1.0, %v1576_v51 }
 0x6cd   :  { %v214_v8 = vsel %vm37_vm0, %v1328_v7, 0.0 }
 0x6ce   :  { %215 = vadd.xlane.f32.xlu0 %v214_v8 }
 0x75b   :  { %v216_v9 = vpop.xlane.xlu0 %215 }
 0x75c   :  { %v217_v10 = vrot.slane %v216_v9, 4 }
 0x75e   :  { %v218_v11 = vadd.f32 %v217_v10, %v216_v9 }
 0x760   :  { %v219_v12 = vrot.slane %v218_v11, 2 }
 0x762   :  { %v220_v13 = vadd.f32 %v219_v12, %v218_v11 }
 0x764   :  { %v221_v14 = vrot.slane %v220_v13, 1 }
 0x766   :  { %v222_v15 = vadd.f32 %v221_v14, %v220_v13 }
 0x768   :  { %1402 = vpush %v222_v15 }
 0x799   :  { %s1403_s6 = spop %1402 }
 0x79a   :  { %p224_p8 = scmp.le.f32.partialorder %s1403_s6, 3.0 }
 0x79c   :  { %s1911_s4 = smov (!%p224_p8, %s208_s4), %s1909_s28 }
 0x79d   :  { %s226_s7 = sor.u32 4194304, %s1911_s4 }
 0x79e   :  { %s227_s8 = sxor.u32 2147483648, %s226_s7 }
 0x79f   :  { %v228_v16 = vstv %s227_s8 }
 0x7a0   :  { %vm229_vm11 = vcmp.lt.s32.totalorder %v1653_v50, %v228_v16 }
 0x7a1   :  { %v1329_v17 = vsel %vm229_vm11, 1.0, %v1576_v51 }
 0x7a2   :  { %v232_v18 = vsel %vm37_vm0, %v1329_v17, 0.0 }
 0x7a3   :  { %233 = vadd.xlane.f32.xlu1 %v232_v18 }
 0x830   :  { %v234_v19 = vpop.xlane.xlu1 %233 }
 0x831   :  { %v235_v20 = vrot.slane %v234_v19, 4 }
 0x833   :  { %v236_v21 = vadd.f32 %v235_v20, %v234_v19 }
 0x835   :  { %v237_v22 = vrot.slane %v236_v21, 2 }
 0x837   :  { %v238_v23 = vadd.f32 %v237_v22, %v236_v21 }
 0x839   :  { %v239_v24 = vrot.slane %v238_v23, 1 }
 0x83b   :  { %v240_v25 = vadd.f32 %v239_v24, %v238_v23 }
 0x83d   :  { %1404 = vpush %v240_v25 }
 0x86e   :  { %s1405_s0 = spop %1404 }
 0x86f   :  { %p242_p9 = scmp.le.f32.partialorder %s1405_s0, 3.0 }
 0x871   :  { %s1913_s7 = smov (!%p242_p9, %s226_s7), %s1911_s4 }
 0x872   :  { %s244_s9 = sor.u32 2097152, %s1913_s7 }
 0x873   :  { %s245_s10 = sxor.u32 2147483648, %s244_s9 }
 0x874   :  { %v246_v26 = vstv %s245_s10 }
 0x875   :  { %vm247_vm12 = vcmp.lt.s32.totalorder %v1653_v50, %v246_v26 }
 0x876   :  { %v1330_v27 = vsel %vm247_vm12, 1.0, %v1576_v51 }
 0x877   :  { %v250_v28 = vsel %vm37_vm0, %v1330_v27, 0.0 }
 0x878   :  { %251 = vadd.xlane.f32.xlu0 %v250_v28 }
 0x905   :  { %v252_v29 = vpop.xlane.xlu0 %251 }
 0x906   :  { %v253_v30 = vrot.slane %v252_v29, 4 }
 0x908   :  { %v254_v31 = vadd.f32 %v253_v30, %v252_v29 }
 0x90a   :  { %v255_v32 = vrot.slane %v254_v31, 2 }
 0x90c   :  { %v256_v33 = vadd.f32 %v255_v32, %v254_v31 }
 0x90e   :  { %v257_v34 = vrot.slane %v256_v33, 1 }
 0x910   :  { %v258_v35 = vadd.f32 %v257_v34, %v256_v33 }
 0x912   :  { %1406 = vpush %v258_v35 }
 0x943   :  { %s1407_s11 = spop %1406 }
 0x944   :  { %p260_p10 = scmp.le.f32.partialorder %s1407_s11, 3.0 }
 0x946   :  { %s1915_s9 = smov (!%p260_p10, %s244_s9), %s1913_s7 }
 0x947   :  { %s262_s12 = sor.u32 1048576, %s1915_s9 }
 0x948   :  { %s263_s13 = sxor.u32 2147483648, %s262_s12 }
 0x949   :  { %v264_v36 = vstv %s263_s13 }
 0x94a   :  { %vm265_vm13 = vcmp.lt.s32.totalorder %v1653_v50, %v264_v36 }
 0x94b   :  { %v1331_v37 = vsel %vm265_vm13, 1.0, %v1576_v51 }
 0x94c   :  { %v268_v38 = vsel %vm37_vm0, %v1331_v37, 0.0 }
 0x94d   :  { %269 = vadd.xlane.f32.xlu1 %v268_v38 }
 0x9da   :  { %v270_v39 = vpop.xlane.xlu1 %269 }
 0x9db   :  { %v271_v40 = vrot.slane %v270_v39, 4 }
 0x9dd   :  { %v272_v41 = vadd.f32 %v271_v40, %v270_v39 }
 0x9df   :  { %v273_v42 = vrot.slane %v272_v41, 2 }
 0x9e1   :  { %v274_v43 = vadd.f32 %v273_v42, %v272_v41 }
 0x9e3   :  { %v275_v44 = vrot.slane %v274_v43, 1 }
 0x9e5   :  { %v276_v45 = vadd.f32 %v275_v44, %v274_v43 }
 0x9e7   :  { %1408 = vpush %v276_v45 }
 0xa18   :  { %s1409_s14 = spop %1408 }
 0xa19   :  { %p278_p11 = scmp.le.f32.partialorder %s1409_s14, 3.0 }
 0xa1b   :  { %s1917_s12 = smov (!%p278_p11, %s262_s12), %s1915_s9 }
 0xa1c   :  { %s280_s15 = sor.u32 524288, %s1917_s12 }
 0xa1d   :  { %s281_s16 = sxor.u32 2147483648, %s280_s15 }
 0xa1e   :  { %v282_v46 = vstv %s281_s16 }
 0xa1f   :  { %vm283_vm14 = vcmp.lt.s32.totalorder %v1653_v50, %v282_v46 }
 0xa20   :  { %v1332_v47 = vsel %vm283_vm14, 1.0, %v1576_v51 }
 0xa21   :  { %v286_v49 = vsel %vm37_vm0, %v1332_v47, 0.0 }
 0xa22   :  { %287 = vadd.xlane.f32.xlu0 %v286_v49 }
 0xaaf   :  { %v288_v52 = vpop.xlane.xlu0 %287 }
 0xab0   :  { %v289_v53 = vrot.slane %v288_v52, 4 }
 0xab2   :  { %v290_v54 = vadd.f32 %v289_v53, %v288_v52 }
 0xab4   :  { %v291_v55 = vrot.slane %v290_v54, 2 }
 0xab6   :  { %v292_v56 = vadd.f32 %v291_v55, %v290_v54 }
 0xab8   :  { %v293_v57 = vrot.slane %v292_v56, 1 }
 0xaba   :  { %v294_v58 = vadd.f32 %v293_v57, %v292_v56 }
 0xabc   :  { %1410 = vpush %v294_v58 }
 0xaed   :  { %s1411_s17 = spop %1410 }
 0xaee   :  { %p296_p12 = scmp.le.f32.partialorder %s1411_s17, 3.0 }
 0xaf0   :  { %s1919_s15 = smov (!%p296_p12, %s280_s15), %s1917_s12 }
 0xaf1   :  { %s298_s18 = sor.u32 262144, %s1919_s15 }
 0xaf2   :  { %s299_s19 = sxor.u32 2147483648, %s298_s18 }
 0xaf3   :  { %v300_v59 = vstv %s299_s19 }
 0xaf4   :  { %vm301_vm15 = vcmp.lt.s32.totalorder %v1653_v50, %v300_v59 }
 0xaf5   :  { %v1333_v60 = vsel %vm301_vm15, 1.0, %v1576_v51 }
 0xaf6   :  { %v304_v61 = vsel %vm37_vm0, %v1333_v60, 0.0 }
 0xaf7   :  { %305 = vadd.xlane.f32.xlu1 %v304_v61 }
 0xb84   :  { %v306_v62 = vpop.xlane.xlu1 %305 }
 0xb85   :  { %v307_v63 = vrot.slane %v306_v62, 4 }
 0xb87   :  { %v308_v0 = vadd.f32 %v307_v63, %v306_v62 }
 0xb89   :  { %v309_v1 = vrot.slane %v308_v0, 2 }
 0xb8b   :  { %v310_v2 = vadd.f32 %v309_v1, %v308_v0 }
 0xb8d   :  { %v311_v3 = vrot.slane %v310_v2, 1 }
 0xb8f   :  { %v312_v4 = vadd.f32 %v311_v3, %v310_v2 }
 0xb91   :  { %1412 = vpush %v312_v4 }
 0xbc2   :  { %s1413_s20 = spop %1412 }
 0xbc3   :  { %p314_p13 = scmp.le.f32.partialorder %s1413_s20, 3.0 }
 0xbc5   :  { %s1921_s18 = smov (!%p314_p13, %s298_s18), %s1919_s15 }
 0xbc6   :  { %s316_s21 = sor.u32 131072, %s1921_s18 }
 0xbc7   :  { %s317_s22 = sxor.u32 2147483648, %s316_s21 }
 0xbc8   :  { %v318_v5 = vstv %s317_s22 }
 0xbc9   :  { %vm319_vm1 = vcmp.lt.s32.totalorder %v1653_v50, %v318_v5 }
 0xbca   :  { %v1334_v6 = vsel %vm319_vm1, 1.0, %v1576_v51 }
 0xbcb   :  { %v322_v7 = vsel %vm37_vm0, %v1334_v6, 0.0 }
 0xbcc   :  { %323 = vadd.xlane.f32.xlu0 %v322_v7 }
 0xc59   :  { %v324_v8 = vpop.xlane.xlu0 %323 }
 0xc5a   :  { %v325_v9 = vrot.slane %v324_v8, 4 }
 0xc5c   :  { %v326_v10 = vadd.f32 %v325_v9, %v324_v8 }
 0xc5e   :  { %v327_v11 = vrot.slane %v326_v10, 2 }
 0xc60   :  { %v328_v12 = vadd.f32 %v327_v11, %v326_v10 }
 0xc62   :  { %v329_v13 = vrot.slane %v328_v12, 1 }
 0xc64   :  { %v330_v14 = vadd.f32 %v329_v13, %v328_v12 }
 0xc66   :  { %1414 = vpush %v330_v14 }
 0xc97   :  { %s1415_s23 = spop %1414 }
 0xc98   :  { %p332_p0 = scmp.le.f32.partialorder %s1415_s23, 3.0 }
 0xc9a   :  { %s1923_s21 = smov (!%p332_p0, %s316_s21), %s1921_s18 }
 0xc9b   :  { %s334_s24 = sor.u32 65536, %s1923_s21 }
 0xc9c   :  { %s335_s25 = sxor.u32 2147483648, %s334_s24 }
 0xc9d   :  { %v336_v15 = vstv %s335_s25 }
 0xc9e   :  { %vm337_vm2 = vcmp.lt.s32.totalorder %v1653_v50, %v336_v15 }
 0xc9f   :  { %v1335_v16 = vsel %vm337_vm2, 1.0, %v1576_v51 }
 0xca0   :  { %v340_v17 = vsel %vm37_vm0, %v1335_v16, 0.0 }
 0xca1   :  { %341 = vadd.xlane.f32.xlu1 %v340_v17 }
 0xd2e   :  { %v342_v18 = vpop.xlane.xlu1 %341 }
 0xd2f   :  { %v343_v19 = vrot.slane %v342_v18, 4 }
 0xd31   :  { %v344_v20 = vadd.f32 %v343_v19, %v342_v18 }
 0xd33   :  { %v345_v21 = vrot.slane %v344_v20, 2 }
 0xd35   :  { %v346_v22 = vadd.f32 %v345_v21, %v344_v20 }
 0xd37   :  { %v347_v23 = vrot.slane %v346_v22, 1 }
 0xd39   :  { %v348_v24 = vadd.f32 %v347_v23, %v346_v22 }
 0xd3b   :  { %1416 = vpush %v348_v24 }
 0xd6c   :  { %s1417_s26 = spop %1416 }
 0xd6d   :  { %p350_p1 = scmp.le.f32.partialorder %s1417_s26, 3.0 }
 0xd6f   :  { %s1925_s24 = smov (!%p350_p1, %s334_s24), %s1923_s21 }
 0xd70   :  { %s352_s27 = sor.u32 32768, %s1925_s24 }
 0xd71   :  { %s353_s28 = sxor.u32 2147483648, %s352_s27 }
 0xd72   :  { %v354_v25 = vstv %s353_s28 }
 0xd73   :  { %vm355_vm3 = vcmp.lt.s32.totalorder %v1653_v50, %v354_v25 }
 0xd74   :  { %v1336_v26 = vsel %vm355_vm3, 1.0, %v1576_v51 }
 0xd75   :  { %v358_v27 = vsel %vm37_vm0, %v1336_v26, 0.0 }
 0xd76   :  { %359 = vadd.xlane.f32.xlu0 %v358_v27 }
 0xe03   :  { %v360_v28 = vpop.xlane.xlu0 %359 }
 0xe04   :  { %v361_v29 = vrot.slane %v360_v28, 4 }
 0xe06   :  { %v362_v30 = vadd.f32 %v361_v29, %v360_v28 }
 0xe08   :  { %v363_v31 = vrot.slane %v362_v30, 2 }
 0xe0a   :  { %v364_v32 = vadd.f32 %v363_v31, %v362_v30 }
 0xe0c   :  { %v365_v33 = vrot.slane %v364_v32, 1 }
 0xe0e   :  { %v366_v34 = vadd.f32 %v365_v33, %v364_v32 }
 0xe10   :  { %1418 = vpush %v366_v34 }
 0xe41   :  { %s1419_s29 = spop %1418 }
 0xe42   :  { %p368_p2 = scmp.le.f32.partialorder %s1419_s29, 3.0 }
 0xe44   :  { %s1927_s27 = smov (!%p368_p2, %s352_s27), %s1925_s24 }
 0xe45   :  { %s370_s30 = sor.u32 16384, %s1927_s27 }
 0xe46   :  { %s371_s4 = sxor.u32 2147483648, %s370_s30 }
 0xe47   :  { %v372_v35 = vstv %s371_s4 }
 0xe48   :  { %vm373_vm4 = vcmp.lt.s32.totalorder %v1653_v50, %v372_v35 }
 0xe49   :  { %v1337_v36 = vsel %vm373_vm4, 1.0, %v1576_v51 }
 0xe4a   :  { %v376_v37 = vsel %vm37_vm0, %v1337_v36, 0.0 }
 0xe4b   :  { %377 = vadd.xlane.f32.xlu1 %v376_v37 }
 0xed8   :  { %v378_v38 = vpop.xlane.xlu1 %377 }
 0xed9   :  { %v379_v39 = vrot.slane %v378_v38, 4 }
 0xedb   :  { %v380_v40 = vadd.f32 %v379_v39, %v378_v38 }
 0xedd   :  { %v381_v41 = vrot.slane %v380_v40, 2 }
 0xedf   :  { %v382_v42 = vadd.f32 %v381_v41, %v380_v40 }
 0xee1   :  { %v383_v43 = vrot.slane %v382_v42, 1 }
 0xee3   :  { %v384_v44 = vadd.f32 %v383_v43, %v382_v42 }
 0xee5   :  { %1420 = vpush %v384_v44 }
 0xf16   :  { %s1421_s5 = spop %1420 }
 0xf17   :  { %p386_p3 = scmp.le.f32.partialorder %s1421_s5, 3.0 }
 0xf19   :  { %s1929_s30 = smov (!%p386_p3, %s370_s30), %s1927_s27 }
 0xf1a   :  { %s388_s6 = sor.u32 8192, %s1929_s30 }
 0xf1b   :  { %s389_s7 = sxor.u32 2147483648, %s388_s6 }
 0xf1c   :  { %v390_v45 = vstv %s389_s7 }
 0xf1d   :  { %vm391_vm5 = vcmp.lt.s32.totalorder %v1653_v50, %v390_v45 }
 0xf1e   :  { %v1338_v46 = vsel %vm391_vm5, 1.0, %v1576_v51 }
 0xf1f   :  { %v394_v47 = vsel %vm37_vm0, %v1338_v46, 0.0 }
 0xf20   :  { %395 = vadd.xlane.f32.xlu0 %v394_v47 }
 0xfad   :  { %v396_v49 = vpop.xlane.xlu0 %395 }
 0xfae   :  { %v397_v52 = vrot.slane %v396_v49, 4 }
 0xfb0   :  { %v398_v53 = vadd.f32 %v397_v52, %v396_v49 }
 0xfb2   :  { %v399_v54 = vrot.slane %v398_v53, 2 }
 0xfb4   :  { %v400_v55 = vadd.f32 %v399_v54, %v398_v53 }
 0xfb6   :  { %v401_v56 = vrot.slane %v400_v55, 1 }
 0xfb8   :  { %v402_v57 = vadd.f32 %v401_v56, %v400_v55 }
 0xfba   :  { %1422 = vpush %v402_v57 }
 0xfeb   :  { %s1423_s8 = spop %1422 }
 0xfec   :  { %p404_p4 = scmp.le.f32.partialorder %s1423_s8, 3.0 }
 0xfee   :  { %s1931_s6 = smov (!%p404_p4, %s388_s6), %s1929_s30 }
 0xfef   :  { %s406_s0 = sor.u32 4096, %s1931_s6 }
 0xff0   :  { %s407_s9 = sxor.u32 2147483648, %s406_s0 }
 0xff1   :  { %v408_v58 = vstv %s407_s9 }
 0xff2   :  { %vm409_vm6 = vcmp.lt.s32.totalorder %v1653_v50, %v408_v58 }
 0xff3   :  { %v1339_v59 = vsel %vm409_vm6, 1.0, %v1576_v51 }
 0xff4   :  { %v412_v60 = vsel %vm37_vm0, %v1339_v59, 0.0 }
 0xff5   :  { %413 = vadd.xlane.f32.xlu1 %v412_v60 }
0x1082   :  { %v414_v61 = vpop.xlane.xlu1 %413 }
0x1083   :  { %v415_v62 = vrot.slane %v414_v61, 4 }
0x1085   :  { %v416_v63 = vadd.f32 %v415_v62, %v414_v61 }
0x1087   :  { %v417_v0 = vrot.slane %v416_v63, 2 }
0x1089   :  { %v418_v1 = vadd.f32 %v417_v0, %v416_v63 }
0x108b   :  { %v419_v2 = vrot.slane %v418_v1, 1 }
0x108d   :  { %v420_v3 = vadd.f32 %v419_v2, %v418_v1 }
0x108f   :  { %1424 = vpush %v420_v3 }
0x10c0   :  { %s1425_s10 = spop %1424 }
0x10c1   :  { %p422_p5 = scmp.le.f32.partialorder %s1425_s10, 3.0 }
0x10c3   :  { %s1933_s0 = smov (!%p422_p5, %s406_s0), %s1931_s6 }
0x10c4   :  { %s424_s11 = sor.u32 2048, %s1933_s0 }
0x10c5   :  { %s425_s12 = sxor.u32 2147483648, %s424_s11 }
0x10c6   :  { %v426_v4 = vstv %s425_s12 }
0x10c7   :  { %vm427_vm7 = vcmp.lt.s32.totalorder %v1653_v50, %v426_v4 }
0x10c8   :  { %v1340_v5 = vsel %vm427_vm7, 1.0, %v1576_v51 }
0x10c9   :  { %v430_v6 = vsel %vm37_vm0, %v1340_v5, 0.0 }
0x10ca   :  { %431 = vadd.xlane.f32.xlu0 %v430_v6 }
0x1157   :  { %v432_v7 = vpop.xlane.xlu0 %431 }
0x1158   :  { %v433_v8 = vrot.slane %v432_v7, 4 }
0x115a   :  { %v434_v9 = vadd.f32 %v433_v8, %v432_v7 }
0x115c   :  { %v435_v10 = vrot.slane %v434_v9, 2 }
0x115e   :  { %v436_v11 = vadd.f32 %v435_v10, %v434_v9 }
0x1160   :  { %v437_v12 = vrot.slane %v436_v11, 1 }
0x1162   :  { %v438_v13 = vadd.f32 %v437_v12, %v436_v11 }
0x1164   :  { %1426 = vpush %v438_v13 }
0x1195   :  { %s1427_s13 = spop %1426 }
0x1196   :  { %p440_p6 = scmp.le.f32.partialorder %s1427_s13, 3.0 }
0x1198   :  { %s1935_s11 = smov (!%p440_p6, %s424_s11), %s1933_s0 }
0x1199   :  { %s442_s14 = sor.u32 1024, %s1935_s11 }
0x119a   :  { %s443_s15 = sxor.u32 2147483648, %s442_s14 }
0x119b   :  { %v444_v14 = vstv %s443_s15 }
0x119c   :  { %vm445_vm8 = vcmp.lt.s32.totalorder %v1653_v50, %v444_v14 }
0x119d   :  { %v1341_v15 = vsel %vm445_vm8, 1.0, %v1576_v51 }
0x119e   :  { %v448_v16 = vsel %vm37_vm0, %v1341_v15, 0.0 }
0x119f   :  { %449 = vadd.xlane.f32.xlu1 %v448_v16 }
0x122c   :  { %v450_v17 = vpop.xlane.xlu1 %449 }
0x122d   :  { %v451_v18 = vrot.slane %v450_v17, 4 }
0x122f   :  { %v452_v19 = vadd.f32 %v451_v18, %v450_v17 }
0x1231   :  { %v453_v20 = vrot.slane %v452_v19, 2 }
0x1233   :  { %v454_v21 = vadd.f32 %v453_v20, %v452_v19 }
0x1235   :  { %v455_v22 = vrot.slane %v454_v21, 1 }
0x1237   :  { %v456_v23 = vadd.f32 %v455_v22, %v454_v21 }
0x1239   :  { %1428 = vpush %v456_v23 }
0x126a   :  { %s1429_s16 = spop %1428 }
0x126b   :  { %p458_p7 = scmp.le.f32.partialorder %s1429_s16, 3.0 }
0x126d   :  { %s1937_s14 = smov (!%p458_p7, %s442_s14), %s1935_s11 }
0x126e   :  { %s460_s17 = sor.u32 512, %s1937_s14 }
0x126f   :  { %s461_s18 = sxor.u32 2147483648, %s460_s17 }
0x1270   :  { %v462_v24 = vstv %s461_s18 }
0x1271   :  { %vm463_vm9 = vcmp.lt.s32.totalorder %v1653_v50, %v462_v24 }
0x1272   :  { %v1342_v25 = vsel %vm463_vm9, 1.0, %v1576_v51 }
0x1273   :  { %v466_v26 = vsel %vm37_vm0, %v1342_v25, 0.0 }
0x1274   :  { %467 = vadd.xlane.f32.xlu0 %v466_v26 }
0x1301   :  { %v468_v27 = vpop.xlane.xlu0 %467 }
0x1302   :  { %v469_v28 = vrot.slane %v468_v27, 4 }
0x1304   :  { %v470_v29 = vadd.f32 %v469_v28, %v468_v27 }
0x1306   :  { %v471_v30 = vrot.slane %v470_v29, 2 }
0x1308   :  { %v472_v31 = vadd.f32 %v471_v30, %v470_v29 }
0x130a   :  { %v473_v32 = vrot.slane %v472_v31, 1 }
0x130c   :  { %v474_v33 = vadd.f32 %v473_v32, %v472_v31 }
0x130e   :  { %1430 = vpush %v474_v33 }
0x133f   :  { %s1431_s19 = spop %1430 }
0x1340   :  { %p476_p8 = scmp.le.f32.partialorder %s1431_s19, 3.0 }
0x1342   :  { %s1939_s17 = smov (!%p476_p8, %s460_s17), %s1937_s14 }
0x1343   :  { %s478_s20 = sor.u32 256, %s1939_s17 }
0x1344   :  { %s479_s21 = sxor.u32 2147483648, %s478_s20 }
0x1345   :  { %v480_v34 = vstv %s479_s21 }
0x1346   :  { %vm481_vm10 = vcmp.lt.s32.totalorder %v1653_v50, %v480_v34 }
0x1347   :  { %v1343_v35 = vsel %vm481_vm10, 1.0, %v1576_v51 }
0x1348   :  { %v484_v36 = vsel %vm37_vm0, %v1343_v35, 0.0 }
0x1349   :  { %485 = vadd.xlane.f32.xlu1 %v484_v36 }
0x13d6   :  { %v486_v37 = vpop.xlane.xlu1 %485 }
0x13d7   :  { %v487_v38 = vrot.slane %v486_v37, 4 }
0x13d9   :  { %v488_v39 = vadd.f32 %v487_v38, %v486_v37 }
0x13db   :  { %v489_v40 = vrot.slane %v488_v39, 2 }
0x13dd   :  { %v490_v41 = vadd.f32 %v489_v40, %v488_v39 }
0x13df   :  { %v491_v42 = vrot.slane %v490_v41, 1 }
0x13e1   :  { %v492_v43 = vadd.f32 %v491_v42, %v490_v41 }
0x13e3   :  { %1432 = vpush %v492_v43 }
0x1414   :  { %s1433_s22 = spop %1432 }
0x1415   :  { %p494_p9 = scmp.le.f32.partialorder %s1433_s22, 3.0 }
0x1417   :  { %s1941_s20 = smov (!%p494_p9, %s478_s20), %s1939_s17 }
0x1418   :  { %s496_s23 = sor.u32 128, %s1941_s20 }
0x1419   :  { %s497_s24 = sxor.u32 2147483648, %s496_s23 }
0x141a   :  { %v498_v44 = vstv %s497_s24 }
0x141b   :  { %vm499_vm11 = vcmp.lt.s32.totalorder %v1653_v50, %v498_v44 }
0x141c   :  { %v1344_v45 = vsel %vm499_vm11, 1.0, %v1576_v51 }
0x141d   :  { %v502_v46 = vsel %vm37_vm0, %v1344_v45, 0.0 }
0x141e   :  { %503 = vadd.xlane.f32.xlu0 %v502_v46 }
0x14ab   :  { %v504_v47 = vpop.xlane.xlu0 %503 }
0x14ac   :  { %v505_v49 = vrot.slane %v504_v47, 4 }
0x14ae   :  { %v506_v52 = vadd.f32 %v505_v49, %v504_v47 }
0x14b0   :  { %v507_v53 = vrot.slane %v506_v52, 2 }
0x14b2   :  { %v508_v54 = vadd.f32 %v507_v53, %v506_v52 }
0x14b4   :  { %v509_v55 = vrot.slane %v508_v54, 1 }
0x14b6   :  { %v510_v56 = vadd.f32 %v509_v55, %v508_v54 }
0x14b8   :  { %1434 = vpush %v510_v56 }
0x14e9   :  { %s1435_s25 = spop %1434 }
0x14ea   :  { %p512_p10 = scmp.le.f32.partialorder %s1435_s25, 3.0 }
0x14ec   :  { %s1943_s23 = smov (!%p512_p10, %s496_s23), %s1941_s20 }
0x14ed   :  { %s514_s26 = sor.u32 64, %s1943_s23 }
0x14ee   :  { %s515_s27 = sxor.u32 2147483648, %s514_s26 }
0x14ef   :  { %v516_v57 = vstv %s515_s27 }
0x14f0   :  { %vm517_vm12 = vcmp.lt.s32.totalorder %v1653_v50, %v516_v57 }
0x14f1   :  { %v1345_v58 = vsel %vm517_vm12, 1.0, %v1576_v51 }
0x14f2   :  { %v520_v59 = vsel %vm37_vm0, %v1345_v58, 0.0 }
0x14f3   :  { %521 = vadd.xlane.f32.xlu1 %v520_v59 }
0x1580   :  { %v522_v60 = vpop.xlane.xlu1 %521 }
0x1581   :  { %v523_v61 = vrot.slane %v522_v60, 4 }
0x1583   :  { %v524_v62 = vadd.f32 %v523_v61, %v522_v60 }
0x1585   :  { %v525_v63 = vrot.slane %v524_v62, 2 }
0x1587   :  { %v526_v0 = vadd.f32 %v525_v63, %v524_v62 }
0x1589   :  { %v527_v1 = vrot.slane %v526_v0, 1 }
0x158b   :  { %v528_v2 = vadd.f32 %v527_v1, %v526_v0 }
0x158d   :  { %1436 = vpush %v528_v2 }
0x15be   :  { %s1437_s28 = spop %1436 }
0x15bf   :  { %p530_p11 = scmp.le.f32.partialorder %s1437_s28, 3.0 }
0x15c1   :  { %s1945_s26 = smov (!%p530_p11, %s514_s26), %s1943_s23 }
0x15c2   :  { %s532_s29 = sor.u32 32, %s1945_s26 }
0x15c3   :  { %s533_s30 = sxor.u32 2147483648, %s532_s29 }
0x15c4   :  { %v534_v3 = vstv %s533_s30 }
0x15c5   :  { %vm535_vm13 = vcmp.lt.s32.totalorder %v1653_v50, %v534_v3 }
0x15c6   :  { %v1346_v4 = vsel %vm535_vm13, 1.0, %v1576_v51 }
0x15c7   :  { %v538_v5 = vsel %vm37_vm0, %v1346_v4, 0.0 }
0x15c8   :  { %539 = vadd.xlane.f32.xlu0 %v538_v5 }
0x1655   :  { %v540_v6 = vpop.xlane.xlu0 %539 }
0x1656   :  { %v541_v7 = vrot.slane %v540_v6, 4 }
0x1658   :  { %v542_v8 = vadd.f32 %v541_v7, %v540_v6 }
0x165a   :  { %v543_v9 = vrot.slane %v542_v8, 2 }
0x165c   :  { %v544_v10 = vadd.f32 %v543_v9, %v542_v8 }
0x165e   :  { %v545_v11 = vrot.slane %v544_v10, 1 }
0x1660   :  { %v546_v12 = vadd.f32 %v545_v11, %v544_v10 }
0x1662   :  { %1438 = vpush %v546_v12 }
0x1693   :  { %s1439_s4 = spop %1438 }
0x1694   :  { %p548_p12 = scmp.le.f32.partialorder %s1439_s4, 3.0 }
0x1696   :  { %s1947_s29 = smov (!%p548_p12, %s532_s29), %s1945_s26 }
0x1697   :  { %s550_s5 = sor.u32 16, %s1947_s29 }
0x1698   :  { %s551_s6 = sxor.u32 2147483648, %s550_s5 }
0x1699   :  { %v552_v13 = vstv %s551_s6 }
0x169a   :  { %vm553_vm14 = vcmp.lt.s32.totalorder %v1653_v50, %v552_v13 }
0x169b   :  { %v1347_v14 = vsel %vm553_vm14, 1.0, %v1576_v51 }
0x169c   :  { %v556_v15 = vsel %vm37_vm0, %v1347_v14, 0.0 }
0x169d   :  { %557 = vadd.xlane.f32.xlu1 %v556_v15 }
0x172a   :  { %v558_v16 = vpop.xlane.xlu1 %557 }
0x172b   :  { %v559_v17 = vrot.slane %v558_v16, 4 }
0x172d   :  { %v560_v18 = vadd.f32 %v559_v17, %v558_v16 }
0x172f   :  { %v561_v19 = vrot.slane %v560_v18, 2 }
0x1731   :  { %v562_v20 = vadd.f32 %v561_v19, %v560_v18 }
0x1733   :  { %v563_v21 = vrot.slane %v562_v20, 1 }
0x1735   :  { %v564_v22 = vadd.f32 %v563_v21, %v562_v20 }
0x1737   :  { %1440 = vpush %v564_v22 }
0x1768   :  { %s1441_s7 = spop %1440 }
0x1769   :  { %p566_p13 = scmp.le.f32.partialorder %s1441_s7, 3.0 }
0x176b   :  { %s1949_s5 = smov (!%p566_p13, %s550_s5), %s1947_s29 }
0x176c   :  { %s568_s8 = sor.u32 8, %s1949_s5 }
0x176d   :  { %s569_s0 = sxor.u32 2147483648, %s568_s8 }
0x176e   :  { %v570_v23 = vstv %s569_s0 }
0x176f   :  { %vm571_vm15 = vcmp.lt.s32.totalorder %v1653_v50, %v570_v23 }
0x1770   :  { %v1348_v24 = vsel %vm571_vm15, 1.0, %v1576_v51 }
0x1771   :  { %v574_v25 = vsel %vm37_vm0, %v1348_v24, 0.0 }
0x1772   :  { %575 = vadd.xlane.f32.xlu0 %v574_v25 }
0x17ff   :  { %v576_v26 = vpop.xlane.xlu0 %575 }
0x1800   :  { %v577_v27 = vrot.slane %v576_v26, 4 }
0x1802   :  { %v578_v28 = vadd.f32 %v577_v27, %v576_v26 }
0x1804   :  { %v579_v29 = vrot.slane %v578_v28, 2 }
0x1806   :  { %v580_v30 = vadd.f32 %v579_v29, %v578_v28 }
0x1808   :  { %v581_v31 = vrot.slane %v580_v30, 1 }
0x180a   :  { %v582_v32 = vadd.f32 %v581_v31, %v580_v30 }
0x180c   :  { %1442 = vpush %v582_v32 }
0x183d   :  { %s1443_s9 = spop %1442 }
0x183e   :  { %p584_p0 = scmp.le.f32.partialorder %s1443_s9, 3.0 }
0x1840   :  { %s1951_s8 = smov (!%p584_p0, %s568_s8), %s1949_s5 }
0x1841   :  { %s586_s10 = sor.u32 4, %s1951_s8 }
0x1842   :  { %s587_s11 = sxor.u32 2147483648, %s586_s10 }
0x1843   :  { %v588_v33 = vstv %s587_s11 }
0x1844   :  { %vm589_vm1 = vcmp.lt.s32.totalorder %v1653_v50, %v588_v33 }
0x1845   :  { %v1349_v34 = vsel %vm589_vm1, 1.0, %v1576_v51 }
0x1846   :  { %v592_v35 = vsel %vm37_vm0, %v1349_v34, 0.0 }
0x1847   :  { %593 = vadd.xlane.f32.xlu1 %v592_v35 }
0x18d4   :  { %v594_v36 = vpop.xlane.xlu1 %593 }
0x18d5   :  { %v595_v37 = vrot.slane %v594_v36, 4 }
0x18d7   :  { %v596_v38 = vadd.f32 %v595_v37, %v594_v36 }
0x18d9   :  { %v597_v39 = vrot.slane %v596_v38, 2 }
0x18db   :  { %v598_v40 = vadd.f32 %v597_v39, %v596_v38 }
0x18dd   :  { %v599_v41 = vrot.slane %v598_v40, 1 }
0x18df   :  { %v600_v42 = vadd.f32 %v599_v41, %v598_v40 }
0x18e1   :  { %1444 = vpush %v600_v42 }
0x1912   :  { %s1445_s12 = spop %1444 }
0x1913   :  { %p602_p1 = scmp.le.f32.partialorder %s1445_s12, 3.0 }
0x1915   :  { %s1953_s10 = smov (!%p602_p1, %s586_s10), %s1951_s8 }
0x1916   :  { %s604_s13 = sor.u32 2, %s1953_s10 }
0x1917   :  { %s605_s14 = sxor.u32 2147483648, %s604_s13 }
0x1918   :  { %v606_v43 = vstv %s605_s14 }
0x1919   :  { %vm607_vm2 = vcmp.lt.s32.totalorder %v1653_v50, %v606_v43 }
0x191a   :  { %v1350_v44 = vsel %vm607_vm2, 1.0, %v1576_v51 }
0x191b   :  { %v610_v45 = vsel %vm37_vm0, %v1350_v44, 0.0 }
0x191c   :  { %611 = vadd.xlane.f32.xlu0 %v610_v45 }
0x19a9   :  { %v612_v46 = vpop.xlane.xlu0 %611 }
0x19aa   :  { %v613_v47 = vrot.slane %v612_v46, 4 }
0x19ac   :  { %v614_v49 = vadd.f32 %v613_v47, %v612_v46 }
0x19ae   :  { %v615_v52 = vrot.slane %v614_v49, 2 }
0x19b0   :  { %v616_v53 = vadd.f32 %v615_v52, %v614_v49 }
0x19b2   :  { %v617_v54 = vrot.slane %v616_v53, 1 }
0x19b4   :  { %v618_v55 = vadd.f32 %v617_v54, %v616_v53 }
0x19b6   :  { %1446 = vpush %v618_v55 }
0x19e7   :  { %s1447_s15 = spop %1446 }
0x19e8   :  { %p620_p2 = scmp.le.f32.partialorder %s1447_s15, 3.0 }
0x19ea   :  { %s1955_s13 = smov (!%p620_p2, %s604_s13), %s1953_s10 }
0x19eb   :  { %s622_s16 = sor.u32 1, %s1955_s13 }
0x19ec   :  { %s623_s17 = sxor.u32 2147483648, %s622_s16 }
0x19ed   :  { %v624_v56 = vstv %s623_s17 }
0x19ee   :  { %vm625_vm3 = vcmp.lt.s32.totalorder %v1653_v50, %v624_v56 }
0x19ef   :  { %v1351_v57 = vsel %vm625_vm3, 1.0, %v1576_v51 }
0x19f0   :  { %v628_v58 = vsel %vm37_vm0, %v1351_v57, 0.0 }
0x19f1   :  { %629 = vadd.xlane.f32.xlu1 %v628_v58 }
0x1a7e   :  { %v630_v59 = vpop.xlane.xlu1 %629 }
0x1a7f   :  { %v631_v60 = vrot.slane %v630_v59, 4 }
0x1a81   :  { %v632_v61 = vadd.f32 %v631_v60, %v630_v59 }
0x1a83   :  { %v633_v62 = vrot.slane %v632_v61, 2 }
0x1a85   :  { %v634_v63 = vadd.f32 %v633_v62, %v632_v61 }
0x1a87   :  { %v635_v0 = vrot.slane %v634_v63, 1 }
0x1a89   :  { %v636_v1 = vadd.f32 %v635_v0, %v634_v63 }
0x1a8b   :  { %1448 = vpush %v636_v1 }
0x1abc   :  { %s1449_s18 = spop %1448 }
0x1abd   :  { %p638_p3 = scmp.le.f32.partialorder %s1449_s18, 3.0 }
0x1abf   :  { %s1957_s16 = smov (!%p638_p3, %s622_s16), %s1955_s13 }
0x1ac0   :  { %s640_s19 = sxor.u32 2147483648, %s1957_s16 }
0x1ac1   :  { %v641_v2 = vstv %s640_s19 }
0x1ac2   :  { %vm642_vm4 = vcmp.le.s32.totalorder %v1653_v50, %v641_v2 }
0x1ac3   :  { %v643_v3 = vsel %vm642_vm4, %v1648_v48, -inf }
0x1ac4   :  { %v644_v4 = vsel %vm37_vm0, %v643_v3, -inf }
0x1ac5   :  { %645 = vmax.xlane.f32.xlu0 %v644_v4 }
0x1b52   :  { %v646_v5 = vpop.xlane.xlu0 %645 }
0x1b53   :  { %v647_v6 = vrot.slane %v646_v5, 4 }
0x1b55   :  { %v648_v7 = vmax.f32 %v646_v5, %v647_v6 }
0x1b57   :  { %v649_v8 = vrot.slane %v648_v7, 2 }
0x1b59   :  { %v650_v9 = vmax.f32 %v648_v7, %v649_v8 }
0x1b5b   :  { %v651_v10 = vrot.slane %v650_v9, 1 }
0x1b5d   :  { %v652_v11 = vmax.f32 %v650_v9, %v651_v10 }
0x1b5f   :  { %1450 = vpush %v652_v11 }
0x1b90   :  { %s1754_s20 = spop %1450 }
0x1b91   :  { %v654_v12 = vstv %s1754_s20  ;;  %1279 = sst [smem:[#allocation2 + $0x4]] %s1754_s20 }
0x1b92   :  { %v655_v50 = vsub.f32 %v1648_v48, %v654_v12 }
0x1b94   :  { %v1759_v13 = vand.u32 2147483647, %v655_v50 }
0x1b96   :  { %vm658_vm5 = vcmp.lt.s32.totalorder %v1759_v13, 1073741824 }
0x1b97   :  { %v1352_v14 = vsel %vm658_vm5, 1.0, %v1576_v51 }
0x1b98   :  { %v661_v15 = vsel %vm37_vm0, %v1352_v14, 0.0 }
0x1b99   :  { %662 = vadd.xlane.f32.xlu1 %v661_v15 }
0x1c26   :  { %v663_v16 = vpop.xlane.xlu1 %662 }
0x1c27   :  { %v664_v17 = vrot.slane %v663_v16, 4 }
0x1c29   :  { %v665_v18 = vadd.f32 %v664_v17, %v663_v16 }
0x1c2b   :  { %v666_v19 = vrot.slane %v665_v18, 2 }
0x1c2d   :  { %v667_v20 = vadd.f32 %v666_v19, %v665_v18 }
0x1c2f   :  { %v668_v21 = vrot.slane %v667_v20, 1 }
0x1c31   :  { %v669_v22 = vadd.f32 %v668_v21, %v667_v20 }
0x1c33   :  { %1452 = vpush %v669_v22 }
0x1c64   :  { %s1453_s21 = spop %1452 }
0x1c65   :  { %p671_p4 = scmp.le.f32.partialorder %s1453_s21, 3.0 }
0x1c67   :  { %s672_s22 = scalar_select %p671_p4, 1073741824, 0 }
0x1c69   :  { %s673_s23 = sor.u32 536870912, %s672_s22 }
0x1c6a   :  { %v674_v23 = vstv %s673_s23 }
0x1c6b   :  { %vm675_vm6 = vcmp.lt.s32.totalorder %v1759_v13, %v674_v23 }
0x1c6c   :  { %v1353_v24 = vsel %vm675_vm6, 1.0, %v1576_v51 }
0x1c6d   :  { %v678_v25 = vsel %vm37_vm0, %v1353_v24, 0.0 }
0x1c6e   :  { %679 = vadd.xlane.f32.xlu0 %v678_v25 }
0x1cfb   :  { %v680_v26 = vpop.xlane.xlu0 %679 }
0x1cfc   :  { %v681_v27 = vrot.slane %v680_v26, 4 }
0x1cfe   :  { %v682_v28 = vadd.f32 %v681_v27, %v680_v26 }
0x1d00   :  { %v683_v29 = vrot.slane %v682_v28, 2 }
0x1d02   :  { %v684_v30 = vadd.f32 %v683_v29, %v682_v28 }
0x1d04   :  { %v685_v31 = vrot.slane %v684_v30, 1 }
0x1d06   :  { %v686_v32 = vadd.f32 %v685_v31, %v684_v30 }
0x1d08   :  { %1454 = vpush %v686_v32 }
0x1d39   :  { %s1455_s24 = spop %1454 }
0x1d3a   :  { %p688_p5 = scmp.le.f32.partialorder %s1455_s24, 3.0 }
0x1d3c   :  { %s1959_s23 = smov (!%p688_p5, %s673_s23), %s672_s22 }
0x1d3d   :  { %s690_s25 = sor.u32 268435456, %s1959_s23 }
0x1d3e   :  { %v691_v33 = vstv %s690_s25 }
0x1d3f   :  { %vm692_vm7 = vcmp.lt.s32.totalorder %v1759_v13, %v691_v33 }
0x1d40   :  { %v1354_v34 = vsel %vm692_vm7, 1.0, %v1576_v51 }
0x1d41   :  { %v695_v35 = vsel %vm37_vm0, %v1354_v34, 0.0 }
0x1d42   :  { %696 = vadd.xlane.f32.xlu1 %v695_v35 }
0x1dcf   :  { %v697_v36 = vpop.xlane.xlu1 %696 }
0x1dd0   :  { %v698_v37 = vrot.slane %v697_v36, 4 }
0x1dd2   :  { %v699_v38 = vadd.f32 %v698_v37, %v697_v36 }
0x1dd4   :  { %v700_v39 = vrot.slane %v699_v38, 2 }
0x1dd6   :  { %v701_v40 = vadd.f32 %v700_v39, %v699_v38 }
0x1dd8   :  { %v702_v41 = vrot.slane %v701_v40, 1 }
0x1dda   :  { %v703_v42 = vadd.f32 %v702_v41, %v701_v40 }
0x1ddc   :  { %1456 = vpush %v703_v42 }
0x1e0d   :  { %s1457_s26 = spop %1456 }
0x1e0e   :  { %p705_p6 = scmp.le.f32.partialorder %s1457_s26, 3.0 }
0x1e10   :  { %s1961_s25 = smov (!%p705_p6, %s690_s25), %s1959_s23 }
0x1e11   :  { %s707_s27 = sor.u32 134217728, %s1961_s25 }
0x1e12   :  { %v708_v43 = vstv %s707_s27 }
0x1e13   :  { %vm709_vm8 = vcmp.lt.s32.totalorder %v1759_v13, %v708_v43 }
0x1e14   :  { %v1355_v44 = vsel %vm709_vm8, 1.0, %v1576_v51 }
0x1e15   :  { %v712_v45 = vsel %vm37_vm0, %v1355_v44, 0.0 }
0x1e16   :  { %713 = vadd.xlane.f32.xlu0 %v712_v45 }
0x1ea3   :  { %v714_v46 = vpop.xlane.xlu0 %713 }
0x1ea4   :  { %v715_v47 = vrot.slane %v714_v46, 4 }
0x1ea6   :  { %v716_v49 = vadd.f32 %v715_v47, %v714_v46 }
0x1ea8   :  { %v717_v52 = vrot.slane %v716_v49, 2 }
0x1eaa   :  { %v718_v53 = vadd.f32 %v717_v52, %v716_v49 }
0x1eac   :  { %v719_v54 = vrot.slane %v718_v53, 1 }
0x1eae   :  { %v720_v55 = vadd.f32 %v719_v54, %v718_v53 }
0x1eb0   :  { %1458 = vpush %v720_v55 }
0x1ee1   :  { %s1459_s28 = spop %1458 }
0x1ee2   :  { %p722_p7 = scmp.le.f32.partialorder %s1459_s28, 3.0 }
0x1ee4   :  { %s1963_s27 = smov (!%p722_p7, %s707_s27), %s1961_s25 }
0x1ee5   :  { %s724_s29 = sor.u32 67108864, %s1963_s27 }
0x1ee6   :  { %v725_v56 = vstv %s724_s29 }
0x1ee7   :  { %vm726_vm9 = vcmp.lt.s32.totalorder %v1759_v13, %v725_v56 }
0x1ee8   :  { %v1356_v57 = vsel %vm726_vm9, 1.0, %v1576_v51 }
0x1ee9   :  { %v729_v58 = vsel %vm37_vm0, %v1356_v57, 0.0 }
0x1eea   :  { %730 = vadd.xlane.f32.xlu1 %v729_v58 }
0x1f77   :  { %v731_v59 = vpop.xlane.xlu1 %730 }
0x1f78   :  { %v732_v60 = vrot.slane %v731_v59, 4 }
0x1f7a   :  { %v733_v61 = vadd.f32 %v732_v60, %v731_v59 }
0x1f7c   :  { %v734_v62 = vrot.slane %v733_v61, 2 }
0x1f7e   :  { %v735_v63 = vadd.f32 %v734_v62, %v733_v61 }
0x1f80   :  { %v736_v0 = vrot.slane %v735_v63, 1 }
0x1f82   :  { %v737_v1 = vadd.f32 %v736_v0, %v735_v63 }
0x1f84   :  { %1460 = vpush %v737_v1 }
0x1fb5   :  { %s1461_s30 = spop %1460 }
0x1fb6   :  { %p739_p8 = scmp.le.f32.partialorder %s1461_s30, 3.0 }
0x1fb8   :  { %s1965_s29 = smov (!%p739_p8, %s724_s29), %s1963_s27 }
0x1fb9   :  { %s741_s4 = sor.u32 33554432, %s1965_s29 }
0x1fba   :  { %v742_v2 = vstv %s741_s4 }
0x1fbb   :  { %vm743_vm10 = vcmp.lt.s32.totalorder %v1759_v13, %v742_v2 }
0x1fbc   :  { %v1357_v3 = vsel %vm743_vm10, 1.0, %v1576_v51 }
0x1fbd   :  { %v746_v4 = vsel %vm37_vm0, %v1357_v3, 0.0 }
0x1fbe   :  { %747 = vadd.xlane.f32.xlu0 %v746_v4 }
0x204b   :  { %v748_v5 = vpop.xlane.xlu0 %747 }
0x204c   :  { %v749_v6 = vrot.slane %v748_v5, 4 }
0x204e   :  { %v750_v7 = vadd.f32 %v749_v6, %v748_v5 }
0x2050   :  { %v751_v8 = vrot.slane %v750_v7, 2 }
0x2052   :  { %v752_v9 = vadd.f32 %v751_v8, %v750_v7 }
0x2054   :  { %v753_v10 = vrot.slane %v752_v9, 1 }
0x2056   :  { %v754_v11 = vadd.f32 %v753_v10, %v752_v9 }
0x2058   :  { %1462 = vpush %v754_v11 }
0x2089   :  { %s1463_s5 = spop %1462 }
0x208a   :  { %p756_p9 = scmp.le.f32.partialorder %s1463_s5, 3.0 }
0x208c   :  { %s1967_s4 = smov (!%p756_p9, %s741_s4), %s1965_s29 }
0x208d   :  { %s758_s6 = sor.u32 16777216, %s1967_s4 }
0x208e   :  { %v759_v12 = vstv %s758_s6 }
0x208f   :  { %vm760_vm11 = vcmp.lt.s32.totalorder %v1759_v13, %v759_v12 }
0x2090   :  { %v1358_v50 = vsel %vm760_vm11, 1.0, %v1576_v51 }
0x2091   :  { %v763_v14 = vsel %vm37_vm0, %v1358_v50, 0.0 }
0x2092   :  { %764 = vadd.xlane.f32.xlu1 %v763_v14 }
0x211f   :  { %v765_v15 = vpop.xlane.xlu1 %764 }
0x2120   :  { %v766_v16 = vrot.slane %v765_v15, 4 }
0x2122   :  { %v767_v17 = vadd.f32 %v766_v16, %v765_v15 }
0x2124   :  { %v768_v18 = vrot.slane %v767_v17, 2 }
0x2126   :  { %v769_v19 = vadd.f32 %v768_v18, %v767_v17 }
0x2128   :  { %v770_v20 = vrot.slane %v769_v19, 1 }
0x212a   :  { %v771_v21 = vadd.f32 %v770_v20, %v769_v19 }
0x212c   :  { %1464 = vpush %v771_v21 }
0x215d   :  { %s1465_s7 = spop %1464 }
0x215e   :  { %p773_p10 = scmp.le.f32.partialorder %s1465_s7, 3.0 }
0x2160   :  { %s1969_s6 = smov (!%p773_p10, %s758_s6), %s1967_s4 }
0x2161   :  { %s775_s8 = sor.u32 8388608, %s1969_s6 }
0x2162   :  { %v776_v22 = vstv %s775_s8 }
0x2163   :  { %vm777_vm12 = vcmp.lt.s32.totalorder %v1759_v13, %v776_v22 }
0x2164   :  { %v1359_v23 = vsel %vm777_vm12, 1.0, %v1576_v51 }
0x2165   :  { %v780_v24 = vsel %vm37_vm0, %v1359_v23, 0.0 }
0x2166   :  { %781 = vadd.xlane.f32.xlu0 %v780_v24 }
0x21f3   :  { %v782_v25 = vpop.xlane.xlu0 %781 }
0x21f4   :  { %v783_v26 = vrot.slane %v782_v25, 4 }
0x21f6   :  { %v784_v27 = vadd.f32 %v783_v26, %v782_v25 }
0x21f8   :  { %v785_v28 = vrot.slane %v784_v27, 2 }
0x21fa   :  { %v786_v29 = vadd.f32 %v785_v28, %v784_v27 }
0x21fc   :  { %v787_v30 = vrot.slane %v786_v29, 1 }
0x21fe   :  { %v788_v31 = vadd.f32 %v787_v30, %v786_v29 }
0x2200   :  { %1466 = vpush %v788_v31 }
0x2231   :  { %s1467_s0 = spop %1466 }
0x2232   :  { %p790_p11 = scmp.le.f32.partialorder %s1467_s0, 3.0 }
0x2234   :  { %s1971_s8 = smov (!%p790_p11, %s775_s8), %s1969_s6 }
0x2235   :  { %s792_s9 = sor.u32 4194304, %s1971_s8 }
0x2236   :  { %v793_v32 = vstv %s792_s9 }
0x2237   :  { %vm794_vm13 = vcmp.lt.s32.totalorder %v1759_v13, %v793_v32 }
0x2238   :  { %v1360_v33 = vsel %vm794_vm13, 1.0, %v1576_v51 }
0x2239   :  { %v797_v34 = vsel %vm37_vm0, %v1360_v33, 0.0 }
0x223a   :  { %798 = vadd.xlane.f32.xlu1 %v797_v34 }
0x22c7   :  { %v799_v35 = vpop.xlane.xlu1 %798 }
0x22c8   :  { %v800_v36 = vrot.slane %v799_v35, 4 }
0x22ca   :  { %v801_v37 = vadd.f32 %v800_v36, %v799_v35 }
0x22cc   :  { %v802_v38 = vrot.slane %v801_v37, 2 }
0x22ce   :  { %v803_v39 = vadd.f32 %v802_v38, %v801_v37 }
0x22d0   :  { %v804_v40 = vrot.slane %v803_v39, 1 }
0x22d2   :  { %v805_v41 = vadd.f32 %v804_v40, %v803_v39 }
0x22d4   :  { %1468 = vpush %v805_v41 }
0x2305   :  { %s1469_s10 = spop %1468 }
0x2306   :  { %p807_p12 = scmp.le.f32.partialorder %s1469_s10, 3.0 }
0x2308   :  { %s1973_s9 = smov (!%p807_p12, %s792_s9), %s1971_s8 }
0x2309   :  { %s809_s11 = sor.u32 2097152, %s1973_s9 }
0x230a   :  { %v810_v42 = vstv %s809_s11 }
0x230b   :  { %vm811_vm14 = vcmp.lt.s32.totalorder %v1759_v13, %v810_v42 }
0x230c   :  { %v1361_v43 = vsel %vm811_vm14, 1.0, %v1576_v51 }
0x230d   :  { %v814_v44 = vsel %vm37_vm0, %v1361_v43, 0.0 }
0x230e   :  { %815 = vadd.xlane.f32.xlu0 %v814_v44 }
0x239b   :  { %v816_v45 = vpop.xlane.xlu0 %815 }
0x239c   :  { %v817_v46 = vrot.slane %v816_v45, 4 }
0x239e   :  { %v818_v47 = vadd.f32 %v817_v46, %v816_v45 }
0x23a0   :  { %v819_v49 = vrot.slane %v818_v47, 2 }
0x23a2   :  { %v820_v52 = vadd.f32 %v819_v49, %v818_v47 }
0x23a4   :  { %v821_v53 = vrot.slane %v820_v52, 1 }
0x23a6   :  { %v822_v54 = vadd.f32 %v821_v53, %v820_v52 }
0x23a8   :  { %1470 = vpush %v822_v54 }
0x23d9   :  { %s1471_s12 = spop %1470 }
0x23da   :  { %p824_p13 = scmp.le.f32.partialorder %s1471_s12, 3.0 }
0x23dc   :  { %s1975_s11 = smov (!%p824_p13, %s809_s11), %s1973_s9 }
0x23dd   :  { %s826_s13 = sor.u32 1048576, %s1975_s11 }
0x23de   :  { %v827_v55 = vstv %s826_s13 }
0x23df   :  { %vm828_vm15 = vcmp.lt.s32.totalorder %v1759_v13, %v827_v55 }
0x23e0   :  { %v1362_v56 = vsel %vm828_vm15, 1.0, %v1576_v51 }
0x23e1   :  { %v831_v57 = vsel %vm37_vm0, %v1362_v56, 0.0 }
0x23e2   :  { %832 = vadd.xlane.f32.xlu1 %v831_v57 }
0x246f   :  { %v833_v58 = vpop.xlane.xlu1 %832 }
0x2470   :  { %v834_v59 = vrot.slane %v833_v58, 4 }
0x2472   :  { %v835_v60 = vadd.f32 %v834_v59, %v833_v58 }
0x2474   :  { %v836_v61 = vrot.slane %v835_v60, 2 }
0x2476   :  { %v837_v62 = vadd.f32 %v836_v61, %v835_v60 }
0x2478   :  { %v838_v63 = vrot.slane %v837_v62, 1 }
0x247a   :  { %v839_v0 = vadd.f32 %v838_v63, %v837_v62 }
0x247c   :  { %1472 = vpush %v839_v0 }
0x24ad   :  { %s1473_s14 = spop %1472 }
0x24ae   :  { %p841_p0 = scmp.le.f32.partialorder %s1473_s14, 3.0 }
0x24b0   :  { %s1977_s13 = smov (!%p841_p0, %s826_s13), %s1975_s11 }
0x24b1   :  { %s843_s15 = sor.u32 524288, %s1977_s13 }
0x24b2   :  { %v844_v1 = vstv %s843_s15 }
0x24b3   :  { %vm845_vm1 = vcmp.lt.s32.totalorder %v1759_v13, %v844_v1 }
0x24b4   :  { %v1363_v2 = vsel %vm845_vm1, 1.0, %v1576_v51 }
0x24b5   :  { %v848_v3 = vsel %vm37_vm0, %v1363_v2, 0.0 }
0x24b6   :  { %849 = vadd.xlane.f32.xlu0 %v848_v3 }
0x2543   :  { %v850_v4 = vpop.xlane.xlu0 %849 }
0x2544   :  { %v851_v5 = vrot.slane %v850_v4, 4 }
0x2546   :  { %v852_v6 = vadd.f32 %v851_v5, %v850_v4 }
0x2548   :  { %v853_v7 = vrot.slane %v852_v6, 2 }
0x254a   :  { %v854_v8 = vadd.f32 %v853_v7, %v852_v6 }
0x254c   :  { %v855_v9 = vrot.slane %v854_v8, 1 }
0x254e   :  { %v856_v10 = vadd.f32 %v855_v9, %v854_v8 }
0x2550   :  { %1474 = vpush %v856_v10 }
0x2581   :  { %s1475_s16 = spop %1474 }
0x2582   :  { %p858_p1 = scmp.le.f32.partialorder %s1475_s16, 3.0 }
0x2584   :  { %s1979_s15 = smov (!%p858_p1, %s843_s15), %s1977_s13 }
0x2585   :  { %s860_s17 = sor.u32 262144, %s1979_s15 }
0x2586   :  { %v861_v11 = vstv %s860_s17 }
0x2587   :  { %vm862_vm2 = vcmp.lt.s32.totalorder %v1759_v13, %v861_v11 }
0x2588   :  { %v1364_v12 = vsel %vm862_vm2, 1.0, %v1576_v51 }
0x2589   :  { %v865_v50 = vsel %vm37_vm0, %v1364_v12, 0.0 }
0x258a   :  { %866 = vadd.xlane.f32.xlu1 %v865_v50 }
0x2617   :  { %v867_v14 = vpop.xlane.xlu1 %866 }
0x2618   :  { %v868_v15 = vrot.slane %v867_v14, 4 }
0x261a   :  { %v869_v16 = vadd.f32 %v868_v15, %v867_v14 }
0x261c   :  { %v870_v17 = vrot.slane %v869_v16, 2 }
0x261e   :  { %v871_v18 = vadd.f32 %v870_v17, %v869_v16 }
0x2620   :  { %v872_v19 = vrot.slane %v871_v18, 1 }
0x2622   :  { %v873_v20 = vadd.f32 %v872_v19, %v871_v18 }
0x2624   :  { %1476 = vpush %v873_v20 }
0x2655   :  { %s1477_s18 = spop %1476 }
0x2656   :  { %p875_p2 = scmp.le.f32.partialorder %s1477_s18, 3.0 }
0x2658   :  { %s1981_s17 = smov (!%p875_p2, %s860_s17), %s1979_s15 }
0x2659   :  { %s877_s19 = sor.u32 131072, %s1981_s17 }
0x265a   :  { %v878_v21 = vstv %s877_s19 }
0x265b   :  { %vm879_vm3 = vcmp.lt.s32.totalorder %v1759_v13, %v878_v21 }
0x265c   :  { %v1365_v22 = vsel %vm879_vm3, 1.0, %v1576_v51 }
0x265d   :  { %v882_v23 = vsel %vm37_vm0, %v1365_v22, 0.0 }
0x265e   :  { %883 = vadd.xlane.f32.xlu0 %v882_v23 }
0x26eb   :  { %v884_v24 = vpop.xlane.xlu0 %883 }
0x26ec   :  { %v885_v25 = vrot.slane %v884_v24, 4 }
0x26ee   :  { %v886_v26 = vadd.f32 %v885_v25, %v884_v24 }
0x26f0   :  { %v887_v27 = vrot.slane %v886_v26, 2 }
0x26f2   :  { %v888_v28 = vadd.f32 %v887_v27, %v886_v26 }
0x26f4   :  { %v889_v29 = vrot.slane %v888_v28, 1 }
0x26f6   :  { %v890_v30 = vadd.f32 %v889_v29, %v888_v28 }
0x26f8   :  { %1478 = vpush %v890_v30 }
0x2729   :  { %s1479_s21 = spop %1478 }
0x272a   :  { %p892_p3 = scmp.le.f32.partialorder %s1479_s21, 3.0 }
0x272c   :  { %s1983_s19 = smov (!%p892_p3, %s877_s19), %s1981_s17 }
0x272d   :  { %s894_s22 = sor.u32 65536, %s1983_s19 }
0x272e   :  { %v895_v31 = vstv %s894_s22 }
0x272f   :  { %vm896_vm4 = vcmp.lt.s32.totalorder %v1759_v13, %v895_v31 }
0x2730   :  { %v1366_v32 = vsel %vm896_vm4, 1.0, %v1576_v51 }
0x2731   :  { %v899_v33 = vsel %vm37_vm0, %v1366_v32, 0.0 }
0x2732   :  { %900 = vadd.xlane.f32.xlu1 %v899_v33 }
0x27bf   :  { %v901_v34 = vpop.xlane.xlu1 %900 }
0x27c0   :  { %v902_v35 = vrot.slane %v901_v34, 4 }
0x27c2   :  { %v903_v36 = vadd.f32 %v902_v35, %v901_v34 }
0x27c4   :  { %v904_v37 = vrot.slane %v903_v36, 2 }
0x27c6   :  { %v905_v38 = vadd.f32 %v904_v37, %v903_v36 }
0x27c8   :  { %v906_v39 = vrot.slane %v905_v38, 1 }
0x27ca   :  { %v907_v40 = vadd.f32 %v906_v39, %v905_v38 }
0x27cc   :  { %1480 = vpush %v907_v40 }
0x27fd   :  { %s1481_s23 = spop %1480 }
0x27fe   :  { %p909_p4 = scmp.le.f32.partialorder %s1481_s23, 3.0 }
0x2800   :  { %s1985_s22 = smov (!%p909_p4, %s894_s22), %s1983_s19 }
0x2801   :  { %s911_s24 = sor.u32 32768, %s1985_s22 }
0x2802   :  { %v912_v41 = vstv %s911_s24 }
0x2803   :  { %vm913_vm5 = vcmp.lt.s32.totalorder %v1759_v13, %v912_v41 }
0x2804   :  { %v1367_v42 = vsel %vm913_vm5, 1.0, %v1576_v51 }
0x2805   :  { %v916_v43 = vsel %vm37_vm0, %v1367_v42, 0.0 }
0x2806   :  { %917 = vadd.xlane.f32.xlu0 %v916_v43 }
0x2893   :  { %v918_v44 = vpop.xlane.xlu0 %917 }
0x2894   :  { %v919_v45 = vrot.slane %v918_v44, 4 }
0x2896   :  { %v920_v46 = vadd.f32 %v919_v45, %v918_v44 }
0x2898   :  { %v921_v47 = vrot.slane %v920_v46, 2 }
0x289a   :  { %v922_v49 = vadd.f32 %v921_v47, %v920_v46 }
0x289c   :  { %v923_v52 = vrot.slane %v922_v49, 1 }
0x289e   :  { %v924_v53 = vadd.f32 %v923_v52, %v922_v49 }
0x28a0   :  { %1482 = vpush %v924_v53 }
0x28d1   :  { %s1483_s25 = spop %1482 }
0x28d2   :  { %p926_p5 = scmp.le.f32.partialorder %s1483_s25, 3.0 }
0x28d4   :  { %s1987_s24 = smov (!%p926_p5, %s911_s24), %s1985_s22 }
0x28d5   :  { %s928_s26 = sor.u32 16384, %s1987_s24 }
0x28d6   :  { %v929_v54 = vstv %s928_s26 }
0x28d7   :  { %vm930_vm6 = vcmp.lt.s32.totalorder %v1759_v13, %v929_v54 }
0x28d8   :  { %v1368_v55 = vsel %vm930_vm6, 1.0, %v1576_v51 }
0x28d9   :  { %v933_v56 = vsel %vm37_vm0, %v1368_v55, 0.0 }
0x28da   :  { %934 = vadd.xlane.f32.xlu1 %v933_v56 }
0x2967   :  { %v935_v57 = vpop.xlane.xlu1 %934 }
0x2968   :  { %v936_v58 = vrot.slane %v935_v57, 4 }
0x296a   :  { %v937_v59 = vadd.f32 %v936_v58, %v935_v57 }
0x296c   :  { %v938_v60 = vrot.slane %v937_v59, 2 }
0x296e   :  { %v939_v61 = vadd.f32 %v938_v60, %v937_v59 }
0x2970   :  { %v940_v62 = vrot.slane %v939_v61, 1 }
0x2972   :  { %v941_v63 = vadd.f32 %v940_v62, %v939_v61 }
0x2974   :  { %1484 = vpush %v941_v63 }
0x29a5   :  { %s1485_s27 = spop %1484 }
0x29a6   :  { %p943_p6 = scmp.le.f32.partialorder %s1485_s27, 3.0 }
0x29a8   :  { %s1989_s26 = smov (!%p943_p6, %s928_s26), %s1987_s24 }
0x29a9   :  { %s945_s28 = sor.u32 8192, %s1989_s26 }
0x29aa   :  { %v946_v0 = vstv %s945_s28 }
0x29ab   :  { %vm947_vm7 = vcmp.lt.s32.totalorder %v1759_v13, %v946_v0 }
0x29ac   :  { %v1369_v1 = vsel %vm947_vm7, 1.0, %v1576_v51 }
0x29ad   :  { %v950_v2 = vsel %vm37_vm0, %v1369_v1, 0.0 }
0x29ae   :  { %951 = vadd.xlane.f32.xlu0 %v950_v2 }
0x2a3b   :  { %v952_v3 = vpop.xlane.xlu0 %951 }
0x2a3c   :  { %v953_v4 = vrot.slane %v952_v3, 4 }
0x2a3e   :  { %v954_v5 = vadd.f32 %v953_v4, %v952_v3 }
0x2a40   :  { %v955_v6 = vrot.slane %v954_v5, 2 }
0x2a42   :  { %v956_v7 = vadd.f32 %v955_v6, %v954_v5 }
0x2a44   :  { %v957_v8 = vrot.slane %v956_v7, 1 }
0x2a46   :  { %v958_v9 = vadd.f32 %v957_v8, %v956_v7 }
0x2a48   :  { %1486 = vpush %v958_v9 }
0x2a79   :  { %s1487_s29 = spop %1486 }
0x2a7a   :  { %p960_p7 = scmp.le.f32.partialorder %s1487_s29, 3.0 }
0x2a7c   :  { %s1991_s28 = smov (!%p960_p7, %s945_s28), %s1989_s26 }
0x2a7d   :  { %s962_s30 = sor.u32 4096, %s1991_s28 }
0x2a7e   :  { %v963_v10 = vstv %s962_s30 }
0x2a7f   :  { %vm964_vm8 = vcmp.lt.s32.totalorder %v1759_v13, %v963_v10 }
0x2a80   :  { %v1370_v11 = vsel %vm964_vm8, 1.0, %v1576_v51 }
0x2a81   :  { %v967_v12 = vsel %vm37_vm0, %v1370_v11, 0.0 }
0x2a82   :  { %968 = vadd.xlane.f32.xlu1 %v967_v12 }
0x2b0f   :  { %v969_v50 = vpop.xlane.xlu1 %968 }
0x2b10   :  { %v970_v14 = vrot.slane %v969_v50, 4 }
0x2b12   :  { %v971_v15 = vadd.f32 %v970_v14, %v969_v50 }
0x2b14   :  { %v972_v16 = vrot.slane %v971_v15, 2 }
0x2b16   :  { %v973_v17 = vadd.f32 %v972_v16, %v971_v15 }
0x2b18   :  { %v974_v18 = vrot.slane %v973_v17, 1 }
0x2b1a   :  { %v975_v19 = vadd.f32 %v974_v18, %v973_v17 }
0x2b1c   :  { %1488 = vpush %v975_v19 }
0x2b4d   :  { %s1489_s4 = spop %1488 }
0x2b4e   :  { %p977_p8 = scmp.le.f32.partialorder %s1489_s4, 3.0 }
0x2b50   :  { %s1993_s30 = smov (!%p977_p8, %s962_s30), %s1991_s28 }
0x2b51   :  { %s979_s5 = sor.u32 2048, %s1993_s30 }
0x2b52   :  { %v980_v20 = vstv %s979_s5 }
0x2b53   :  { %vm981_vm9 = vcmp.lt.s32.totalorder %v1759_v13, %v980_v20 }
0x2b54   :  { %v1371_v21 = vsel %vm981_vm9, 1.0, %v1576_v51 }
0x2b55   :  { %v984_v22 = vsel %vm37_vm0, %v1371_v21, 0.0 }
0x2b56   :  { %985 = vadd.xlane.f32.xlu0 %v984_v22 }
0x2be3   :  { %v986_v23 = vpop.xlane.xlu0 %985 }
0x2be4   :  { %v987_v24 = vrot.slane %v986_v23, 4 }
0x2be6   :  { %v988_v25 = vadd.f32 %v987_v24, %v986_v23 }
0x2be8   :  { %v989_v26 = vrot.slane %v988_v25, 2 }
0x2bea   :  { %v990_v27 = vadd.f32 %v989_v26, %v988_v25 }
0x2bec   :  { %v991_v28 = vrot.slane %v990_v27, 1 }
0x2bee   :  { %v992_v29 = vadd.f32 %v991_v28, %v990_v27 }
0x2bf0   :  { %1490 = vpush %v992_v29 }
0x2c21   :  { %s1491_s6 = spop %1490 }
0x2c22   :  { %p994_p9 = scmp.le.f32.partialorder %s1491_s6, 3.0 }
0x2c24   :  { %s1995_s5 = smov (!%p994_p9, %s979_s5), %s1993_s30 }
0x2c25   :  { %s996_s7 = sor.u32 1024, %s1995_s5 }
0x2c26   :  { %v997_v30 = vstv %s996_s7 }
0x2c27   :  { %vm998_vm10 = vcmp.lt.s32.totalorder %v1759_v13, %v997_v30 }
0x2c28   :  { %v1372_v31 = vsel %vm998_vm10, 1.0, %v1576_v51 }
0x2c29   :  { %v1001_v32 = vsel %vm37_vm0, %v1372_v31, 0.0 }
0x2c2a   :  { %1002 = vadd.xlane.f32.xlu1 %v1001_v32 }
0x2cb7   :  { %v1003_v33 = vpop.xlane.xlu1 %1002 }
0x2cb8   :  { %v1004_v34 = vrot.slane %v1003_v33, 4 }
0x2cba   :  { %v1005_v35 = vadd.f32 %v1004_v34, %v1003_v33 }
0x2cbc   :  { %v1006_v36 = vrot.slane %v1005_v35, 2 }
0x2cbe   :  { %v1007_v37 = vadd.f32 %v1006_v36, %v1005_v35 }
0x2cc0   :  { %v1008_v38 = vrot.slane %v1007_v37, 1 }
0x2cc2   :  { %v1009_v39 = vadd.f32 %v1008_v38, %v1007_v37 }
0x2cc4   :  { %1492 = vpush %v1009_v39 }
0x2cf5   :  { %s1493_s8 = spop %1492 }
0x2cf6   :  { %p1011_p10 = scmp.le.f32.partialorder %s1493_s8, 3.0 }
0x2cf8   :  { %s1997_s7 = smov (!%p1011_p10, %s996_s7), %s1995_s5 }
0x2cf9   :  { %s1013_s0 = sor.u32 512, %s1997_s7 }
0x2cfa   :  { %v1014_v40 = vstv %s1013_s0 }
0x2cfb   :  { %vm1015_vm11 = vcmp.lt.s32.totalorder %v1759_v13, %v1014_v40 }
0x2cfc   :  { %v1373_v41 = vsel %vm1015_vm11, 1.0, %v1576_v51 }
0x2cfd   :  { %v1018_v42 = vsel %vm37_vm0, %v1373_v41, 0.0 }
0x2cfe   :  { %1019 = vadd.xlane.f32.xlu0 %v1018_v42 }
0x2d8b   :  { %v1020_v43 = vpop.xlane.xlu0 %1019 }
0x2d8c   :  { %v1021_v44 = vrot.slane %v1020_v43, 4 }
0x2d8e   :  { %v1022_v45 = vadd.f32 %v1021_v44, %v1020_v43 }
0x2d90   :  { %v1023_v46 = vrot.slane %v1022_v45, 2 }
0x2d92   :  { %v1024_v47 = vadd.f32 %v1023_v46, %v1022_v45 }
0x2d94   :  { %v1025_v49 = vrot.slane %v1024_v47, 1 }
0x2d96   :  { %v1026_v52 = vadd.f32 %v1025_v49, %v1024_v47 }
0x2d98   :  { %1494 = vpush %v1026_v52 }
0x2dc9   :  { %s1495_s9 = spop %1494 }
0x2dca   :  { %p1028_p11 = scmp.le.f32.partialorder %s1495_s9, 3.0 }
0x2dcc   :  { %s1999_s0 = smov (!%p1028_p11, %s1013_s0), %s1997_s7 }
0x2dcd   :  { %s1030_s10 = sor.u32 256, %s1999_s0 }
0x2dce   :  { %v1031_v53 = vstv %s1030_s10 }
0x2dcf   :  { %vm1032_vm12 = vcmp.lt.s32.totalorder %v1759_v13, %v1031_v53 }
0x2dd0   :  { %v1374_v54 = vsel %vm1032_vm12, 1.0, %v1576_v51 }
0x2dd1   :  { %v1035_v55 = vsel %vm37_vm0, %v1374_v54, 0.0 }
0x2dd2   :  { %1036 = vadd.xlane.f32.xlu1 %v1035_v55 }
0x2e5f   :  { %v1037_v56 = vpop.xlane.xlu1 %1036 }
0x2e60   :  { %v1038_v57 = vrot.slane %v1037_v56, 4 }
0x2e62   :  { %v1039_v58 = vadd.f32 %v1038_v57, %v1037_v56 }
0x2e64   :  { %v1040_v59 = vrot.slane %v1039_v58, 2 }
0x2e66   :  { %v1041_v60 = vadd.f32 %v1040_v59, %v1039_v58 }
0x2e68   :  { %v1042_v61 = vrot.slane %v1041_v60, 1 }
0x2e6a   :  { %v1043_v62 = vadd.f32 %v1042_v61, %v1041_v60 }
0x2e6c   :  { %1496 = vpush %v1043_v62 }
0x2e9d   :  { %s1497_s11 = spop %1496 }
0x2e9e   :  { %p1045_p12 = scmp.le.f32.partialorder %s1497_s11, 3.0 }
0x2ea0   :  { %s2001_s10 = smov (!%p1045_p12, %s1030_s10), %s1999_s0 }
0x2ea1   :  { %s1047_s12 = sor.u32 128, %s2001_s10 }
0x2ea2   :  { %v1048_v63 = vstv %s1047_s12 }
0x2ea3   :  { %vm1049_vm13 = vcmp.lt.s32.totalorder %v1759_v13, %v1048_v63 }
0x2ea4   :  { %v1375_v0 = vsel %vm1049_vm13, 1.0, %v1576_v51 }
0x2ea5   :  { %v1052_v1 = vsel %vm37_vm0, %v1375_v0, 0.0 }
0x2ea6   :  { %1053 = vadd.xlane.f32.xlu0 %v1052_v1 }
0x2f33   :  { %v1054_v2 = vpop.xlane.xlu0 %1053 }
0x2f34   :  { %v1055_v3 = vrot.slane %v1054_v2, 4 }
0x2f36   :  { %v1056_v4 = vadd.f32 %v1055_v3, %v1054_v2 }
0x2f38   :  { %v1057_v5 = vrot.slane %v1056_v4, 2 }
0x2f3a   :  { %v1058_v6 = vadd.f32 %v1057_v5, %v1056_v4 }
0x2f3c   :  { %v1059_v7 = vrot.slane %v1058_v6, 1 }
0x2f3e   :  { %v1060_v8 = vadd.f32 %v1059_v7, %v1058_v6 }
0x2f40   :  { %1498 = vpush %v1060_v8 }
0x2f71   :  { %s1499_s13 = spop %1498 }
0x2f72   :  { %p1062_p13 = scmp.le.f32.partialorder %s1499_s13, 3.0 }
0x2f74   :  { %s2003_s12 = smov (!%p1062_p13, %s1047_s12), %s2001_s10 }
0x2f75   :  { %s1064_s14 = sor.u32 64, %s2003_s12 }
0x2f76   :  { %v1065_v9 = vstv %s1064_s14 }
0x2f77   :  { %vm1066_vm14 = vcmp.lt.s32.totalorder %v1759_v13, %v1065_v9 }
0x2f78   :  { %v1376_v10 = vsel %vm1066_vm14, 1.0, %v1576_v51 }
0x2f79   :  { %v1069_v11 = vsel %vm37_vm0, %v1376_v10, 0.0 }
0x2f7a   :  { %1070 = vadd.xlane.f32.xlu1 %v1069_v11 }
0x3007   :  { %v1071_v12 = vpop.xlane.xlu1 %1070 }
0x3008   :  { %v1072_v50 = vrot.slane %v1071_v12, 4 }
0x300a   :  { %v1073_v14 = vadd.f32 %v1072_v50, %v1071_v12 }
0x300c   :  { %v1074_v15 = vrot.slane %v1073_v14, 2 }
0x300e   :  { %v1075_v16 = vadd.f32 %v1074_v15, %v1073_v14 }
0x3010   :  { %v1076_v17 = vrot.slane %v1075_v16, 1 }
0x3012   :  { %v1077_v18 = vadd.f32 %v1076_v17, %v1075_v16 }
0x3014   :  { %1500 = vpush %v1077_v18 }
0x3045   :  { %s1501_s15 = spop %1500 }
0x3046   :  { %p1079_p0 = scmp.le.f32.partialorder %s1501_s15, 3.0 }
0x3048   :  { %s2005_s14 = smov (!%p1079_p0, %s1064_s14), %s2003_s12  ;;  %s1577_s12 = smov 1.0  }
0x3049   :  { %s1081_s16 = sor.u32 32, %s2005_s14 }
0x304a   :  { %v1082_v19 = vstv %s1081_s16 }
0x304b   :  { %vm1083_vm15 = vcmp.lt.s32.totalorder %v1759_v13, %v1082_v19 }
0x304c   :  { %v1377_v20 = vsel %vm1083_vm15, 1.0, %v1576_v51 }
0x304d   :  { %v1086_v21 = vsel %vm37_vm0, %v1377_v20, 0.0 }
0x304e   :  { %1087 = vadd.xlane.f32.xlu0 %v1086_v21 }
0x30db   :  { %v1088_v22 = vpop.xlane.xlu0 %1087 }
0x30dc   :  { %v1089_v23 = vrot.slane %v1088_v22, 4 }
0x30de   :  { %v1090_v24 = vadd.f32 %v1089_v23, %v1088_v22 }
0x30e0   :  { %v1091_v25 = vrot.slane %v1090_v24, 2 }
0x30e2   :  { %v1092_v26 = vadd.f32 %v1091_v25, %v1090_v24 }
0x30e4   :  { %v1093_v27 = vrot.slane %v1092_v26, 1 }
0x30e6   :  { %v1094_v28 = vadd.f32 %v1093_v27, %v1092_v26 }
0x30e8   :  { %1502 = vpush %v1094_v28 }
0x3119   :  { %s1503_s17 = spop %1502 }
0x311a   :  { %p1096_p1 = scmp.le.f32.partialorder %s1503_s17, 3.0 }
0x311c   :  { %s2007_s16 = smov (!%p1096_p1, %s1081_s16), %s2005_s14  ;;  %s1578_s14 = smov [#allocation5]  }
0x311d   :  { %s1098_s18 = sor.u32 16, %s2007_s16  ;;  %s1303_s15 = sshll.u32 %s1578_s14, 4  ;;  %s1304_s15 = int_to_ptr.vmem [resolvable:$true] %s1303_s15 }
0x311e   :  { %v1099_v29 = vstv %s1098_s18  ;;  %s1542_s17 = scalar_lea.vmem %s1304_s15, 32  ;;  %p1543_p9 = scmp.lt.s32.totalorder %s1304_s15, %s1304_s15 }
0x311f   :  { %vm1100_vm1 = vcmp.lt.s32.totalorder %v1759_v13, %v1099_v29 }
0x3120   :  { %v1378_v30 = vsel %vm1100_vm1, 1.0, %v1576_v51 }
0x3121   :  { %v1103_v31 = vsel %vm37_vm0, %v1378_v30, 0.0 }
0x3122   :  { %1104 = vadd.xlane.f32.xlu1 %v1103_v31  ;;  %v1384_v31 = vclamps-f32 %v1648_v48, 5.0 }
0x3124   :  { %1268 = vst.msk [vmem:[#allocation5] sm:$0x1] %vm37_vm0, %v1384_v31 }
0x31af   :  { %v1105_v32 = vpop.xlane.xlu1 %1104 }
0x31b0   :  { %v1106_v33 = vrot.slane %v1105_v32, 4 }
0x31b2   :  { %v1107_v34 = vadd.f32 %v1106_v33, %v1105_v32 }
0x31b4   :  { %v1108_v35 = vrot.slane %v1107_v34, 2 }
0x31b6   :  { %v1109_v36 = vadd.f32 %v1108_v35, %v1107_v34 }
0x31b8   :  { %v1110_v37 = vrot.slane %v1109_v36, 1 }
0x31ba   :  { %v1111_v38 = vadd.f32 %v1110_v37, %v1109_v36 }
0x31bc   :  { %1504 = vpush %v1111_v38 }
0x31ed   :  { %s1505_s19 = spop %1504 }
0x31ee   :  { %p1113_p2 = scmp.le.f32.partialorder %s1505_s19, 3.0 }
0x31f0   :  { %s2009_s18 = smov (!%p1113_p2, %s1098_s18), %s2007_s16  ;;  %s1538_s16 = scalar_lea.vmem %s1304_s15, 16 }
0x31f1   :  { %s1115_s21 = sor.u32 8, %s2009_s18  ;;  %p1539_p8 = scmp.ne.s32.totalorder %s1304_s15, %s1538_s16 }
0x31f2   :  { %v1116_v39 = vstv %s1115_s21  ;;  %p1544_p10 = scmp.lt.s32.totalorder %s1542_s17, %s1538_s16 }
0x31f3   :  { %vm1117_vm2 = vcmp.lt.s32.totalorder %v1759_v13, %v1116_v39 }
0x31f4   :  { %v1379_v40 = vsel %vm1117_vm2, 1.0, %v1576_v51  ;;  %p1545_p11 = por %p1544_p10, %p1543_p9 }
0x31f5   :  { %v1120_v41 = vsel %vm37_vm0, %v1379_v40, 0.0 }
0x31f6   :  { %1121 = vadd.xlane.f32.xlu0 %v1120_v41  ;;  %p1546_p12 = pnand %p1545_p11, %p1539_p8 }
0x3283   :  { %v1122_v42 = vpop.xlane.xlu0 %1121 }
0x3284   :  { %v1123_v43 = vrot.slane %v1122_v42, 4 }
0x3286   :  { %v1124_v44 = vadd.f32 %v1123_v43, %v1122_v42 }
0x3288   :  { %v1125_v45 = vrot.slane %v1124_v44, 2 }
0x328a   :  { %v1126_v46 = vadd.f32 %v1125_v45, %v1124_v44 }
0x328c   :  { %v1127_v47 = vrot.slane %v1126_v46, 1 }
0x328e   :  { %v1128_v49 = vadd.f32 %v1127_v47, %v1126_v46 }
0x3290   :  { %1506 = vpush %v1128_v49 }
0x32c1   :  { %s1507_s22 = spop %1506 }
0x32c2   :  { %p1130_p3 = scmp.le.f32.partialorder %s1507_s22, 3.0 }
0x32c4   :  { %s2011_s21 = smov (!%p1130_p3, %s1115_s21), %s2009_s18 }
0x32c5   :  { %s1132_s23 = sor.u32 4, %s2011_s21 }
0x32c6   :  { %v1133_v52 = vstv %s1132_s23 }
0x32c7   :  { %vm1134_vm3 = vcmp.lt.s32.totalorder %v1759_v13, %v1133_v52 }
0x32c8   :  { %v1380_v53 = vsel %vm1134_vm3, 1.0, %v1576_v51 }
0x32c9   :  { %v1137_v54 = vsel %vm37_vm0, %v1380_v53, 0.0 }
0x32ca   :  { %1138 = vadd.xlane.f32.xlu1 %v1137_v54 }
0x3357   :  { %v1139_v55 = vpop.xlane.xlu1 %1138 }
0x3358   :  { %v1140_v56 = vrot.slane %v1139_v55, 4 }
0x335a   :  { %v1141_v57 = vadd.f32 %v1140_v56, %v1139_v55 }
0x335c   :  { %v1142_v58 = vrot.slane %v1141_v57, 2 }
0x335e   :  { %v1143_v59 = vadd.f32 %v1142_v58, %v1141_v57 }
0x3360   :  { %v1144_v60 = vrot.slane %v1143_v59, 1 }
0x3362   :  { %v1145_v61 = vadd.f32 %v1144_v60, %v1143_v59 }
0x3364   :  { %1508 = vpush %v1145_v61 }
0x3395   :  { %s1509_s24 = spop %1508 }
0x3396   :  { %p1147_p4 = scmp.le.f32.partialorder %s1509_s24, 3.0 }
0x3398   :  { %s2013_s23 = smov (!%p1147_p4, %s1132_s23), %s2011_s21 }
0x3399   :  { %s1149_s25 = sor.u32 2, %s2013_s23 }
0x339a   :  { %v1150_v62 = vstv %s1149_s25 }
0x339b   :  { %vm1151_vm4 = vcmp.lt.s32.totalorder %v1759_v13, %v1150_v62 }
0x339c   :  { %v1381_v63 = vsel %vm1151_vm4, 1.0, %v1576_v51 }
0x339d   :  { %v1154_v0 = vsel %vm37_vm0, %v1381_v63, 0.0 }
0x339e   :  { %1155 = vadd.xlane.f32.xlu0 %v1154_v0 }
0x342b   :  { %v1156_v1 = vpop.xlane.xlu0 %1155 }
0x342c   :  { %v1157_v2 = vrot.slane %v1156_v1, 4 }
0x342e   :  { %v1158_v3 = vadd.f32 %v1157_v2, %v1156_v1 }
0x3430   :  { %v1159_v4 = vrot.slane %v1158_v3, 2 }
0x3432   :  { %v1160_v5 = vadd.f32 %v1159_v4, %v1158_v3 }
0x3434   :  { %v1161_v6 = vrot.slane %v1160_v5, 1 }
0x3436   :  { %v1162_v7 = vadd.f32 %v1161_v6, %v1160_v5 }
0x3438   :  { %1510 = vpush %v1162_v7 }
0x3469   :  { %s1511_s26 = spop %1510 }
0x346a   :  { %p1164_p5 = scmp.le.f32.partialorder %s1511_s26, 3.0 }
0x346c   :  { %s2015_s25 = smov (!%p1164_p5, %s1149_s25), %s2013_s23 }
0x346d   :  { %s1166_s27 = sor.u32 1, %s2015_s25 }
0x346e   :  { %v1167_v8 = vstv %s1166_s27 }
0x346f   :  { %vm1168_vm5 = vcmp.lt.s32.totalorder %v1759_v13, %v1167_v8 }
0x3470   :  { %v1382_v9 = vsel %vm1168_vm5, 1.0, %v1576_v51 }
0x3471   :  { %v1171_v10 = vsel %vm37_vm0, %v1382_v9, 0.0 }
0x3472   :  { %1172 = vadd.xlane.f32.xlu1 %v1171_v10 }
0x34ff   :  { %v1173_v11 = vpop.xlane.xlu1 %1172 }
0x3500   :  { %v1174_v12 = vrot.slane %v1173_v11, 4 }
0x3502   :  { %v1175_v50 = vadd.f32 %v1174_v12, %v1173_v11 }
0x3504   :  { %v1176_v14 = vrot.slane %v1175_v50, 2 }
0x3506   :  { %v1177_v15 = vadd.f32 %v1176_v14, %v1175_v50 }
0x3508   :  { %v1178_v16 = vrot.slane %v1177_v15, 1 }
0x350a   :  { %v1179_v17 = vadd.f32 %v1178_v16, %v1177_v15 }
0x350c   :  { %1512 = vpush %v1179_v17 }
0x353d   :  { %s1513_s28 = spop %1512 }
0x353e   :  { %p1181_p6 = scmp.le.f32.partialorder %s1513_s28, 3.0 }
0x3540   :  { %s2017_s27 = smov (!%p1181_p6, %s1166_s27), %s2015_s25 }
0x3541   :  { %v1183_v18 = vstv %s2017_s27 }
0x3542   :  { %vm1184_vm6 = vcmp.le.s32.totalorder %v1759_v13, %v1183_v18 }
0x3543   :  { %v1185_v19 = vsel %vm1184_vm6, %v1759_v13, -inf }
0x3544   :  { %v1186_v20 = vsel %vm37_vm0, %v1185_v19, -inf }
0x3545   :  { %1187 = vmax.xlane.f32.xlu0 %v1186_v20 }
0x35d2   :  { %v1188_v21 = vpop.xlane.xlu0 %1187 }
0x35d3   :  { %v1189_v22 = vrot.slane %v1188_v21, 4 }
0x35d5   :  { %v1190_v23 = vmax.f32 %v1188_v21, %v1189_v22 }
0x35d7   :  { %v1191_v24 = vrot.slane %v1190_v23, 2 }
0x35d9   :  { %v1192_v25 = vmax.f32 %v1190_v23, %v1191_v24 }
0x35db   :  { %v1193_v26 = vrot.slane %v1192_v25, 1 }
0x35dd   :  { %v1194_v27 = vmax.f32 %v1192_v25, %v1193_v26 }
0x35df   :  { %1514 = vpush %v1194_v27 }
0x3610   :  { %s1515_s29 = spop %1514 }
0x3611   :  { %s1196_s30 = smul.f32 10.0, %s1515_s29  ;;  %1281 = sst [smem:[#allocation2 + $0x5]] %s1515_s29 }
0x3613   :  { %s1197_s4 = ssub.f32 %s1754_s20, %s1196_s30 }
0x3614   :  { %s1198_s5 = sadd.f32 %s1754_s20, %s1196_s30 }
0x3615   :  { %v1199_v28 = vstv %s1197_s4 }
0x3616   :  { %v1201_v29 = vstv %s1198_s5  ;;  %vm1200_vm7 = vcmp.ge.f32.partialorder %v1648_v48, %v1199_v28 }
0x3617   :  { %vm1202_vm8 = vcmp.le.f32.partialorder %v1648_v48, %v1201_v29 }
0x3618   :  { %vm1203_vm9 = vmand %vm1200_vm7, %vm1202_vm8 }
0x3619   :  { %v1383_v13 = vsel %vm1203_vm9, 1.0, %v1576_v51 }
0x361a   :  { %v1206_v30 = vsel %vm37_vm0, %v1383_v13, 0.0 }
0x361b   :  { %1207 = vadd.xlane.f32.xlu1 %v1206_v30 }
0x36a8   :  { %v1208_v32 = vpop.xlane.xlu1 %1207 }
0x36a9   :  { %v1209_v33 = vrot.slane %v1208_v32, 4 }
0x36ab   :  { %v1210_v34 = vadd.f32 %v1209_v33, %v1208_v32 }
0x36ad   :  { %v1211_v35 = vrot.slane %v1210_v34, 2 }
0x36af   :  { %v1212_v36 = vadd.f32 %v1211_v35, %v1210_v34 }
0x36b1   :  { %v1213_v37 = vrot.slane %v1212_v36, 1 }
0x36b3   :  { %v1214_v38 = vadd.f32 %v1213_v37, %v1212_v36 }
0x36b5   :  { %1516 = vpush %v1214_v38 }
0x36e6   :  { %s1517_s20 = spop %1516 }
0x36e7   :  { %p1216_p7 = scmp.gt.f32.partialorder %s1517_s20, 0.0 }
0x36e9   :  { %s1217_s6 = scalar_select %p1216_p7, 1, 0 }
0x36ea   :  { %s2019_s20 = smov (!%p1216_p7, %s1517_s20), 8.0 }
0x36eb   :  { %v1218_v51 = vstv %s1217_s6  ;;  %s1282_s7 = ssub.f32 8.0, %s2019_s20  ;;  %v1235_v41 = vstv %s2019_s20 }
0x36ec   :  { %vm1219_vm10 = vcmp.eq.s32.totalorder %v1218_v51, 1  ;;  %1286 = sst [smem:[#allocation2 + $0x7]] %s2019_s20  ;;  %1532 = vrcp.f32 %v1235_v41 }
0x36ed   :  { %v1220_v48 = vsel %vm1219_vm10, %v1383_v13, 1.0  ;;  %1284 = sst [smem:[#allocation2 + $0x6]] %s1282_s7 }
0x36ee   :  { %v1224_v39 = vmul.f32 %v1384_v31, %v1220_v48  ;;  %1269 = vst.msk [vmem:[%s1895_s3] sm:$0x1] %vm37_vm0, %v1220_v48  ;;  %s1385_s11 = sadd.f32 -1.0, %s2019_s20 }
0x36f0   :  { %v1225_v40 = vsel %vm37_vm0, %v1224_v39, 0.0  ;;  %s1254_s13 = smax.f32 %s1577_s12, %s1385_s11 }
0x36f1   :  { %1226 = vadd.xlane.f32.xlu0 %v1225_v40  ;;  %v1255_v59 = vstv %s1254_s13 }
0x36f2   :  { %1534 = vrcp.f32 %v1255_v59 }
0x36f6   :  { %v1533_v52 = vpop.eup %1532 }
0x377e   :  { %v1227_v42 = vpop.xlane.xlu0 %1226 }
0x377f   :  { %v1228_v43 = vrot.slane %v1227_v42, 4 }
0x3781   :  { %v1229_v44 = vadd.f32 %v1228_v43, %v1227_v42 }
0x3783   :  { %v1230_v45 = vrot.slane %v1229_v44, 2 }
0x3785   :  { %v1231_v46 = vadd.f32 %v1230_v45, %v1229_v44 }
0x3787   :  { %v1232_v47 = vrot.slane %v1231_v46, 1 }
0x3789   :  { %v1233_v49 = vadd.f32 %v1232_v47, %v1231_v46 }
0x378b   :  { %1518 = vpush %v1233_v49 }
0x378c   :  { %1520 = vpush %v1533_v52 }
0x37bc   :  { %s1519_s9 = spop %1518 }
0x37bd   :  { %s1521_s10 = spop %1520 }
0x37be   :  { %s1238_s3 = smul.f32 %s1521_s10, %s1519_s9 }
0x37c0   :  { %v1239_v53 = vstv %s1238_s3  ;;  %1271 = sst [smem:[#allocation2]] %s1238_s3 }
0x37c1   :  { %1273 = sst [smem:[#allocation2 + $0x1]] %s1238_s3  ;;  %v1240_v54 = vsub.f32 %v1384_v31, %v1239_v53 }
0x37c3   :  { %v1241_v55 = vmul.f32 %v1240_v54, %v1240_v54 }
0x37c5   :  { %v1242_v56 = vmul.f32 %v1241_v55, %v1220_v48 }
0x37c7   :  { %v1243_v57 = vsel %vm37_vm0, %v1242_v56, 0.0 }
0x37c8   :  { %1244 = vadd.xlane.f32.xlu1 %v1243_v57 }
0x3855   :  { %v1245_v58 = vpop.xlane.xlu1 %1244 }
0x3856   :  { %v1246_v60 = vrot.slane %v1245_v58, 4 }
0x3858   :  { %v1247_v61 = vadd.f32 %v1246_v60, %v1245_v58 }
0x385a   :  { %v1248_v62 = vrot.slane %v1247_v61, 2 }
0x385c   :  { %v1249_v63 = vadd.f32 %v1248_v62, %v1247_v61 }
0x385d   :  { %1549 = shalt.err (!%p1546_p12)
}
0x385e   :  { %s1550_s21 = scalar_lea.hbm %s1894_s2, 16 }
0x385f   :  { %p1551_p13 = scmp.ne.s32.totalorder %s1894_s2, %s1550_s21  ;;  %p1554_p0 = scmp.lt.u32.totalorder %s1550_s21, %s1894_s2 }
0x3861   :  { %p1556_p1 = pnand %p1554_p0, %p1551_p13 }
0x3863   :  { %1559 = shalt.err (!%p1556_p1)
}
0x3864   :  { %1306 = dma.vmem_to_hbm [thread:$0]  %s1304_s15, 16, %s1894_s2, [#allocation3]   ;;  %v1250_v0 = vrot.slane %v1249_v63, 1  ;;  %v1535_v2 = vpop.eup %1534 }
0x3865   :  { %s1293_s5 = sshll.u32 %s1893_s1, 4  ;;  %s1294_s5 = int_to_ptr.vmem [resolvable:$true] %s1293_s5 }
0x3866   :  { %v1251_v1 = vadd.f32 %v1250_v0, %v1249_v63  ;;  %s1560_s6 = scalar_lea.vmem %s1294_s5, 16  ;;  %p1565_p3 = scmp.lt.s32.totalorder %s1294_s5, %s1294_s5 }
0x3867   :  { %p1561_p2 = scmp.ne.s32.totalorder %s1294_s5, %s1560_s6  ;;  %p1566_p4 = scmp.lt.s32.totalorder %s1560_s6, %s1560_s6 }
0x3868   :  { %1522 = vpush %v1251_v1 }
0x3869   :  { %1524 = vpush %v1535_v2  ;;  %p1567_p5 = por %p1566_p4, %p1565_p3 }
0x386b   :  { %p1568_p6 = pnand %p1567_p5, %p1561_p2 }
0x3899   :  { %s1523_s28 = spop %1522 }
0x389a   :  { %s1525_s29 = spop %1524 }
0x389b   :  { %s1258_s30 = smul.f32 %s1525_s29, %s1523_s28 }
0x389d   :  { %v1259_v3 = vstv %s1258_s30  ;;  %1275 = sst [smem:[#allocation2 + $0x2]] %s1258_s30 }
0x389e   :  { %1536 = vrsqrt.f32 %v1259_v3  ;;  %vm1262_vm0 = vcmp.eq.f32.partialorder %v1259_v3, inf  ;;  %v1265_v6 = vand.u32 2147483648, %v1259_v3  ;;  %vm1264_vm11 = vcmp.eq.f32.partialorder %v1259_v3, 0.0 }
0x38a8   :  { %v1537_v4 = vpop.eup %1536 }
0x38a9   :  { %v1261_v5 = vmul.f32 %v1537_v4, %v1259_v3 }
0x38ab   :  { %v1263_v7 = vsel %vm1262_vm0, %v1259_v3, %v1261_v5 }
0x38ac   :  { %v1266_v8 = vsel %vm1264_vm11, %v1265_v6, %v1263_v7 }
0x38ad   :  { %1526 = vpush %v1266_v8 }
0x38de   :  { %s1527_s20 = spop %1526 }
0x38df   :  { %1277 = sst [smem:[#allocation2 + $0x3]] %s1527_s20 }
0x38e0   :  { %1571 = shalt.err (!%p1568_p6)
}
0x38e1   :  { %s1579_s7 = smov [#allocation2]  }
0x38e2   :  { %1296 = dma.smem_to_vmem %s1579_s7, 16, %s1294_s5, [#allocation4]  }
0x38e3   :  { %1572 = dma.done.wait [#allocation4], 16  }
0x38e4   :  { %1573 = vsyncadd [#allocation4], 4294967280 }
0x38e5   :  { %1574 = dma.done.wait [#allocation3], 16  }
0x38e6   :  { %1575 = vsyncadd [#allocation3], 4294967280 }
0x38e7   :  { %1317 = sfence }
0x38e8   :  { %1318 = vsyncpa [#allocation3], 1 }
0x38e9   :  { %1319 = vsyncpa [#allocation4], 1 }

</bundles_post_ra>
